<compile_context>
chip_gen: v7x
topology: tpu7x:2x2x1
jax: 0.10.0
libtpu: 0.0.40
codegen_flags: <defaults>
</compile_context>

<pallas_src>
import functools

import numpy as np
import jax
import jax.numpy as jnp
from jax.experimental import pallas as pl
from jax.experimental.pallas import tpu as pltpu


# ----------------------------------------------------------------------------
# weight / constant preprocessing (hoisted out of the forward path)
# ----------------------------------------------------------------------------

def _tap_layer1(K1):
    """(48, 128) tap matrix for conv1 (Cin=1), consuming UNPADDED width-16 input.

    t[dy*16 + wi, w*8 + co] = K1[co, 0, dy, wi - w + 1]  (width padding handled
    by simply dropping out-of-range taps)."""
    K1 = np.asarray(K1, np.float32)
    t = np.zeros((3, 16, 128), np.float32)
    for dy in range(3):
        for w in range(16):
            for dx in range(3):
                wi = w + dx - 1
                if 0 <= wi < 16:
                    t[dy, wi, w * 8:(w + 1) * 8] = K1[:, 0, dy, dx]
    return t.reshape(48, 128)


def _tap_padded(K, S):
    """(3*(S+2)*Cin, S*Cout) tap matrix; input lanes are the width-padded
    (wp, ci) layout emitted by the previous layer's width-pool matrix; the
    three dy blocks are stacked on the contraction axis (single fat matmul)."""
    K = np.asarray(K, np.float32)
    Cout, Cin = K.shape[0], K.shape[1]
    t = np.zeros((3, (S + 2) * Cin, S * Cout), np.float32)
    for dy in range(3):
        for w in range(S):
            for dx in range(3):
                wp = w + dx
                t[dy, wp * Cin:(wp + 1) * Cin, w * Cout:(w + 1) * Cout] = \
                    K[:, :, dy, dx].T
    return t.reshape(3 * (S + 2) * Cin, S * Cout)


def _pool_cols(S, C, pad):
    """(S*C, (S//2 + 2*pad)*C): 2x width avg-pool (channel-minor layout),
    optionally also emitting the next layer's zero-padded width columns."""
    So = S // 2
    M = np.zeros((S * C, (So + 2 * pad) * C), np.float32)
    for wo in range(So):
        wp = wo + pad
        for c in range(C):
            M[(2 * wo) * C + c, wp * C + c] = 0.5
            M[(2 * wo + 1) * C + c, wp * C + c] = 0.5
    return M


def _pool_rows(Nb, S):
    """(Nb*(S//2), Nb*S): plain 2x average pooling over rows (block-diag)."""
    So = S // 2
    M = np.zeros((Nb * So, Nb * S), np.float32)
    for n in range(Nb):
        for h in range(So):
            M[n * So + h, n * S + 2 * h] = 0.5
            M[n * So + h, n * S + 2 * h + 1] = 0.5
    return M


def _pool_rows_final(B, D):
    """(B*D*2, B*D*4): final row pool, with output rows reordered to
    (d*2 + hh)*B + b so the fc flatten is a lane-concat of contiguous row
    blocks inside the kernel (no strided row gathers)."""
    M = np.zeros((B * D * 2, B * D * 4), np.float32)
    for b in range(B):
        for d in range(D):
            n = b * D + d
            for hh in range(2):
                r = (d * 2 + hh) * B + b
                M[r, n * 4 + 2 * hh] = 0.5
                M[r, n * 4 + 2 * hh + 1] = 0.5
    return M


def prepare(params, B, D):
    """Precompute everything that only depends on weights / shapes.
    Call once per weight update, NOT per forward."""
    bf16 = jnp.bfloat16
    Nb = B * D
    assert params["W1"].shape[1] == D * 128, "fc1 expects 32*D*2*2 features"

    # torch flatten index (c-major: (B,32,D,2,2).view) for each kernel-native
    # lane (native = d*128 + hh*64 + ww*32 + c); used to permute fc1's rows so
    # fc1 consumes the native layout directly.
    nat = np.arange(D * 128)
    d_, r_ = nat // 128, nat % 128
    hh_, ww_, c_ = r_ // 64, (r_ % 64) // 32, r_ % 32
    torch_of_native = c_ * (D * 4) + d_ * 4 + hh_ * 2 + ww_
    w1perm = np.asarray(params["W1"], np.float32).T[torch_of_native]   # (768, 192)

    return {
        "t1": jnp.asarray(_tap_layer1(params["K1"]), bf16),            # (48, 128)
        "t2": jnp.asarray(_tap_padded(params["K2"], 8), bf16),         # (240, 128)
        "t3": jnp.asarray(_tap_padded(params["K3"], 4), bf16),         # (288, 128)
        "cb1": jnp.asarray(np.tile(np.asarray(params["b1"], np.float32), 16).reshape(1, 128)),
        "cb2": jnp.asarray(np.tile(np.asarray(params["b2"], np.float32), 8).reshape(1, 128)),
        "cb3": jnp.asarray(np.tile(np.asarray(params["b3"], np.float32), 4).reshape(1, 128)),
        "pw1": jnp.asarray(_pool_cols(16, 8, 1), bf16),                # (128, 80)
        "pw2": jnp.asarray(_pool_cols(8, 16, 1), bf16),                # (128, 96)
        "pw3": jnp.asarray(_pool_cols(4, 32, 0), bf16),                # (128, 64)
        "p1": jnp.asarray(_pool_rows(Nb, 16), bf16),                   # (Nb*8, Nb*16)
        "p2": jnp.asarray(_pool_rows(Nb, 8), bf16),                    # (Nb*4, Nb*8)
        "p3": jnp.asarray(_pool_rows_final(B, D), bf16),               # (Nb*2, Nb*4)
        "w1p": jnp.asarray(w1perm, bf16),                              # (768, 192)
        "bf1": jnp.asarray(np.asarray(params["bf1"], np.float32).reshape(1, -1)),
        "w3t": jnp.asarray(np.asarray(params["W3"], np.float32).T, bf16),   # (192, 5)
        "bf3": jnp.asarray(np.asarray(params["bf3"], np.float32).reshape(1, -1)),
    }


# ----------------------------------------------------------------------------
# fused kernel: conv1 + conv2 + conv3 + fc1 + sigmoid + fc3 + softmax
# ----------------------------------------------------------------------------

def _cnn_kernel(x_ref, t1_ref, cb1_ref, pw1_ref, p1_ref,
                t2_ref, cb2_ref, pw2_ref, p2_ref,
                t3_ref, cb3_ref, pw3_ref, p3_ref,
                w1_ref, bf1_ref, w3_ref, bf3_ref,
                prob_ref, pred_ref, fc_ref, *, B, D):
    bf16 = jnp.bfloat16

    def mm(a, b):
        # bf16 MXU matmul with f32 accumulation
        return jnp.dot(a.astype(bf16), b.astype(bf16),
                       preferred_element_type=jnp.float32)

    def shift3(p, h):
        """lanes <- [row h-1 | row h | row h+1], zero across per-sample row
        boundaries (== the conv's (0,1,1) row padding), built entirely in VMEM."""
        rows, lanes = p.shape
        zrow = jnp.zeros((1, lanes), p.dtype)
        up = jnp.concatenate([zrow, p[:rows - 1, :]], axis=0)    # row h-1
        dn = jnp.concatenate([p[1:, :], zrow], axis=0)           # row h+1
        hloc = jax.lax.broadcasted_iota(jnp.int32, (rows, 1), 0) & (h - 1)
        up = jnp.where(hloc == 0, 0.0, up)
        dn = jnp.where(hloc == h - 1, 0.0, dn)
        return jnp.concatenate([up, p, dn], axis=-1)

    # ---- layer 1: conv(1->8, 3x3, pad 1) + bias + ReLU      rows = (b, d, h) ----
    y1 = jnp.maximum(mm(shift3(x_ref[...], 16), t1_ref[...]) + cb1_ref[...], 0.0)
    # 2x2 avg-pool: width via pw1 (also emits layer-2's zero-pad cols), rows via p1
    a1 = mm(p1_ref[...], mm(y1, pw1_ref[...]))                   # (Nb*8, 80)

    # ---- layer 2: conv(8->16) + bias + ReLU + 2x2 avg-pool ----
    y2 = jnp.maximum(mm(shift3(a1, 8), t2_ref[...]) + cb2_ref[...], 0.0)
    a2 = mm(p2_ref[...], mm(y2, pw2_ref[...]))                   # (Nb*4, 96)

    # ---- layer 3: conv(16->32) + bias + ReLU + 2x2 avg-pool ----
    y3 = jnp.maximum(mm(shift3(a2, 4), t3_ref[...]) + cb3_ref[...], 0.0)
    a3 = mm(p3_ref[...], mm(y3, pw3_ref[...]))                   # (D*2*B, 64)

    # ---- flatten to the kernel-native lane-dense (B, D*128) layout ----
    # a3 rows are ordered (d*2+hh)*B + b, so per-(d,hh) blocks are contiguous.
    fc_nat = jnp.concatenate([a3[j * B:(j + 1) * B, :] for j in range(2 * D)],
                             axis=-1)                            # (B, 768)
    fc_ref[...] = fc_nat

    # ---- fc1 + numerically stable sigmoid (w1 rows pre-permuted to native) ----
    z1 = mm(fc_nat, w1_ref[...]) + bf1_ref[...]                  # (B, 192)
    e1 = jnp.exp(-jnp.abs(z1))
    h1 = jnp.where(z1 >= 0, 1.0 / (1.0 + e1), e1 / (1.0 + e1))

    # ---- fc3 + softmax over dim=1 ----
    z3 = mm(h1, w3_ref[...]) + bf3_ref[...]                      # (B, 5)
    pred_ref[...] = z3                                           # raw fc3 logits
    mx = jnp.max(z3, axis=-1, keepdims=True)
    ex = jnp.exp(z3 - mx)
    prob_ref[...] = ex / jnp.sum(ex, axis=-1, keepdims=True)


# ----------------------------------------------------------------------------
# pallas_call wrapper and full forward
# ----------------------------------------------------------------------------

def _full_spec(shape):
    zeros = (0,) * len(shape)
    return pl.BlockSpec(shape, lambda i, _z=zeros: _z)


def _cnn_pallas(x2d, prep, B, D):
    args = (x2d,
            prep["t1"], prep["cb1"], prep["pw1"], prep["p1"],
            prep["t2"], prep["cb2"], prep["pw2"], prep["p2"],
            prep["t3"], prep["cb3"], prep["pw3"], prep["p3"],
            prep["w1p"], prep["bf1"], prep["w3t"], prep["bf3"])
    out_shapes = (jax.ShapeDtypeStruct((B, 5), jnp.float32),        # prob
                  jax.ShapeDtypeStruct((B, 5), jnp.float32),        # pred (logits)
                  jax.ShapeDtypeStruct((B, D * 128), jnp.float32))  # fc_full (native order)
    return pl.pallas_call(
        functools.partial(_cnn_kernel, B=B, D=D),
        out_shape=out_shapes,
        grid=(1,),
        in_specs=[_full_spec(a.shape) for a in args],
        out_specs=tuple(_full_spec(s.shape) for s in out_shapes),
        compiler_params=pltpu.CompilerParams(dimension_semantics=("arbitrary",)),
    )(*args)


def cnn_forward(x, prep):
    # x: (B, 1, D, 16, 16) NCDHW; the depth kernel is 1 so depth acts as batch.
    B, _, D, H, W = x.shape
    x2d = x[:, 0].reshape(B * D * H, W)          # contiguous -> free reshape
    prob, pred, fc_nat = _cnn_pallas(x2d, prep, B, D)
    # TODO(synk): torch's c-major flatten ((B,32,D,2,2).view) needs a
    # lane<->sublane transpose that the conv matmuls cannot emit cheaply; this
    # 6 KB output-formatting permute (NOT on the prob/pred path — fc1 consumes
    # the native layout in-kernel via pre-permuted weights) stays in XLA.
    fc_full = (fc_nat.reshape(B, D, 2, 2, 32)
                     .transpose(0, 4, 1, 2, 3)
                     .reshape(B, D * 128))
    return prob, pred, fc_full


def init_params(key):
    ks = jax.random.split(key, 10)
    s = 0.1
    return {
        "K1": jax.random.normal(ks[0], (8, 1, 3, 3), jnp.float32) * s,
        "b1": jax.random.normal(ks[1], (8,), jnp.float32) * s,
        "K2": jax.random.normal(ks[2], (16, 8, 3, 3), jnp.float32) * s,
        "b2": jax.random.normal(ks[3], (16,), jnp.float32) * s,
        "K3": jax.random.normal(ks[4], (32, 16, 3, 3), jnp.float32) * s,
        "b3": jax.random.normal(ks[5], (32,), jnp.float32) * s,
        "W1": jax.random.normal(ks[6], (192, 768), jnp.float32) * s,
        "bf1": jax.random.normal(ks[7], (192,), jnp.float32) * s,
        "W3": jax.random.normal(ks[8], (5, 192), jnp.float32) * s,
        "bf3": jax.random.normal(ks[9], (5,), jnp.float32) * s,
    }


if __name__ == "__main__":
    key = jax.random.PRNGKey(0)
    kx, kp = jax.random.split(key)
    B, D = 2, 6                       # 32 * D * 2 * 2 = 768 -> matches fc1(768, 192)
    x = jax.random.normal(kx, (B, 1, D, 16, 16), jnp.float32)
    params = init_params(kp)

    prep = prepare(params, B, D)      # hoisted: built once per weight update
    fwd = jax.jit(cnn_forward)
    prob, pred, fc_full = fwd(x, prep)
    jax.block_until_ready((prob, pred, fc_full))

    assert prob.shape == (B, 5) and pred.shape == (B, 5) and fc_full.shape == (B, 768)
    print("KERNEL_OK")
</pallas_src>

<mosaic_0001>
module attributes {stable_mosaic.version = 11 : i64} {
  func.func @_cnn_kernel(%arg0: i32, %arg1: memref<192x16xf32, #tpu.memory_space<vmem>>, %arg2: memref<48x128xbf16, #tpu.memory_space<vmem>>, %arg3: memref<1x128xf32, #tpu.memory_space<vmem>>, %arg4: memref<128x80xbf16, #tpu.memory_space<vmem>>, %arg5: memref<96x192xbf16, #tpu.memory_space<vmem>>, %arg6: memref<240x128xbf16, #tpu.memory_space<vmem>>, %arg7: memref<1x128xf32, #tpu.memory_space<vmem>>, %arg8: memref<128x96xbf16, #tpu.memory_space<vmem>>, %arg9: memref<48x96xbf16, #tpu.memory_space<vmem>>, %arg10: memref<288x128xbf16, #tpu.memory_space<vmem>>, %arg11: memref<1x128xf32, #tpu.memory_space<vmem>>, %arg12: memref<128x64xbf16, #tpu.memory_space<vmem>>, %arg13: memref<24x48xbf16, #tpu.memory_space<vmem>>, %arg14: memref<768x192xbf16, #tpu.memory_space<vmem>>, %arg15: memref<1x192xf32, #tpu.memory_space<vmem>>, %arg16: memref<192x5xbf16, #tpu.memory_space<vmem>>, %arg17: memref<1x5xf32, #tpu.memory_space<vmem>>, %arg18: memref<2x5xf32, #tpu.memory_space<vmem>>, %arg19: memref<2x5xf32, #tpu.memory_space<vmem>>, %arg20: memref<2x768xf32, #tpu.memory_space<vmem>>) attributes {dimension_semantics = [#tpu.dimension_semantics<arbitrary>], iteration_bounds = array<i64: 1>, scalar_prefetch = 0 : i64, scratch_operands = 0 : i64, tpu.core_type = #tpu.core_type<tc>, window_params = [{pipeline_mode = #tpu.pipeline_mode<synchronous>, transform_indices = @transform_0, window_bounds = array<i64: 192, 16>}, {pipeline_mode = #tpu.pipeline_mode<synchronous>, transform_indices = @transform_1, window_bounds = array<i64: 48, 128>}, {pipeline_mode = #tpu.pipeline_mode<synchronous>, transform_indices = @transform_2, window_bounds = array<i64: 1, 128>}, {pipeline_mode = #tpu.pipeline_mode<synchronous>, transform_indices = @transform_3, window_bounds = array<i64: 128, 80>}, {pipeline_mode = #tpu.pipeline_mode<synchronous>, transform_indices = @transform_4, window_bounds = array<i64: 96, 192>}, {pipeline_mode = #tpu.pipeline_mode<synchronous>, transform_indices = @transform_5, window_bounds = array<i64: 240, 128>}, {pipeline_mode = #tpu.pipeline_mode<synchronous>, transform_indices = @transform_6, window_bounds = array<i64: 1, 128>}, {pipeline_mode = #tpu.pipeline_mode<synchronous>, transform_indices = @transform_7, window_bounds = array<i64: 128, 96>}, {pipeline_mode = #tpu.pipeline_mode<synchronous>, transform_indices = @transform_8, window_bounds = array<i64: 48, 96>}, {pipeline_mode = #tpu.pipeline_mode<synchronous>, transform_indices = @transform_9, window_bounds = array<i64: 288, 128>}, {pipeline_mode = #tpu.pipeline_mode<synchronous>, transform_indices = @transform_10, window_bounds = array<i64: 1, 128>}, {pipeline_mode = #tpu.pipeline_mode<synchronous>, transform_indices = @transform_11, window_bounds = array<i64: 128, 64>}, {pipeline_mode = #tpu.pipeline_mode<synchronous>, transform_indices = @transform_12, window_bounds = array<i64: 24, 48>}, {pipeline_mode = #tpu.pipeline_mode<synchronous>, transform_indices = @transform_13, window_bounds = array<i64: 768, 192>}, {pipeline_mode = #tpu.pipeline_mode<synchronous>, transform_indices = @transform_14, window_bounds = array<i64: 1, 192>}, {pipeline_mode = #tpu.pipeline_mode<synchronous>, transform_indices = @transform_15, window_bounds = array<i64: 192, 5>}, {pipeline_mode = #tpu.pipeline_mode<synchronous>, transform_indices = @transform_16, window_bounds = array<i64: 1, 5>}, {pipeline_mode = #tpu.pipeline_mode<synchronous>, transform_indices = @transform_17, window_bounds = array<i64: 2, 5>}, {pipeline_mode = #tpu.pipeline_mode<synchronous>, transform_indices = @transform_18, window_bounds = array<i64: 2, 5>}, {pipeline_mode = #tpu.pipeline_mode<synchronous>, transform_indices = @transform_19, window_bounds = array<i64: 2, 768>}]} {
    %c0 = arith.constant 0 : index
    %c0_0 = arith.constant 0 : index
    %0 = vector.load %arg1[%c0, %c0_0] : memref<192x16xf32, #tpu.memory_space<vmem>>, vector<192x16xf32>
    %cst = arith.constant 0.000000e+00 : f32
    %1 = vector.broadcast %cst : f32 to vector<1x16xf32>
    %2 = vector.extract_strided_slice %0 {offsets = [0, 0], sizes = [191, 16], strides = [1, 1]} : vector<192x16xf32> to vector<191x16xf32>
    %3 = tpu.concatenate %1, %2 in 0 : vector<1x16xf32>, vector<191x16xf32> -> vector<192x16xf32>
    %4 = vector.extract_strided_slice %0 {offsets = [1, 0], sizes = [191, 16], strides = [1, 1]} : vector<192x16xf32> to vector<191x16xf32>
    %5 = tpu.concatenate %4, %1 in 0 : vector<191x16xf32>, vector<1x16xf32> -> vector<192x16xf32>
    %6 = tpu.iota {dimensions = array<i32: 0>} : vector<192x1xi32>
    %c15_i32 = arith.constant 15 : i32
    %7 = vector.broadcast %c15_i32 : i32 to vector<192x1xi32>
    %8 = arith.andi %6, %7 : vector<192x1xi32>
    %c0_i32 = arith.constant 0 : i32
    %9 = vector.broadcast %c0_i32 : i32 to vector<192x1xi32>
    %10 = arith.cmpi eq, %8, %9 : vector<192x1xi32>
    %cst_1 = arith.constant 0.000000e+00 : f32
    %11 = vector.shape_cast %10 : vector<192x1xi1> to vector<192x1xi1>
    %12 = vector.broadcast %11 : vector<192x1xi1> to vector<192x16xi1>
    %13 = vector.broadcast %cst_1 : f32 to vector<192x16xf32>
    %14 = arith.select %12, %13, %3 : vector<192x16xi1>, vector<192x16xf32>
    %c15_i32_2 = arith.constant 15 : i32
    %15 = vector.broadcast %c15_i32_2 : i32 to vector<192x1xi32>
    %16 = arith.cmpi eq, %8, %15 : vector<192x1xi32>
    %cst_3 = arith.constant 0.000000e+00 : f32
    %17 = vector.shape_cast %16 : vector<192x1xi1> to vector<192x1xi1>
    %18 = vector.broadcast %17 : vector<192x1xi1> to vector<192x16xi1>
    %19 = vector.broadcast %cst_3 : f32 to vector<192x16xf32>
    %20 = arith.select %18, %19, %5 : vector<192x16xi1>, vector<192x16xf32>
    %21 = tpu.concatenate %14, %0, %20 in 1 : vector<192x16xf32>, vector<192x16xf32>, vector<192x16xf32> -> vector<192x48xf32>
    %c0_4 = arith.constant 0 : index
    %c0_5 = arith.constant 0 : index
    %22 = vector.load %arg2[%c0_4, %c0_5] : memref<48x128xbf16, #tpu.memory_space<vmem>>, vector<48x128xbf16>
    %23 = arith.truncf %21 : vector<192x48xf32> to vector<192x48xbf16>
    %cst_6 = arith.constant dense<0.000000e+00> : vector<192x128xf32>
    %24 = tpu.matmul %23, %22, %cst_6 {dimension_numbers = #tpu.dot_dimension_numbers<[1], [0], [0], [1], [0, 0, 1, 1], [], []>} : vector<192x48xbf16>, vector<48x128xbf16>, vector<192x128xf32> -> vector<192x128xf32>
    %c0_7 = arith.constant 0 : index
    %c0_8 = arith.constant 0 : index
    %25 = vector.load %arg3[%c0_7, %c0_8] : memref<1x128xf32, #tpu.memory_space<vmem>>, vector<1x128xf32>
    %26 = vector.broadcast %25 : vector<1x128xf32> to vector<192x128xf32>
    %27 = arith.addf %24, %26 : vector<192x128xf32>
    %cst_9 = arith.constant 0.000000e+00 : f32
    %28 = vector.broadcast %cst_9 : f32 to vector<192x128xf32>
    %29 = arith.maximumf %27, %28 : vector<192x128xf32>
    %c0_10 = arith.constant 0 : index
    %c0_11 = arith.constant 0 : index
    %30 = vector.load %arg5[%c0_10, %c0_11] : memref<96x192xbf16, #tpu.memory_space<vmem>>, vector<96x192xbf16>
    %c0_12 = arith.constant 0 : index
    %c0_13 = arith.constant 0 : index
    %31 = vector.load %arg4[%c0_12, %c0_13] : memref<128x80xbf16, #tpu.memory_space<vmem>>, vector<128x80xbf16>
    %32 = arith.truncf %29 : vector<192x128xf32> to vector<192x128xbf16>
    %cst_14 = arith.constant dense<0.000000e+00> : vector<192x80xf32>
    %33 = tpu.matmul %32, %31, %cst_14 {dimension_numbers = #tpu.dot_dimension_numbers<[1], [0], [0], [1], [0, 0, 1, 1], [], []>} : vector<192x128xbf16>, vector<128x80xbf16>, vector<192x80xf32> -> vector<192x80xf32>
    %34 = arith.truncf %33 : vector<192x80xf32> to vector<192x80xbf16>
    %cst_15 = arith.constant dense<0.000000e+00> : vector<96x80xf32>
    %35 = tpu.matmul %30, %34, %cst_15 {dimension_numbers = #tpu.dot_dimension_numbers<[1], [0], [0], [1], [0, 0, 1, 1], [], []>} : vector<96x192xbf16>, vector<192x80xbf16>, vector<96x80xf32> -> vector<96x80xf32>
    %cst_16 = arith.constant 0.000000e+00 : f32
    %36 = vector.broadcast %cst_16 : f32 to vector<1x80xf32>
    %37 = vector.extract_strided_slice %35 {offsets = [0, 0], sizes = [95, 80], strides = [1, 1]} : vector<96x80xf32> to vector<95x80xf32>
    %38 = tpu.concatenate %36, %37 in 0 : vector<1x80xf32>, vector<95x80xf32> -> vector<96x80xf32>
    %39 = vector.extract_strided_slice %35 {offsets = [1, 0], sizes = [95, 80], strides = [1, 1]} : vector<96x80xf32> to vector<95x80xf32>
    %40 = tpu.concatenate %39, %36 in 0 : vector<95x80xf32>, vector<1x80xf32> -> vector<96x80xf32>
    %41 = tpu.iota {dimensions = array<i32: 0>} : vector<96x1xi32>
    %c7_i32 = arith.constant 7 : i32
    %42 = vector.broadcast %c7_i32 : i32 to vector<96x1xi32>
    %43 = arith.andi %41, %42 : vector<96x1xi32>
    %c0_i32_17 = arith.constant 0 : i32
    %44 = vector.broadcast %c0_i32_17 : i32 to vector<96x1xi32>
    %45 = arith.cmpi eq, %43, %44 : vector<96x1xi32>
    %cst_18 = arith.constant 0.000000e+00 : f32
    %46 = vector.shape_cast %45 : vector<96x1xi1> to vector<96x1xi1>
    %47 = vector.broadcast %46 : vector<96x1xi1> to vector<96x80xi1>
    %48 = vector.broadcast %cst_18 : f32 to vector<96x80xf32>
    %49 = arith.select %47, %48, %38 : vector<96x80xi1>, vector<96x80xf32>
    %c7_i32_19 = arith.constant 7 : i32
    %50 = vector.broadcast %c7_i32_19 : i32 to vector<96x1xi32>
    %51 = arith.cmpi eq, %43, %50 : vector<96x1xi32>
    %cst_20 = arith.constant 0.000000e+00 : f32
    %52 = vector.shape_cast %51 : vector<96x1xi1> to vector<96x1xi1>
    %53 = vector.broadcast %52 : vector<96x1xi1> to vector<96x80xi1>
    %54 = vector.broadcast %cst_20 : f32 to vector<96x80xf32>
    %55 = arith.select %53, %54, %40 : vector<96x80xi1>, vector<96x80xf32>
    %56 = tpu.concatenate %49, %35, %55 in 1 : vector<96x80xf32>, vector<96x80xf32>, vector<96x80xf32> -> vector<96x240xf32>
    %c0_21 = arith.constant 0 : index
    %c0_22 = arith.constant 0 : index
    %57 = vector.load %arg6[%c0_21, %c0_22] : memref<240x128xbf16, #tpu.memory_space<vmem>>, vector<240x128xbf16>
    %58 = arith.truncf %56 : vector<96x240xf32> to vector<96x240xbf16>
    %cst_23 = arith.constant dense<0.000000e+00> : vector<96x128xf32>
    %59 = tpu.matmul %58, %57, %cst_23 {dimension_numbers = #tpu.dot_dimension_numbers<[1], [0], [0], [1], [0, 0, 1, 1], [], []>} : vector<96x240xbf16>, vector<240x128xbf16>, vector<96x128xf32> -> vector<96x128xf32>
    %c0_24 = arith.constant 0 : index
    %c0_25 = arith.constant 0 : index
    %60 = vector.load %arg7[%c0_24, %c0_25] : memref<1x128xf32, #tpu.memory_space<vmem>>, vector<1x128xf32>
    %61 = vector.broadcast %60 : vector<1x128xf32> to vector<96x128xf32>
    %62 = arith.addf %59, %61 : vector<96x128xf32>
    %cst_26 = arith.constant 0.000000e+00 : f32
    %63 = vector.broadcast %cst_26 : f32 to vector<96x128xf32>
    %64 = arith.maximumf %62, %63 : vector<96x128xf32>
    %c0_27 = arith.constant 0 : index
    %c0_28 = arith.constant 0 : index
    %65 = vector.load %arg9[%c0_27, %c0_28] : memref<48x96xbf16, #tpu.memory_space<vmem>>, vector<48x96xbf16>
    %c0_29 = arith.constant 0 : index
    %c0_30 = arith.constant 0 : index
    %66 = vector.load %arg8[%c0_29, %c0_30] : memref<128x96xbf16, #tpu.memory_space<vmem>>, vector<128x96xbf16>
    %67 = arith.truncf %64 : vector<96x128xf32> to vector<96x128xbf16>
    %cst_31 = arith.constant dense<0.000000e+00> : vector<96x96xf32>
    %68 = tpu.matmul %67, %66, %cst_31 {dimension_numbers = #tpu.dot_dimension_numbers<[1], [0], [0], [1], [0, 0, 1, 1], [], []>} : vector<96x128xbf16>, vector<128x96xbf16>, vector<96x96xf32> -> vector<96x96xf32>
    %69 = arith.truncf %68 : vector<96x96xf32> to vector<96x96xbf16>
    %cst_32 = arith.constant dense<0.000000e+00> : vector<48x96xf32>
    %70 = tpu.matmul %65, %69, %cst_32 {dimension_numbers = #tpu.dot_dimension_numbers<[1], [0], [0], [1], [0, 0, 1, 1], [], []>} : vector<48x96xbf16>, vector<96x96xbf16>, vector<48x96xf32> -> vector<48x96xf32>
    %cst_33 = arith.constant 0.000000e+00 : f32
    %71 = vector.broadcast %cst_33 : f32 to vector<1x96xf32>
    %72 = vector.extract_strided_slice %70 {offsets = [0, 0], sizes = [47, 96], strides = [1, 1]} : vector<48x96xf32> to vector<47x96xf32>
    %73 = tpu.concatenate %71, %72 in 0 : vector<1x96xf32>, vector<47x96xf32> -> vector<48x96xf32>
    %74 = vector.extract_strided_slice %70 {offsets = [1, 0], sizes = [47, 96], strides = [1, 1]} : vector<48x96xf32> to vector<47x96xf32>
    %75 = tpu.concatenate %74, %71 in 0 : vector<47x96xf32>, vector<1x96xf32> -> vector<48x96xf32>
    %76 = tpu.iota {dimensions = array<i32: 0>} : vector<48x1xi32>
    %c3_i32 = arith.constant 3 : i32
    %77 = vector.broadcast %c3_i32 : i32 to vector<48x1xi32>
    %78 = arith.andi %76, %77 : vector<48x1xi32>
    %c0_i32_34 = arith.constant 0 : i32
    %79 = vector.broadcast %c0_i32_34 : i32 to vector<48x1xi32>
    %80 = arith.cmpi eq, %78, %79 : vector<48x1xi32>
    %cst_35 = arith.constant 0.000000e+00 : f32
    %81 = vector.shape_cast %80 : vector<48x1xi1> to vector<48x1xi1>
    %82 = vector.broadcast %81 : vector<48x1xi1> to vector<48x96xi1>
    %83 = vector.broadcast %cst_35 : f32 to vector<48x96xf32>
    %84 = arith.select %82, %83, %73 : vector<48x96xi1>, vector<48x96xf32>
    %c3_i32_36 = arith.constant 3 : i32
    %85 = vector.broadcast %c3_i32_36 : i32 to vector<48x1xi32>
    %86 = arith.cmpi eq, %78, %85 : vector<48x1xi32>
    %cst_37 = arith.constant 0.000000e+00 : f32
    %87 = vector.shape_cast %86 : vector<48x1xi1> to vector<48x1xi1>
    %88 = vector.broadcast %87 : vector<48x1xi1> to vector<48x96xi1>
    %89 = vector.broadcast %cst_37 : f32 to vector<48x96xf32>
    %90 = arith.select %88, %89, %75 : vector<48x96xi1>, vector<48x96xf32>
    %91 = tpu.concatenate %84, %70, %90 in 1 : vector<48x96xf32>, vector<48x96xf32>, vector<48x96xf32> -> vector<48x288xf32>
    %c0_38 = arith.constant 0 : index
    %c0_39 = arith.constant 0 : index
    %92 = vector.load %arg10[%c0_38, %c0_39] : memref<288x128xbf16, #tpu.memory_space<vmem>>, vector<288x128xbf16>
    %93 = arith.truncf %91 : vector<48x288xf32> to vector<48x288xbf16>
    %cst_40 = arith.constant dense<0.000000e+00> : vector<48x128xf32>
    %94 = tpu.matmul %93, %92, %cst_40 {dimension_numbers = #tpu.dot_dimension_numbers<[1], [0], [0], [1], [0, 0, 1, 1], [], []>} : vector<48x288xbf16>, vector<288x128xbf16>, vector<48x128xf32> -> vector<48x128xf32>
    %c0_41 = arith.constant 0 : index
    %c0_42 = arith.constant 0 : index
    %95 = vector.load %arg11[%c0_41, %c0_42] : memref<1x128xf32, #tpu.memory_space<vmem>>, vector<1x128xf32>
    %96 = vector.broadcast %95 : vector<1x128xf32> to vector<48x128xf32>
    %97 = arith.addf %94, %96 : vector<48x128xf32>
    %cst_43 = arith.constant 0.000000e+00 : f32
    %98 = vector.broadcast %cst_43 : f32 to vector<48x128xf32>
    %99 = arith.maximumf %97, %98 : vector<48x128xf32>
    %c0_44 = arith.constant 0 : index
    %c0_45 = arith.constant 0 : index
    %100 = vector.load %arg13[%c0_44, %c0_45] : memref<24x48xbf16, #tpu.memory_space<vmem>>, vector<24x48xbf16>
    %c0_46 = arith.constant 0 : index
    %c0_47 = arith.constant 0 : index
    %101 = vector.load %arg12[%c0_46, %c0_47] : memref<128x64xbf16, #tpu.memory_space<vmem>>, vector<128x64xbf16>
    %102 = arith.truncf %99 : vector<48x128xf32> to vector<48x128xbf16>
    %cst_48 = arith.constant dense<0.000000e+00> : vector<48x64xf32>
    %103 = tpu.matmul %102, %101, %cst_48 {dimension_numbers = #tpu.dot_dimension_numbers<[1], [0], [0], [1], [0, 0, 1, 1], [], []>} : vector<48x128xbf16>, vector<128x64xbf16>, vector<48x64xf32> -> vector<48x64xf32>
    %104 = arith.truncf %103 : vector<48x64xf32> to vector<48x64xbf16>
    %cst_49 = arith.constant dense<0.000000e+00> : vector<24x64xf32>
    %105 = tpu.matmul %100, %104, %cst_49 {dimension_numbers = #tpu.dot_dimension_numbers<[1], [0], [0], [1], [0, 0, 1, 1], [], []>} : vector<24x48xbf16>, vector<48x64xbf16>, vector<24x64xf32> -> vector<24x64xf32>
    %106 = vector.extract_strided_slice %105 {offsets = [0, 0], sizes = [2, 64], strides = [1, 1]} : vector<24x64xf32> to vector<2x64xf32>
    %107 = vector.extract_strided_slice %105 {offsets = [2, 0], sizes = [2, 64], strides = [1, 1]} : vector<24x64xf32> to vector<2x64xf32>
    %108 = vector.extract_strided_slice %105 {offsets = [4, 0], sizes = [2, 64], strides = [1, 1]} : vector<24x64xf32> to vector<2x64xf32>
    %109 = vector.extract_strided_slice %105 {offsets = [6, 0], sizes = [2, 64], strides = [1, 1]} : vector<24x64xf32> to vector<2x64xf32>
    %110 = vector.extract_strided_slice %105 {offsets = [8, 0], sizes = [2, 64], strides = [1, 1]} : vector<24x64xf32> to vector<2x64xf32>
    %111 = vector.extract_strided_slice %105 {offsets = [10, 0], sizes = [2, 64], strides = [1, 1]} : vector<24x64xf32> to vector<2x64xf32>
    %112 = vector.extract_strided_slice %105 {offsets = [12, 0], sizes = [2, 64], strides = [1, 1]} : vector<24x64xf32> to vector<2x64xf32>
    %113 = vector.extract_strided_slice %105 {offsets = [14, 0], sizes = [2, 64], strides = [1, 1]} : vector<24x64xf32> to vector<2x64xf32>
    %114 = vector.extract_strided_slice %105 {offsets = [16, 0], sizes = [2, 64], strides = [1, 1]} : vector<24x64xf32> to vector<2x64xf32>
    %115 = vector.extract_strided_slice %105 {offsets = [18, 0], sizes = [2, 64], strides = [1, 1]} : vector<24x64xf32> to vector<2x64xf32>
    %116 = vector.extract_strided_slice %105 {offsets = [20, 0], sizes = [2, 64], strides = [1, 1]} : vector<24x64xf32> to vector<2x64xf32>
    %117 = vector.extract_strided_slice %105 {offsets = [22, 0], sizes = [2, 64], strides = [1, 1]} : vector<24x64xf32> to vector<2x64xf32>
    %118 = tpu.concatenate %106, %107, %108, %109, %110, %111, %112, %113, %114, %115, %116, %117 in 1 : vector<2x64xf32>, vector<2x64xf32>, vector<2x64xf32>, vector<2x64xf32>, vector<2x64xf32>, vector<2x64xf32>, vector<2x64xf32>, vector<2x64xf32>, vector<2x64xf32>, vector<2x64xf32>, vector<2x64xf32>, vector<2x64xf32> -> vector<2x768xf32>
    %c0_50 = arith.constant 0 : index
    %c0_51 = arith.constant 0 : index
    %119 = vector.load %arg20[%c0_50, %c0_51] : memref<2x768xf32, #tpu.memory_space<vmem>>, vector<2x768xf32>
    tpu.vector_store %arg20[%c0_50, %c0_51], %118 {strides = array<i32>} : memref<2x768xf32, #tpu.memory_space<vmem>>, vector<2x768xf32>,
    %c0_52 = arith.constant 0 : index
    %c0_53 = arith.constant 0 : index
    %120 = vector.load %arg14[%c0_52, %c0_53] : memref<768x192xbf16, #tpu.memory_space<vmem>>, vector<768x192xbf16>
    %121 = arith.truncf %118 : vector<2x768xf32> to vector<2x768xbf16>
    %cst_54 = arith.constant dense<0.000000e+00> : vector<2x192xf32>
    %122 = tpu.matmul %121, %120, %cst_54 {dimension_numbers = #tpu.dot_dimension_numbers<[1], [0], [0], [1], [0, 0, 1, 1], [], []>} : vector<2x768xbf16>, vector<768x192xbf16>, vector<2x192xf32> -> vector<2x192xf32>
    %c0_55 = arith.constant 0 : index
    %c0_56 = arith.constant 0 : index
    %123 = vector.load %arg15[%c0_55, %c0_56] : memref<1x192xf32, #tpu.memory_space<vmem>>, vector<1x192xf32>
    %124 = vector.broadcast %123 : vector<1x192xf32> to vector<2x192xf32>
    %125 = arith.addf %122, %124 : vector<2x192xf32>
    %126 = math.absf %125 : vector<2x192xf32>
    %cst_57 = arith.constant 0.000000e+00 : f32
    %127 = vector.broadcast %cst_57 : f32 to vector<2x192xf32>
    %128 = arith.subf %127, %126 : vector<2x192xf32>
    %129 = math.exp %128 : vector<2x192xf32>
    %cst_58 = arith.constant 0.000000e+00 : f32
    %130 = vector.broadcast %cst_58 : f32 to vector<2x192xf32>
    %131 = arith.cmpf oge, %125, %130 : vector<2x192xf32>
    %cst_59 = arith.constant 1.000000e+00 : f32
    %132 = vector.broadcast %cst_59 : f32 to vector<2x192xf32>
    %133 = arith.addf %132, %129 : vector<2x192xf32>
    %cst_60 = arith.constant 1.000000e+00 : f32
    %134 = vector.broadcast %cst_60 : f32 to vector<2x192xf32>
    %135 = arith.divf %134, %133 : vector<2x192xf32>
    %cst_61 = arith.constant 1.000000e+00 : f32
    %136 = vector.broadcast %cst_61 : f32 to vector<2x192xf32>
    %137 = arith.addf %136, %129 : vector<2x192xf32>
    %138 = arith.divf %129, %137 : vector<2x192xf32>
    %139 = arith.select %131, %135, %138 : vector<2x192xi1>, vector<2x192xf32>
    %c0_62 = arith.constant 0 : index
    %c0_63 = arith.constant 0 : index
    %140 = vector.load %arg16[%c0_62, %c0_63] : memref<192x5xbf16, #tpu.memory_space<vmem>>, vector<192x5xbf16>
    %141 = arith.truncf %139 : vector<2x192xf32> to vector<2x192xbf16>
    %cst_64 = arith.constant dense<0.000000e+00> : vector<2x5xf32>
    %142 = tpu.matmul %141, %140, %cst_64 {dimension_numbers = #tpu.dot_dimension_numbers<[1], [0], [0], [1], [0, 0, 1, 1], [], []>} : vector<2x192xbf16>, vector<192x5xbf16>, vector<2x5xf32> -> vector<2x5xf32>
    %c0_65 = arith.constant 0 : index
    %c0_66 = arith.constant 0 : index
    %143 = vector.load %arg17[%c0_65, %c0_66] : memref<1x5xf32, #tpu.memory_space<vmem>>, vector<1x5xf32>
    %144 = vector.broadcast %143 : vector<1x5xf32> to vector<2x5xf32>
    %145 = arith.addf %142, %144 : vector<2x5xf32>
    %c0_67 = arith.constant 0 : index
    %c0_68 = arith.constant 0 : index
    %146 = vector.load %arg19[%c0_67, %c0_68] : memref<2x5xf32, #tpu.memory_space<vmem>>, vector<2x5xf32>
    tpu.vector_store %arg19[%c0_67, %c0_68], %145 {strides = array<i32>} : memref<2x5xf32, #tpu.memory_space<vmem>>, vector<2x5xf32>,
    %cst_69 = arith.constant dense<0xFF800000> : vector<2xf32>
    %147 = vector.multi_reduction <maximumf>, %145, %cst_69 [1] : vector<2x5xf32> to vector<2xf32>
    %148 = vector.shape_cast %147 : vector<2xf32> to vector<2x1xf32>
    %149 = vector.broadcast %148 : vector<2x1xf32> to vector<2x5xf32>
    %150 = arith.subf %145, %149 : vector<2x5xf32>
    %151 = math.exp %150 : vector<2x5xf32>
    %cst_70 = arith.constant dense<0.000000e+00> : vector<2xf32>
    %152 = vector.multi_reduction <add>, %151, %cst_70 [1] : vector<2x5xf32> to vector<2xf32>
    %153 = vector.shape_cast %152 : vector<2xf32> to vector<2x1xf32>
    %154 = vector.broadcast %153 : vector<2x1xf32> to vector<2x5xf32>
    %155 = arith.divf %151, %154 : vector<2x5xf32>
    %c0_71 = arith.constant 0 : index
    %c0_72 = arith.constant 0 : index
    %156 = vector.load %arg18[%c0_71, %c0_72] : memref<2x5xf32, #tpu.memory_space<vmem>>, vector<2x5xf32>
    tpu.vector_store %arg18[%c0_71, %c0_72], %155 {strides = array<i32>} : memref<2x5xf32, #tpu.memory_space<vmem>>, vector<2x5xf32>,
    return
  }
  func.func @transform_0(%arg0: i32) -> (i32, i32) {
    %c0_i32 = arith.constant 0 : i32
    %c0_i32_0 = arith.constant 0 : i32
    %c0_i32_1 = arith.constant 0 : i32
    return %c0_i32, %c0_i32_0 : i32, i32
  }
  func.func @transform_1(%arg0: i32) -> (i32, i32) {
    %c0_i32 = arith.constant 0 : i32
    %c0_i32_0 = arith.constant 0 : i32
    %c0_i32_1 = arith.constant 0 : i32
    return %c0_i32, %c0_i32_0 : i32, i32
  }
  func.func @transform_2(%arg0: i32) -> (i32, i32) {
    %c0_i32 = arith.constant 0 : i32
    %c0_i32_0 = arith.constant 0 : i32
    %c0_i32_1 = arith.constant 0 : i32
    return %c0_i32, %c0_i32_0 : i32, i32
  }
  func.func @transform_3(%arg0: i32) -> (i32, i32) {
    %c0_i32 = arith.constant 0 : i32
    %c0_i32_0 = arith.constant 0 : i32
    %c0_i32_1 = arith.constant 0 : i32
    return %c0_i32, %c0_i32_0 : i32, i32
  }
  func.func @transform_4(%arg0: i32) -> (i32, i32) {
    %c0_i32 = arith.constant 0 : i32
    %c0_i32_0 = arith.constant 0 : i32
    %c0_i32_1 = arith.constant 0 : i32
    return %c0_i32, %c0_i32_0 : i32, i32
  }
  func.func @transform_5(%arg0: i32) -> (i32, i32) {
    %c0_i32 = arith.constant 0 : i32
    %c0_i32_0 = arith.constant 0 : i32
    %c0_i32_1 = arith.constant 0 : i32
    return %c0_i32, %c0_i32_0 : i32, i32
  }
  func.func @transform_6(%arg0: i32) -> (i32, i32) {
    %c0_i32 = arith.constant 0 : i32
    %c0_i32_0 = arith.constant 0 : i32
    %c0_i32_1 = arith.constant 0 : i32
    return %c0_i32, %c0_i32_0 : i32, i32
  }
  func.func @transform_7(%arg0: i32) -> (i32, i32) {
    %c0_i32 = arith.constant 0 : i32
    %c0_i32_0 = arith.constant 0 : i32
    %c0_i32_1 = arith.constant 0 : i32
    return %c0_i32, %c0_i32_0 : i32, i32
  }
  func.func @transform_8(%arg0: i32) -> (i32, i32) {
    %c0_i32 = arith.constant 0 : i32
    %c0_i32_0 = arith.constant 0 : i32
    %c0_i32_1 = arith.constant 0 : i32
    return %c0_i32, %c0_i32_0 : i32, i32
  }
  func.func @transform_9(%arg0: i32) -> (i32, i32) {
    %c0_i32 = arith.constant 0 : i32
    %c0_i32_0 = arith.constant 0 : i32
    %c0_i32_1 = arith.constant 0 : i32
    return %c0_i32, %c0_i32_0 : i32, i32
  }
  func.func @transform_10(%arg0: i32) -> (i32, i32) {
    %c0_i32 = arith.constant 0 : i32
    %c0_i32_0 = arith.constant 0 : i32
    %c0_i32_1 = arith.constant 0 : i32
    return %c0_i32, %c0_i32_0 : i32, i32
  }
  func.func @transform_11(%arg0: i32) -> (i32, i32) {
    %c0_i32 = arith.constant 0 : i32
    %c0_i32_0 = arith.constant 0 : i32
    %c0_i32_1 = arith.constant 0 : i32
    return %c0_i32, %c0_i32_0 : i32, i32
  }
  func.func @transform_12(%arg0: i32) -> (i32, i32) {
    %c0_i32 = arith.constant 0 : i32
    %c0_i32_0 = arith.constant 0 : i32
    %c0_i32_1 = arith.constant 0 : i32
    return %c0_i32, %c0_i32_0 : i32, i32
  }
  func.func @transform_13(%arg0: i32) -> (i32, i32) {
    %c0_i32 = arith.constant 0 : i32
    %c0_i32_0 = arith.constant 0 : i32
    %c0_i32_1 = arith.constant 0 : i32
    return %c0_i32, %c0_i32_0 : i32, i32
  }
  func.func @transform_14(%arg0: i32) -> (i32, i32) {
    %c0_i32 = arith.constant 0 : i32
    %c0_i32_0 = arith.constant 0 : i32
    %c0_i32_1 = arith.constant 0 : i32
    return %c0_i32, %c0_i32_0 : i32, i32
  }
  func.func @transform_15(%arg0: i32) -> (i32, i32) {
    %c0_i32 = arith.constant 0 : i32
    %c0_i32_0 = arith.constant 0 : i32
    %c0_i32_1 = arith.constant 0 : i32
    return %c0_i32, %c0_i32_0 : i32, i32
  }
  func.func @transform_16(%arg0: i32) -> (i32, i32) {
    %c0_i32 = arith.constant 0 : i32
    %c0_i32_0 = arith.constant 0 : i32
    %c0_i32_1 = arith.constant 0 : i32
    return %c0_i32, %c0_i32_0 : i32, i32
  }
  func.func @transform_17(%arg0: i32) -> (i32, i32) {
    %c0_i32 = arith.constant 0 : i32
    %c0_i32_0 = arith.constant 0 : i32
    %c0_i32_1 = arith.constant 0 : i32
    return %c0_i32, %c0_i32_0 : i32, i32
  }
  func.func @transform_18(%arg0: i32) -> (i32, i32) {
    %c0_i32 = arith.constant 0 : i32
    %c0_i32_0 = arith.constant 0 : i32
    %c0_i32_1 = arith.constant 0 : i32
    return %c0_i32, %c0_i32_0 : i32, i32
  }
  func.func @transform_19(%arg0: i32) -> (i32, i32) {
    %c0_i32 = arith.constant 0 : i32
    %c0_i32_0 = arith.constant 0 : i32
    %c0_i32_1 = arith.constant 0 : i32
    return %c0_i32, %c0_i32_0 : i32, i32
  }
}

</mosaic_0001>

<bundles_post_ra>
// kernel: cnn_forward.1
= control target key start
LH: loop header
LB: loop body
LE: loop exit
PB: predicated region body
PF: predicated region fallthrough
CT: control target
= control target key end

     0   :  { %s6640_s0 = inlined_call_operand.vmem [shape: f32[192,16], index: 0, kind: input, shape index: {}]   ;;  %s6641_s1 = inlined_call_operand.vmem [shape: bf16[48,128], index: 1, kind: input, shape index: {}]   ;;  %s6642_s2 = inlined_call_operand.vmem [shape: f32[1,128], index: 2, kind: input, shape index: {}]   ;;  %s6643_s3 = inlined_call_operand.vmem [shape: bf16[128,80], index: 3, kind: input, shape index: {}]   ;;  %s6644_s4 = inlined_call_operand.vmem [shape: bf16[96,192], index: 4, kind: input, shape index: {}]   ;;  %s6645_s5 = inlined_call_operand.vmem [shape: bf16[240,128], index: 5, kind: input, shape index: {}]   ;;  %s6646_s6 = inlined_call_operand.vmem [shape: f32[1,128], index: 6, kind: input, shape index: {}]   ;;  %s6647_s7 = inlined_call_operand.vmem [shape: bf16[128,96], index: 7, kind: input, shape index: {}]   ;;  %s6648_s8 = inlined_call_operand.vmem [shape: bf16[48,96], index: 8, kind: input, shape index: {}]   ;;  %s6649_s9 = inlined_call_operand.vmem [shape: bf16[288,128], index: 9, kind: input, shape index: {}]   ;;  %s6650_s10 = inlined_call_operand.vmem [shape: f32[1,128], index: 10, kind: input, shape index: {}]   ;;  %s6651_s11 = inlined_call_operand.vmem [shape: bf16[128,64], index: 11, kind: input, shape index: {}]   ;;  %s6652_s12 = inlined_call_operand.vmem [shape: bf16[24,48], index: 12, kind: input, shape index: {}]   ;;  %s6653_s13 = inlined_call_operand.vmem [shape: bf16[768,192], index: 13, kind: input, shape index: {}]   ;;  %s6654_s14 = inlined_call_operand.vmem [shape: f32[1,192], index: 14, kind: input, shape index: {}]   ;;  %s6655_s15 = inlined_call_operand.vmem [shape: bf16[192,5], index: 15, kind: input, shape index: {}]   ;;  %s6656_s16 = inlined_call_operand.vmem [shape: f32[1,5], index: 16, kind: input, shape index: {}]   ;;  %s6657_s17 = inlined_call_operand.hbm [shape: f32[2,5], index: 17, kind: output, shape index: {0}]   ;;  %s6658_s18 = inlined_call_operand.hbm [shape: f32[2,5], index: 18, kind: output, shape index: {1}]   ;;  %s6659_s19 = inlined_call_operand.vmem [shape: f32[2,768], index: 19, kind: output, shape index: {2}]  }
   0x1   :  { %6672 = sst [smem:[#allocation8_spill]] %s6640_s0 }
   0x2   :  { %6673 = sst [smem:[#allocation9_spill]] %s6641_s1 }
   0x3   :  { %6674 = sst [smem:[#allocation10_spill]] %s6642_s2 }
   0x4   :  { %6675 = sst [smem:[#allocation11_spill]] %s6643_s3 }
   0x5   :  { %25 = vsyncpa [#allocation3], 0  ;;  %s6676_s20 = sld [smem:[#allocation8_spill]]  ;;  %v256_v3 = vlaneseq  ;;  %s4804_s28 = smov 16   ;;  %vm6666_vm0 = vcmask 1046528   ;;  %vm6667_vm10 = vcmask 1040384  }
   0x6   :  { %s6677_s27 = sld [smem:[#allocation9_spill]]  ;;  %s4805_s3 = smov 32  }
   0x7   :  { %v4953_v12 = vshrl.u32 %v256_v3, 7  ;;  %s6694_s23 = sld [smem:[#allocation11_spill]] }
   0x9   :  { %v4963_v16 = vadd.s32 8, %v4953_v12  ;;  %v4967_v18 = vadd.s32 24, %v4953_v12  ;;  %v4971_v20 = vadd.s32 40, %v4953_v12  ;;  %v5039_v49 = vadd.s32 56, %v4953_v12 }
   0xa   :  { %v5047_v53 = vadd.s32 72, %v4953_v12 }
   0xb   :  { %v4918_v0 = vld [vmem:[%s6676_s20] sm:$0xff]  ;;  %v4923_v1 = vld [vmem:[%s6676_s20 + $0x8] sm:$0xff]  ;;  %v4928_v2 = vld [vmem:[%s6676_s20 + $0x10] sm:$0xff]  ;;  %v282_v24 = vand.u32 15, %v4963_v16  ;;  %v284_v28 = vand.u32 15, %v4967_v18  ;;  %v286_v30 = vand.u32 15, %v4971_v20 }
   0xc   :  { %v4295_v4 = vpack.i.bf16 %v4923_v1, %v4918_v0  ;;  %v4935_v5 = vld [vmem:[%s6676_s20 + $0x18] sm:$0xff]  ;;  %v4940_v6 = vld [vmem:[%s6676_s20 + $0x28] sm:$0xff]  ;;  %v185_v7 = vrot.slane %v4923_v1, 1  ;;  %v4946_v8 = vld [vmem:[%s6676_s20 + $0x20] sm:$0xff]  ;;  %v184_v9 = vrot.slane %v4918_v0, 1  ;;  %v187_v11 = vrot.slane %v4928_v2, 1 }
   0xd   :  { %v4300_v10 = vpack.i.bf16 %v4935_v5, %v4928_v2  ;;  %v4958_v13 = vld [vmem:[%s6676_s20 + $0x30] sm:$0xff]  ;;  %v189_v14 = vrot.slane %v4935_v5, 1  ;;  %v193_v15 = vrot.slane %v4940_v6, 1  ;;  %v191_v17 = vrot.slane %v4946_v8, 1  ;;  %v4976_v21 = vld [vmem:[%s6676_s20 + $0x38] sm:$0xff]  ;;  %v4987_v26 = vld [vmem:[%s6676_s20 + $0x48] sm:$0xff] }
   0xe   :  { %4296 = vrot.lane.b32.xlu0 %v4295_v4, %s4804_s28  ;;  %v195_v19 = vrot.slane %v4958_v13, 1  ;;  %v186_v22 = vsel %vm6666_vm0, %v184_v9, %v185_v7  ;;  %v188_v23 = vsel %vm6666_vm0, %v185_v7, %v187_v11  ;;  %v4305_v25 = vpack.i.bf16 %v4940_v6, %v4946_v8  ;;  %v4998_v31 = vld [vmem:[%s6676_s20 + $0x40] sm:$0xff]  ;;  %v5006_v35 = vld [vmem:[%s6676_s20 + $0x50] sm:$0xff]  ;;  %v5019_v40 = vld [vmem:[%s6676_s20 + $0x58] sm:$0xff] }
   0xf   :  { %v192_v27 = vsel %vm6666_vm0, %v189_v14, %v191_v17  ;;  %vm402_vm1 = vcmp.eq.s32.totalorder %v282_v24, 15  ;;  %v190_v32 = vsel %vm6666_vm0, %v187_v11, %v189_v14  ;;  %v194_v33 = vsel %vm6666_vm0, %v191_v17, %v193_v15  ;;  %v4505_v36 = vld [vmem:[%s6677_s27] sm:$0xff]   ;;  %v5033_v46 = vld [vmem:[%s6676_s20 + $0x68] sm:$0xff]  ;;  %v4507_v50 = vld [vmem:[%s6677_s27 + $0x10] sm:$0xff]  }
  0x10   :  { %v196_v29 = vsel %vm6666_vm0, %v193_v15, %v195_v19  ;;  %v197_v34 = vrot.slane %v4976_v21, 1  ;;  %v474_v37 = vsel %vm402_vm1, 0.0, %v188_v23  ;;  %vm5011_vm2 = vcmp.eq.s32.totalorder %v284_v28, 15  ;;  %v5028_v45 = vld [vmem:[%s6676_s20 + $0x60] sm:$0xff]  ;;  %4100 = vmatprep.subr.bf16.mxu0 %v4505_v36  ;;  %v4506_v47 = vld [vmem:[%s6677_s27 + $0x8] sm:$0xff]   ;;  %v5060_v60 = vld [vmem:[%s6676_s20 + $0x70] sm:$0xff] }
  0x11   :  { %vm406_vm3 = vcmp.eq.s32.totalorder %v286_v30, 15  ;;  %v201_v39 = vrot.slane %v4987_v26, 1  ;;  %v4310_v41 = vpack.i.bf16 %v474_v37, %v186_v22  ;;  %v476_v42 = vsel %vm5011_vm2, 0.0, %v192_v27  ;;  %4101 = vmatpush3.bf16.msra.mxu0 %v4505_v36  ;;  %v5091_v28 = vld [vmem:[%s6676_s20 + $0x78] sm:$0xff] }
  0x12   :  { %4301 = vrot.lane.b32.xlu0 %v4300_v10, %s4804_s28  ;;  %v478_v43 = vsel %vm406_vm3, 0.0, %v196_v29  ;;  %v199_v44 = vrot.slane %v4998_v31, 1  ;;  %v4315_v51 = vpack.i.bf16 %v476_v42, %v190_v32  ;;  %v203_v52 = vrot.slane %v5006_v35, 1  ;;  %4102 = vmatprep.subr.bf16.mxu0 %v4506_v47  ;;  %v5096_v29 = vld [vmem:[%s6676_s20 + $0x88] sm:$0xff] }
  0x13   :  { %v4325_v48 = vpack.i.bf16 %v478_v43, %v194_v33  ;;  %4311 = vrot.lane.b32.xlu1 %v4310_v41, %s4805_s3  ;;  %v288_v55 = vand.u32 15, %v5039_v49  ;;  %v4335_v56 = vpack.i.bf16 %v4987_v26, %v4998_v31  ;;  %v290_v58 = vand.u32 15, %v5047_v53  ;;  %v5106_v33 = vld [vmem:[%s6676_s20 + $0x90] sm:$0xff] }
  0x14   :  { %v200_v54 = vsel %vm6666_vm0, %v197_v34, %v199_v44  ;;  %v204_v57 = vsel %vm6666_vm0, %v201_v39, %v203_v52  ;;  %v205_v59 = vrot.slane %v5019_v40, 1  ;;  %v202_v62 = vsel %vm6666_vm0, %v199_v44, %v201_v39  ;;  %v5117_v39 = vld [vmem:[%s6676_s20 + $0x80] sm:$0xff] }
  0x15   :  { %vm5062_vm4 = vcmp.eq.s32.totalorder %v288_v55, 15  ;;  %v209_v63 = vrot.slane %v5033_v46, 1  ;;  %v207_v3 = vrot.slane %v5028_v45, 1  ;;  %4103 = vmatpush3.bf16.msra.mxu0 %v4506_v47  ;;  %v4320_v4 = vpack.i.bf16 %v4976_v21, %v4958_v13 }
  0x16   :  { %4306 = vrot.lane.b32.xlu0 %v4305_v25, %s4804_s28  ;;  %v480_v7 = vsel %vm5062_vm4, 0.0, %v200_v54  ;;  %vm410_vm5 = vcmp.eq.s32.totalorder %v290_v58, 15  ;;  %v5075_v9 = vadd.s32 88, %v4953_v12  ;;  %4104 = vmatprep.subr.bf16.mxu0 %v4507_v50  ;;  %v198_v10 = vsel %vm6666_vm0, %v195_v19, %v197_v34 }
  0x17   :  { %4316 = vrot.lane.b32.xlu1 %v4315_v51, %s4805_s3  ;;  %v482_v11 = vsel %vm410_vm5, 0.0, %v204_v57  ;;  %v211_v17 = vrot.slane %v5060_v60, 1  ;;  %v270_v22 = vadd.s32 104, %v4953_v12  ;;  %v112_v23 = vrot.slane %v4923_v1, 7  ;;  %v85_v1 = vld [vmem:[%s6676_s20 + $0xb8] sm:$0xff] }
  0x18   :  { %v4345_v14 = vpack.i.bf16 %v482_v11, %v202_v62  ;;  %v292_v15 = vand.u32 15, %v5075_v9  ;;  %v111_v24 = vrot.slane %v4918_v0, 7  ;;  %v4330_v25 = vpack.i.bf16 %v480_v7, %v198_v10 }
  0x19   :  { %4105 = vmatpush3.bf16.msra.mxu0 %v4507_v50  ;;  %v212_v19 = vsel %vm6666_vm0, %v209_v63, %v211_v17  ;;  %v294_v27 = vand.u32 15, %v270_v22  ;;  %v116_v30 = vrot.slane %v4935_v5, 7  ;;  %v4355_v34 = vpack.i.bf16 %v5033_v46, %v5028_v45 }
  0x1a   :  { %4326 = vrot.lane.b32.xlu0 %v4325_v48, %s4805_s3  ;;  %vm5099_vm6 = vcmp.eq.s32.totalorder %v292_v15, 15  ;;  %v208_v36 = vsel %vm6666_vm0, %v205_v59, %v207_v3  ;;  %v272_v37 = vadd.s32 120, %v4953_v12  ;;  %v210_v5 = vsel %vm6666_vm0, %v207_v3, %v209_v63  ;;  %v5156_v3 = vld [vmem:[%s6676_s20 + $0xb0] sm:$0xff] }
  0x1b   :  { %4321 = vrot.lane.b32.xlu1 %v4320_v4, %s4804_s28  ;;  %vm414_vm7 = vcmp.eq.s32.totalorder %v294_v27, 15  ;;  %v4340_v41 = vpack.i.bf16 %v5019_v40, %v5006_v35  ;;  %v217_v42 = vrot.slane %v5096_v29, 1  ;;  %v219_v43 = vrot.slane %v5106_v33, 1 }
  0x1c   :  { %v486_v38 = vsel %vm414_vm7, 0.0, %v212_v19  ;;  %v274_v44 = vadd.s32 136, %v4953_v12  ;;  %v206_v47 = vsel %vm6666_vm0, %v203_v52, %v205_v59  ;;  %v484_v48 = vsel %vm5099_vm6, 0.0, %v208_v36  ;;  %v5175_v19 = vld [vmem:[%s6676_s20 + $0xa0] sm:$0xff] }
  0x1d   :  { %v213_v50 = vrot.slane %v5091_v28, 1  ;;  %v4365_v51 = vpack.i.bf16 %v486_v38, %v210_v5  ;;  %v215_v54 = vrot.slane %v5117_v39, 1  ;;  %v296_v55 = vand.u32 15, %v272_v37 }
  0x1e   :  { %4336 = vrot.lane.b32.xlu0 %v4335_v56, %s4804_s28  ;;  %v298_v56 = vand.u32 15, %v274_v44  ;;  %v114_v57 = vrot.slane %v4928_v2, 7  ;;  %v120_v58 = vrot.slane %v4940_v6, 7  ;;  %v118_v61 = vrot.slane %v4946_v8, 7  ;;  %v5146_v2 = vld [vmem:[%s6676_s20 + $0x98] sm:$0xff]  ;;  %v5151_v8 = vld [vmem:[%s6676_s20 + $0xa8] sm:$0xff] }
  0x1f   :  { %4331 = vrot.lane.b32.xlu1 %v4330_v25, %s4805_s3  ;;  %v124_v52 = vrot.slane %v4976_v21, 7  ;;  %v4350_v59 = vpack.i.bf16 %v484_v48, %v206_v47  ;;  %v220_v62 = vsel %vm6666_vm0, %v217_v42, %v219_v43  ;;  %v278_v4 = vadd.s32 168, %v4953_v12 }
  0x20   :  { %vm5139_vm8 = vcmp.eq.s32.totalorder %v298_v56, 15  ;;  %v4375_v7 = vpack.i.bf16 %v5096_v29, %v5117_v39  ;;  %v216_v10 = vsel %vm6666_vm0, %v213_v50, %v215_v54  ;;  %vm5163_vm9 = vcmp.eq.s32.totalorder %v296_v55, 15 }
  0x21   :  { %v128_v15 = vrot.slane %v4987_v26, 7  ;;  %v218_v22 = vsel %vm6666_vm0, %v215_v54, %v217_v42  ;;  %v490_v25 = vsel %vm5139_vm8, 0.0, %v220_v62  ;;  %v4360_v27 = vpack.i.bf16 %v5091_v28, %v5060_v60 }
  0x22   :  { %4346 = vrot.lane.b32.xlu0 %v4345_v14, %s4805_s3  ;;  %v276_v14 = vadd.s32 152, %v4953_v12  ;;  %v225_v32 = vrot.slane %v5151_v8, 1  ;;  %v302_v26 = vand.u32 15, %v278_v4  ;;  %v214_v36 = vsel %vm6666_vm0, %v211_v17, %v213_v50 }
  0x23   :  { %4341 = vrot.lane.b32.xlu1 %v4340_v41, %s4804_s28  ;;  %v488_v37 = vsel %vm5163_vm9, 0.0, %v216_v10  ;;  %v221_v5 = vrot.slane %v5146_v2, 1  ;;  %v4385_v38 = vpack.i.bf16 %v490_v25, %v218_v22  ;;  %v223_v41 = vrot.slane %v5175_v19, 1 }
  0x24   :  { %v300_v42 = vand.u32 15, %v276_v14  ;;  %v5191_v44 = vsel %vm6667_vm10, %v112_v23, %v114_v57  ;;  %v126_v47 = vrot.slane %v4998_v31, 7  ;;  %v5195_v17 = vsel %vm6667_vm10, %v114_v57, %v116_v30 }
  0x25   :  { %v5198_v48 = vsel %vm6667_vm10, %v116_v30, %v118_v61  ;;  %v4370_v50 = vpack.i.bf16 %v488_v37, %v214_v36  ;;  %vm5204_vm11 = vcmp.eq.s32.totalorder %v302_v26, 15  ;;  %v5211_v31 = vsel %vm6667_vm10, %v118_v61, %v120_v58 }
  0x26   :  { %4356 = vrot.lane.b32.xlu0 %v4355_v34, %s4804_s28  ;;  %v227_v34 = vrot.slane %v5156_v3, 1  ;;  %v132_v55 = vrot.slane %v5019_v40, 7  ;;  %v136_v30 = vrot.slane %v5033_v46, 7  ;;  %v134_v56 = vrot.slane %v5028_v45, 7 }
  0x27   :  { %4351 = vrot.lane.b32.xlu1 %v4350_v59, %s4805_s3  ;;  %v5221_v57 = vsel %vm6667_vm10, %v111_v24, %v112_v23  ;;  %v4395_v59 = vpack.i.bf16 %v5151_v8, %v5175_v19  ;;  %v224_v61 = vsel %vm6666_vm0, %v221_v5, %v223_v41  ;;  %vm5227_vm12 = vcmp.eq.s32.totalorder %v300_v42, 15 }
  0x28   :  { %v280_v45 = vadd.s32 184, %v4953_v12  ;;  %v226_v46 = vsel %vm6666_vm0, %v223_v41, %v225_v32  ;;  %v122_v62 = vrot.slane %v4958_v13, 7  ;;  %v5242_v63 = vsel %vm6667_vm10, %v124_v52, %v126_v47 }
  0x29   :  { %v140_v4 = vrot.slane %v5091_v28, 7  ;;  %v222_v10 = vsel %vm6666_vm0, %v219_v43, %v221_v5  ;;  %v5252_v11 = vsel %vm6667_vm10, %v126_v47, %v128_v15  ;;  %v492_v13 = vsel %vm5227_vm12, 0.0, %v224_v61  ;;  %v4508_v47 = vld [vmem:[%s6694_s23] sm:$0xff]   ;;  %v4510_v61 = vld [vmem:[%s6694_s23 + $0x10] sm:$0xff]  }
  0x2a   :  { %4366 = vrot.lane.b32.xlu0 %v4365_v51, %s4805_s3  ;;  %v228_v51 = vsel %vm6666_vm0, %v225_v32, %v227_v34  ;;  %v229_v14 = vrot.slane %v85_v1, 1  ;;  %v5259_v28 = vsel %vm6667_vm10, %v120_v58, %v122_v62  ;;  %v5264_v22 = vsel %vm6667_vm10, %v122_v62, %v124_v52  ;;  %4130 = vmatprep.subr.bf16.mxu1 %v4508_v47 }
  0x2b   :  { %4361 = vrot.lane.b32.xlu1 %v4360_v27, %s4804_s28  ;;  %v494_v23 = vsel %vm5204_vm11, 0.0, %v228_v51  ;;  %v142_v25 = vrot.slane %v5117_v39, 7  ;;  %v304_v27 = vand.u32 15, %v280_v45  ;;  %v130_v32 = vrot.slane %v5006_v35, 7  ;;  %4131 = vmatpush3.bf16.msra.mxu1 %v4508_v47  ;;  %v4511_v45 = vld [vmem:[%s6694_s23 + $0x18] sm:$0xff]  }
  0x2c   :  { %v4405_v43 = vpack.i.bf16 %v494_v23, %v226_v46  ;;  %v144_v26 = vrot.slane %v5096_v29, 7  ;;  %v5271_v6 = vsel %vm6667_vm10, %v132_v55, %v134_v56  ;;  %v5274_v58 = vsel %vm6667_vm10, %v134_v56, %v136_v30  ;;  %v4513_v46 = vld [vmem:[%s6694_s23 + $0x28] sm:$0xff]  }
  0x2d   :  { %v138_v21 = vrot.slane %v5060_v60, 7  ;;  %v4390_v52 = vpack.i.bf16 %v492_v13, %v222_v10  ;;  %v5279_v39 = vsel %vm6667_vm10, %v128_v15, %v130_v32  ;;  %v5282_v36 = vsel %vm6667_vm10, %v130_v32, %v132_v55 }
  0x2e   :  { %4376 = vrot.lane.b32.xlu0 %v4375_v7, %s4804_s28  ;;  %v4380_v7 = vpack.i.bf16 %v5146_v2, %v5106_v33  ;;  %v148_v35 = vrot.slane %v5146_v2, 7  ;;  %v152_v29 = vrot.slane %v5151_v8, 7  ;;  %v150_v37 = vrot.slane %v5175_v19, 7 }
  0x2f   :  { %4371 = vrot.lane.b32.xlu1 %v4370_v50, %s4805_s3  ;;  %v255_v5 = vsel %vm6666_vm0, %v229_v14, 0.0  ;;  %vm5289_vm13 = vcmp.eq.s32.totalorder %v304_v27, 15  ;;  %v5294_v15 = vsel %vm6667_vm10, %v136_v30, %v138_v21  ;;  %v5300_v2 = vsel %vm6667_vm10, %v140_v4, %v142_v25  ;;  %v4509_v50 = vld [vmem:[%s6694_s23 + $0x8] sm:$0xff]  }
  0x30   :  { %v5303_v8 = vsel %vm6667_vm10, %v142_v25, %v144_v26  ;;  %v156_v19 = vrot.slane %v85_v1, 7  ;;  %v4400_v41 = vpack.i.bf16 %v85_v1, %v5156_v3  ;;  %v146_v42 = vrot.slane %v5106_v33, 7  ;;  %4132 = vmatprep.subr.bf16.mxu1 %v4509_v50 }
  0x31   :  { %v230_v51 = vsel %vm6666_vm0, %v227_v34, %v229_v14  ;;  %v496_v54 = vsel %vm5289_vm13, 0.0, %v255_v5  ;;  %v5320_v55 = vsel %vm6667_vm10, %v148_v35, %v150_v37  ;;  %v5323_v33 = vsel %vm6667_vm10, %v150_v37, %v152_v29  ;;  %4133 = vmatpush3.bf16.msra.mxu1 %v4509_v50 }
  0x32   :  { %4386 = vrot.lane.b32.xlu0 %v4385_v38, %s4805_s3  ;;  %v5297_v38 = vsel %vm6667_vm10, %v138_v21, %v140_v4  ;;  %v5326_v30 = vsel %vm6667_vm10, %v144_v26, %v146_v42  ;;  %v5329_v56 = vsel %vm6667_vm10, %v146_v42, %v148_v35  ;;  %v4410_v34 = vpack.i.bf16 %v496_v54, %v230_v51 }
  0x33   :  { %4381 = vrot.lane.b32.xlu1 %v4380_v7, %s4804_s28  ;;  %4134 = vmatprep.subr.bf16.mxu1 %v4510_v61 }
  0x35   :  { %4135 = vmatpush3.bf16.msra.mxu1 %v4510_v61 }
  0x36   :  { %4396 = vrot.lane.b32.xlu0 %v4395_v59, %s4804_s28  ;;  %v154_v59 = vrot.slane %v5156_v3, 7  ;;  %v4512_v3 = vld [vmem:[%s6694_s23 + $0x20] sm:$0xff]   ;;  %4136 = vmatprep.subr.bf16.mxu1 %v4511_v45 }
  0x37   :  { %4391 = vrot.lane.b32.xlu1 %v4390_v52, %s4805_s3 }
  0x38   :  { %v5337_v40 = vsel %vm6667_vm10, %v152_v29, %v154_v59  ;;  %v5340_v1 = vsel %vm6667_vm10, %v154_v59, %v156_v19 }
  0x39   :  { %4137 = vmatpush3.bf16.msra.mxu1 %v4511_v45 }
  0x3a   :  { %4406 = vrot.lane.b32.xlu0 %v4405_v43, %s4805_s3  ;;  %4138 = vmatprep.subr.bf16.mxu1 %v4512_v3 }
  0x3b   :  { %4401 = vrot.lane.b32.xlu1 %v4400_v41, %s4804_s28 }
  0x3d   :  { %4139 = vmatpush3.bf16.msra.mxu1 %v4512_v3 }
  0x3e   :  { %4140 = vmatprep.subr.bf16.mxu1 %v4513_v46 }
  0x3f   :  { %4411 = vrot.lane.b32.xlu1 %v4410_v34, %s4805_s3 }
  0x41   :  { %4141 = vmatpush3.bf16.msra.mxu1 %v4513_v46 }
  0x42   :  { %26 = vsyncpa [#allocation5], 0  ;;  %v5353_v23 = vadd.s32 32, %v4953_v12  ;;  %v5356_v4 = vadd.s32 16, %v4953_v12  ;;  %v281_v7 = vand.u32 15, %v4953_v12  ;;  %v182_v25 = vsel %vm6667_vm10, 0.0, %v111_v24 }
  0x43   :  { %v5369_v27 = vadd.s32 64, %v4953_v12  ;;  %vm665_vm1 = vcmask 130048   ;;  %vm6665_vm3 = vcmask 261120   ;;  %v5386_v60 = vadd.s32 48, %v4953_v12  ;;  %s6717_s27 = sld [smem:[#allocation10_spill]]  ;;  %s4807_s24 = smov 80  }
  0x44   :  { %v285_v10 = vand.u32 15, %v5353_v23  ;;  %v283_v13 = vand.u32 15, %v5356_v4  ;;  %vm5364_vm14 = vcmp.eq.s32.totalorder %v281_v7, 0  ;;  %vm6663_vm4 = vcmask 392192   ;;  %s4810_s25 = smov 96  }
  0x45   :  { %v377_v52 = vsel %vm5364_vm14, 0.0, %v182_v25  ;;  %v289_v35 = vand.u32 15, %v5369_v27  ;;  %v269_v3 = vadd.s32 96, %v4953_v12 }
  0x46   :  { %vm5371_vm15 = vcmp.eq.s32.totalorder %v285_v10, 0  ;;  %vm5377_vm2 = vcmp.eq.s32.totalorder %v283_v13, 0 }
  0x47   :  { %v381_v29 = vsel %vm5371_vm15, 0.0, %v5198_v48  ;;  %v379_v51 = vsel %vm5377_vm2, 0.0, %v5191_v44  ;;  %vm5397_vm5 = vcmp.eq.s32.totalorder %v289_v35, 0  ;;  %v293_v0 = vand.u32 15, %v269_v3 }
  0x48   :  { %vm6664_vm15 = vcmask 523264  }
  0x49   :  { %vm5432_vm7 = vcmp.eq.s32.totalorder %v293_v0, 0 }
  0x80   :  { %v4297_v62 = vpop.permute.xlu0 %4296 }
  0x81   :  { %v4299_v32 = vunpack.i.h.bf16 %v4297_v62  ;;  %v4298_v26 = vunpack.i.l.bf16 %v4297_v62 }
  0x83   :  { %v666_v47 = vsel %vm665_vm1, %v377_v52, %v4298_v26  ;;  %v667_v50 = vsel %vm665_vm1, %v5221_v57, %v4299_v32  ;;  %v385_v52 = vsel %vm5397_vm5, 0.0, %v5242_v63 }
  0x84   :  { %v4302_v14 = vpop.permute.xlu0 %4301 }
  0x85   :  { %v4304_v19 = vunpack.i.h.bf16 %v4302_v14  ;;  %v4303_v41 = vunpack.i.l.bf16 %v4302_v14  ;;  %v4312_v42 = vpop.permute.xlu1 %4311  ;;  %v287_v14 = vand.u32 15, %v5386_v60 }
  0x86   :  { %v4314_v54 = vunpack.i.h.bf16 %v4312_v42  ;;  %v4313_v59 = vunpack.i.l.bf16 %v4312_v42  ;;  %v5421_v42 = vadd.s32 80, %v4953_v12 }
  0x87   :  { %v669_v7 = vsel %vm665_vm1, %v5195_v17, %v4304_v19  ;;  %vm5416_vm6 = vcmp.eq.s32.totalorder %v287_v14, 0 }
  0x88   :  { %v4307_v24 = vpop.permute.xlu0 %4306  ;;  %v691_v57 = vsel %vm6665_vm3, %v666_v47, %v4313_v59  ;;  %v692_v46 = vsel %vm6665_vm3, %v667_v50, %v4314_v54  ;;  %v273_v47 = vadd.s32 128, %v4953_v12 }
  0x89   :  { %v4309_v37 = vunpack.i.h.bf16 %v4307_v24  ;;  %v4308_v5 = vunpack.i.l.bf16 %v4307_v24  ;;  %v4317_v10 = vpop.permute.xlu1 %4316  ;;  %v721_v13 = vpack.c.bf16 %v692_v46, %v691_v57  ;;  %v291_v57 = vand.u32 15, %v5421_v42 }
  0x8a   :  { %v4319_v25 = vunpack.i.h.bf16 %v4317_v10  ;;  %v4318_v43 = vunpack.i.l.bf16 %v4317_v10  ;;  %v297_v46 = vand.u32 15, %v273_v47 }
  0x8b   :  { %v671_v48 = vsel %vm665_vm1, %v5211_v31, %v4309_v37  ;;  %v670_v34 = vsel %vm665_vm1, %v381_v29, %v4308_v5  ;;  %v668_v31 = vsel %vm665_vm1, %v379_v51, %v4303_v41  ;;  %4106 = vmatprep.mubr.msk.bf16.mxu0 %vm6663_vm4, %v721_v13  ;;  %v389_v13 = vsel %vm5432_vm7, 0.0, %v5271_v6 }
  0x8c   :  { %v4327_v61 = vpop.permute.xlu0 %4326  ;;  %v694_v24 = vsel %vm6665_vm3, %v669_v7, %v4319_v25  ;;  %v693_v35 = vsel %vm6665_vm3, %v668_v31, %v4318_v43  ;;  %vm5447_vm8 = vcmp.eq.s32.totalorder %v291_v57, 0  ;;  %vm5452_vm9 = vcmp.eq.s32.totalorder %v297_v46, 0 }
  0x8d   :  { %v4329_v44 = vunpack.i.h.bf16 %v4327_v61  ;;  %v4328_v62 = vunpack.i.l.bf16 %v4327_v61  ;;  %v722_v5 = vpack.c.bf16 %v694_v24, %v693_v35  ;;  %v4322_v41 = vpop.permute.xlu1 %4321  ;;  %v277_v6 = vadd.s32 160, %v4953_v12 }
  0x8e   :  { %v4324_v63 = vunpack.i.h.bf16 %v4322_v41  ;;  %v4323_v50 = vunpack.i.l.bf16 %v4322_v41  ;;  %v387_v19 = vsel %vm5447_vm8, 0.0, %v5279_v39 }
  0x8f   :  { %v695_v32 = vsel %vm6665_vm3, %v670_v34, %v4328_v62  ;;  %v696_v26 = vsel %vm6665_vm3, %v671_v48, %v4329_v44  ;;  %4107 = vmatmul.mubr.msk.bf16.vlgmr.msra.gmra.mrb[0].mxu0 %vm6663_vm4, %v722_v5  ;;  %v383_v48 = vsel %vm5416_vm6, 0.0, %v5259_v28 }
  0x90   :  { %v723_v21 = vpack.c.bf16 %v696_v26, %v695_v32  ;;  %v4337_v17 = vpop.permute.xlu0 %4336  ;;  %v673_v28 = vsel %vm665_vm1, %v5264_v22, %v4324_v63  ;;  %v672_v31 = vsel %vm665_vm1, %v383_v48, %v4323_v50 }
  0x91   :  { %v4339_v29 = vunpack.i.h.bf16 %v4337_v17  ;;  %v4338_v37 = vunpack.i.l.bf16 %v4337_v17  ;;  %v4332_v3 = vpop.permute.xlu1 %4331  ;;  %v271_v17 = vadd.s32 112, %v4953_v12 }
  0x92   :  { %4110 = vmatprep.mubr.msk.bf16.mxu0 %vm6663_vm4, %v723_v21  ;;  %v4333_v44 = vunpack.i.l.bf16 %v4332_v3 }
  0x93   :  { %v675_v51 = vsel %vm665_vm1, %v5252_v11, %v4339_v29  ;;  %v674_v54 = vsel %vm665_vm1, %v385_v52, %v4338_v37  ;;  %v4334_v11 = vunpack.i.h.bf16 %v4332_v3  ;;  %v295_v50 = vand.u32 15, %v271_v17 }
  0x94   :  { %v4347_v59 = vpop.permute.xlu0 %4346  ;;  %v697_v25 = vsel %vm6665_vm3, %v672_v31, %v4333_v44  ;;  %v301_v3 = vand.u32 15, %v277_v6 }
  0x95   :  { %v4349_v34 = vunpack.i.h.bf16 %v4347_v59  ;;  %v4348_v61 = vunpack.i.l.bf16 %v4347_v59  ;;  %v698_v43 = vsel %vm6665_vm3, %v673_v28, %v4334_v11  ;;  %v4342_v22 = vpop.permute.xlu1 %4341  ;;  %vm5475_vm11 = vcmp.eq.s32.totalorder %v295_v50, 0 }
  0x96   :  { %v724_v21 = vpack.c.bf16 %v698_v43, %v697_v25  ;;  %v4344_v24 = vunpack.i.h.bf16 %v4342_v22  ;;  %v4343_v35 = vunpack.i.l.bf16 %v4342_v22  ;;  %v275_v28 = vadd.s32 144, %v4953_v12 }
  0x97   :  { %v699_v62 = vsel %vm6665_vm3, %v674_v54, %v4348_v61  ;;  %v700_v7 = vsel %vm6665_vm3, %v675_v51, %v4349_v34  ;;  %v393_v51 = vsel %vm5452_vm9, 0.0, %v5300_v2  ;;  %v391_v25 = vsel %vm5475_vm11, 0.0, %v5294_v15 }
  0x98   :  { %v725_v10 = vpack.c.bf16 %v700_v7, %v699_v62  ;;  %v4357_v14 = vpop.permute.xlu0 %4356  ;;  %4111 = vmatmul.mubr.msk.bf16.gmra.mrb[4].mxu0 %vm6663_vm4, %v724_v21  ;;  %v677_v34 = vsel %vm665_vm1, %v5282_v36, %v4344_v24  ;;  %v676_v39 = vsel %vm665_vm1, %v387_v19, %v4343_v35  ;;  %vm5488_vm12 = vcmp.eq.s32.totalorder %v301_v3, 0 }
  0x99   :  { %v4359_v32 = vunpack.i.h.bf16 %v4357_v14  ;;  %v4358_v26 = vunpack.i.l.bf16 %v4357_v14  ;;  %v4352_v63 = vpop.permute.xlu1 %4351  ;;  %v299_v52 = vand.u32 15, %v275_v28  ;;  %v397_v35 = vsel %vm5488_vm12, 0.0, %v5320_v55 }
  0x9a   :  { %4114 = vmatprep.mubr.msk.bf16.mxu0 %vm6663_vm4, %v725_v10  ;;  %v4354_v54 = vunpack.i.h.bf16 %v4352_v63  ;;  %v4353_v59 = vunpack.i.l.bf16 %v4352_v63  ;;  %v279_v50 = vadd.s32 176, %v4953_v12 }
  0x9b   :  { %v679_v29 = vsel %vm665_vm1, %v5274_v58, %v4359_v32  ;;  %v678_v37 = vsel %vm665_vm1, %v389_v13, %v4358_v26  ;;  %vm5502_vm13 = vcmp.eq.s32.totalorder %v299_v52, 0  ;;  %v4515_v52 = vld [vmem:[%s6694_s23 + $0x38] sm:$0xff]  }
  0x9c   :  { %v4367_v5 = vpop.permute.xlu0 %4366  ;;  %v701_v57 = vsel %vm6665_vm3, %v676_v39, %v4353_v59  ;;  %v702_v46 = vsel %vm6665_vm3, %v677_v34, %v4354_v54 }
  0x9d   :  { %v4369_v41 = vunpack.i.h.bf16 %v4367_v5  ;;  %v4368_v47 = vunpack.i.l.bf16 %v4367_v5  ;;  %v726_v44 = vpack.c.bf16 %v702_v46, %v701_v57  ;;  %v4362_v7 = vpop.permute.xlu1 %4361 }
  0x9e   :  { %v4364_v36 = vunpack.i.h.bf16 %v4362_v7  ;;  %v4363_v31 = vunpack.i.l.bf16 %v4362_v7 }
  0x9f   :  { %v703_v58 = vsel %vm6665_vm3, %v678_v37, %v4368_v47  ;;  %v704_v48 = vsel %vm6665_vm3, %v679_v29, %v4369_v41 }
  0xa0   :  { %v727_v61 = vpack.c.bf16 %v704_v48, %v703_v58  ;;  %v4377_v45 = vpop.permute.xlu0 %4376  ;;  %4115 = vmatmul.mubr.msk.bf16.gmra.mrb[8].mxu0 %vm6663_vm4, %v726_v44  ;;  %v681_v6 = vsel %vm665_vm1, %v5297_v38, %v4364_v36  ;;  %v680_v15 = vsel %vm665_vm1, %v391_v25, %v4363_v31  ;;  %v395_v48 = vsel %vm5502_vm13, 0.0, %v5326_v30 }
  0xa1   :  { %v4379_v11 = vunpack.i.h.bf16 %v4377_v45  ;;  %v4378_v2 = vunpack.i.l.bf16 %v4377_v45  ;;  %v4372_v21 = vpop.permute.xlu1 %4371  ;;  %v303_v45 = vand.u32 15, %v279_v50 }
  0xa2   :  { %4118 = vmatprep.mubr.msk.bf16.mxu0 %vm6663_vm4, %v727_v61  ;;  %v4374_v22 = vunpack.i.h.bf16 %v4372_v21  ;;  %v4373_v17 = vunpack.i.l.bf16 %v4372_v21 }
  0xa3   :  { %v683_v10 = vsel %vm665_vm1, %v5303_v8, %v4379_v11  ;;  %v682_v13 = vsel %vm665_vm1, %v393_v51, %v4378_v2  ;;  %vm327_vm14 = vcmp.eq.s32.totalorder %v303_v45, 0 }
  0xa4   :  { %v4387_v14 = vpop.permute.xlu0 %4386  ;;  %v705_v37 = vsel %vm6665_vm3, %v680_v15, %v4373_v17  ;;  %v706_v5 = vsel %vm6665_vm3, %v681_v6, %v4374_v22 }
  0xa5   :  { %v4389_v43 = vunpack.i.h.bf16 %v4387_v14  ;;  %v4388_v32 = vunpack.i.l.bf16 %v4387_v14  ;;  %v728_v47 = vpack.c.bf16 %v706_v5, %v705_v37  ;;  %v4382_v38 = vpop.permute.xlu1 %4381 }
  0xa6   :  { %v4384_v51 = vunpack.i.h.bf16 %v4382_v38  ;;  %v4383_v54 = vunpack.i.l.bf16 %v4382_v38 }
  0xa7   :  { %v707_v8 = vsel %vm6665_vm3, %v682_v13, %v4388_v32  ;;  %v708_v0 = vsel %vm6665_vm3, %v683_v10, %v4389_v43  ;;  %v399_v10 = vsel %vm327_vm14, 0.0, %v5337_v40  ;;  %v4514_v40 = vld [vmem:[%s6694_s23 + $0x30] sm:$0xff]  }
  0xa8   :  { %v729_v24 = vpack.c.bf16 %v708_v0, %v707_v8  ;;  %v4397_v29 = vpop.permute.xlu0 %4396  ;;  %4119 = vmatmul.mubr.msk.bf16.gmra.mrb[12].mxu0 %vm6663_vm4, %v728_v47  ;;  %v684_v2 = vsel %vm665_vm1, %v395_v48, %v4383_v54  ;;  %4142 = vmatprep.subr.bf16.mxu1 %v4514_v40 }
  0xa9   :  { %v4399_v19 = vunpack.i.h.bf16 %v4397_v29  ;;  %v4398_v41 = vunpack.i.l.bf16 %v4397_v29  ;;  %v4392_v61 = vpop.permute.xlu1 %4391  ;;  %4143 = vmatpush3.bf16.msra.mxu1 %v4514_v40 }
  0xaa   :  { %4122 = vmatprep.mubr.msk.bf16.mxu0 %vm6663_vm4, %v729_v24  ;;  %v4394_v3 = vunpack.i.h.bf16 %v4392_v61  ;;  %v4393_v57 = vunpack.i.l.bf16 %v4392_v61  ;;  %4144 = vmatprep.subr.bf16.mxu1 %v4515_v52 }
  0xab   :  { %v687_v55 = vsel %vm665_vm1, %v5323_v33, %v4399_v19  ;;  %v686_v59 = vsel %vm665_vm1, %v397_v35, %v4398_v41  ;;  %v685_v33 = vsel %vm665_vm1, %v5329_v56, %v4384_v51 }
  0xac   :  { %v4407_v58 = vpop.permute.xlu0 %4406  ;;  %v709_v30 = vsel %vm6665_vm3, %v684_v2, %v4393_v57  ;;  %v710_v62 = vsel %vm6665_vm3, %v685_v33, %v4394_v3 }
  0xad   :  { %v4409_v34 = vunpack.i.h.bf16 %v4407_v58  ;;  %v4408_v39 = vunpack.i.l.bf16 %v4407_v58  ;;  %v730_v7 = vpack.c.bf16 %v710_v62, %v709_v30  ;;  %v4402_v28 = vpop.permute.xlu1 %4401  ;;  %4145 = vmatpush3.bf16.msra.mxu1 %v4515_v52 }
  0xae   :  { %v4404_v36 = vunpack.i.h.bf16 %v4402_v28  ;;  %v4403_v31 = vunpack.i.l.bf16 %v4402_v28 }
  0xaf   :  { %v711_v46 = vsel %vm6665_vm3, %v686_v59, %v4408_v39  ;;  %v712_v11 = vsel %vm6665_vm3, %v687_v55, %v4409_v34 }
  0xb0   :  { %v731_v44 = vpack.c.bf16 %v712_v11, %v711_v46  ;;  %4123 = vmatmul.mubr.msk.bf16.gmra.mrb[16].mxu0 %vm6663_vm4, %v730_v7  ;;  %v689_v25 = vsel %vm665_vm1, %v5340_v1, %v4404_v36  ;;  %v688_v43 = vsel %vm665_vm1, %v399_v10, %v4403_v31  ;;  %v5540_v1 = vld [vmem:[%s6717_s27] ss:$0 sm:$0xff] }
  0xb1   :  { %v4412_v13 = vpop.permute.xlu1 %4411 }
  0xb2   :  { %4126 = vmatprep.mubr.msk.bf16.mxu0 %vm6663_vm4, %v731_v44  ;;  %v4414_v56 = vunpack.i.h.bf16 %v4412_v13  ;;  %v4413_v14 = vunpack.i.l.bf16 %v4412_v13 }
  0xb4   :  { %v713_v32 = vsel %vm6665_vm3, %v688_v43, %v4413_v14  ;;  %v714_v26 = vsel %vm6665_vm3, %v689_v25, %v4414_v56 }
  0xb5   :  { %v732_v21 = vpack.c.bf16 %v714_v26, %v713_v32 }
  0xb8   :  { %4127 = vmatmul.mubr.msk.bf16.gmra.mrb[20].mxu0 %vm6663_vm4, %v732_v21 }
 0x162   :  { %v4108_v22 = vpop.f32.mrb[0].mxu0 }
 0x163   :  { %v838_v17 = vadd.f32 %v4108_v22, %v5540_v1  ;;  %v829_v8 = vpop.f32.mrb[1].mxu0 }
 0x164   :  { %v830_v0 = vadd.f32 %v5540_v1, %v829_v8  ;;  %v4109_v6 = vpop.f32.mrb[2].mxu0 }
 0x165   :  { %v841_v15 = vadd.f32 %v4109_v6, %v5540_v1  ;;  %v832_v24 = vpop.f32.mrb[3].mxu0  ;;  %v926_v29 = vmax.f32 %v838_v17, 0.0 }
 0x166   :  { %v833_v35 = vadd.f32 %v5540_v1, %v832_v24  ;;  %v924_v5 = vmax.f32 %v830_v0, 0.0 }
 0x167   :  { %v927_v37 = vmax.f32 %v841_v15, 0.0 }
 0x168   :  { %v925_v19 = vmax.f32 %v833_v35, 0.0 }
 0x169   :  { %v977_v41 = vpack.c.bf16 %v927_v37, %v926_v29 }
 0x16a   :  { %v976_v63 = vpack.c.bf16 %v925_v19, %v924_v5 }
 0x16b   :  { %v4112_v47 = vpop.f32.mrb[4].mxu0 }
 0x16c   :  { %v854_v38 = vadd.f32 %v4112_v47, %v5540_v1  ;;  %v845_v50 = vpop.f32.mrb[5].mxu0  ;;  %4146 = vmatprep.mubr.bf16.mxu1 %v976_v63 }
 0x16d   :  { %v846_v51 = vadd.f32 %v5540_v1, %v845_v50  ;;  %v4113_v54 = vpop.f32.mrb[6].mxu0  ;;  %4147 = vmatmul.mubr.bf16.vlgmr.msra.gmra.mrb[0].mxu1 %v977_v41 }
 0x16e   :  { %v857_v55 = vadd.f32 %v4113_v54, %v5540_v1  ;;  %v848_v59 = vpop.f32.mrb[7].mxu0  ;;  %v930_v48 = vmax.f32 %v854_v38, 0.0 }
 0x16f   :  { %v849_v58 = vadd.f32 %v5540_v1, %v848_v59  ;;  %v928_v39 = vmax.f32 %v846_v51, 0.0 }
 0x170   :  { %v931_v34 = vmax.f32 %v857_v55, 0.0 }
 0x171   :  { %v929_v61 = vmax.f32 %v849_v58, 0.0 }
 0x172   :  { %v979_v45 = vpack.c.bf16 %v931_v34, %v930_v48 }
 0x173   :  { %v978_v3 = vpack.c.bf16 %v929_v61, %v928_v39  ;;  %v4116_v57 = vpop.f32.mrb[8].mxu0 }
 0x174   :  { %v870_v46 = vadd.f32 %v4116_v57, %v5540_v1  ;;  %v861_v11 = vpop.f32.mrb[9].mxu0 }
 0x175   :  { %v862_v33 = vadd.f32 %v5540_v1, %v861_v11  ;;  %v4117_v2 = vpop.f32.mrb[10].mxu0  ;;  %4150 = vmatprep.mubr.bf16.mxu1 %v978_v3 }
 0x176   :  { %v873_v44 = vadd.f32 %v4117_v2, %v5540_v1  ;;  %v864_v30 = vpop.f32.mrb[11].mxu0  ;;  %4151 = vmatmul.mubr.bf16.gmra.mrb[4].mxu1 %v979_v45  ;;  %v934_v7 = vmax.f32 %v870_v46, 0.0 }
 0x177   :  { %v865_v62 = vadd.f32 %v5540_v1, %v864_v30  ;;  %v932_v36 = vmax.f32 %v862_v33, 0.0  ;;  %v4518_v30 = vld [vmem:[%s6644_s4 + $0x4] ss:$8 sps:$4 sm:$0xff]  }
 0x178   :  { %v935_v28 = vmax.f32 %v873_v44, 0.0  ;;  %v4806_v44 = vmov 0   ;;  %3800 = vmatprep.mubr.msk.bf16.mxu0 %vm6664_vm15, %v4518_v30  ;;  %v4537_v30 = vld [vmem:[%s6645_s5 + $0x18] sm:$0xff]  }
 0x179   :  { %v933_v31 = vmax.f32 %v865_v62, 0.0  ;;  %1250 = vmatprep.subr.bf16.mxu0 %v4806_v44  ;;  %1790 = vmatprep.subr.bf16.mxu1 %v4806_v44 }
 0x17a   :  { %v981_v10 = vpack.c.bf16 %v935_v28, %v934_v7 }
 0x17b   :  { %v980_v13 = vpack.c.bf16 %v933_v31, %v932_v36  ;;  %v4120_v56 = vpop.f32.mrb[12].mxu0 }
 0x17c   :  { %v886_v14 = vadd.f32 %v4120_v56, %v5540_v1  ;;  %v877_v25 = vpop.f32.mrb[13].mxu0 }
 0x17d   :  { %v878_v43 = vadd.f32 %v5540_v1, %v877_v25  ;;  %v4121_v32 = vpop.f32.mrb[14].mxu0  ;;  %4154 = vmatprep.mubr.bf16.mxu1 %v980_v13 }
 0x17e   :  { %v889_v26 = vadd.f32 %v4121_v32, %v5540_v1  ;;  %v880_v21 = vpop.f32.mrb[15].mxu0  ;;  %4155 = vmatmul.mubr.bf16.gmra.mrb[8].mxu1 %v981_v10  ;;  %v938_v52 = vmax.f32 %v886_v14, 0.0 }
 0x17f   :  { %v881_v40 = vadd.f32 %v5540_v1, %v880_v21  ;;  %v936_v17 = vmax.f32 %v878_v43, 0.0 }
 0x180   :  { %v939_v22 = vmax.f32 %v889_v26, 0.0 }
 0x181   :  { %v937_v8 = vmax.f32 %v881_v40, 0.0 }
 0x182   :  { %v983_v0 = vpack.c.bf16 %v939_v22, %v938_v52 }
 0x183   :  { %v982_v6 = vpack.c.bf16 %v937_v8, %v936_v17  ;;  %v4124_v15 = vpop.f32.mrb[16].mxu0 }
 0x184   :  { %v902_v24 = vadd.f32 %v4124_v15, %v5540_v1  ;;  %v893_v35 = vpop.f32.mrb[17].mxu0 }
 0x185   :  { %v894_v29 = vadd.f32 %v5540_v1, %v893_v35  ;;  %v4125_v37 = vpop.f32.mrb[18].mxu0  ;;  %4158 = vmatprep.mubr.bf16.mxu1 %v982_v6 }
 0x186   :  { %v905_v5 = vadd.f32 %v4125_v37, %v5540_v1  ;;  %v896_v19 = vpop.f32.mrb[19].mxu0  ;;  %4159 = vmatmul.mubr.bf16.gmra.mrb[12].mxu1 %v983_v0  ;;  %v942_v47 = vmax.f32 %v902_v24, 0.0 }
 0x187   :  { %v897_v41 = vadd.f32 %v5540_v1, %v896_v19  ;;  %v940_v38 = vmax.f32 %v894_v29, 0.0 }
 0x188   :  { %v943_v63 = vmax.f32 %v905_v5, 0.0 }
 0x189   :  { %v941_v50 = vmax.f32 %v897_v41, 0.0 }
 0x18a   :  { %v985_v51 = vpack.c.bf16 %v943_v63, %v942_v47 }
 0x18b   :  { %v984_v54 = vpack.c.bf16 %v941_v50, %v940_v38  ;;  %v4128_v55 = vpop.f32.mrb[20].mxu0 }
 0x18c   :  { %v918_v59 = vadd.f32 %v4128_v55, %v5540_v1  ;;  %v909_v58 = vpop.f32.mrb[21].mxu0  ;;  %v4516_v55 = vld [vmem:[%s6644_s4] ss:$8 sps:$4 sm:$0xff]  }
 0x18d   :  { %v910_v48 = vadd.f32 %v5540_v1, %v909_v58  ;;  %v4129_v34 = vpop.f32.mrb[22].mxu0  ;;  %4162 = vmatprep.mubr.bf16.mxu1 %v984_v54  ;;  %v4521_v58 = vld [vmem:[%s6644_s4 + $0x10] ss:$8 sps:$4 sm:$0xff]  }
 0x18e   :  { %v921_v39 = vadd.f32 %v4129_v34, %v5540_v1  ;;  %v912_v61 = vpop.f32.mrb[23].mxu0  ;;  %4163 = vmatmul.mubr.bf16.gmra.mrb[16].mxu1 %v985_v51  ;;  %v946_v3 = vmax.f32 %v918_v59, 0.0  ;;  %v4519_v59 = vld [vmem:[%s6644_s4 + $0x14] ss:$8 sps:$4 sm:$0xff]   ;;  %v4524_v34 = vld [vmem:[%s6644_s4 + $0x20] ss:$8 sps:$4 sm:$0xff]  }
 0x18f   :  { %v913_v45 = vadd.f32 %v5540_v1, %v912_v61  ;;  %v944_v46 = vmax.f32 %v910_v48, 0.0  ;;  %v4522_v48 = vld [vmem:[%s6644_s4 + $0x24] ss:$8 sps:$4 sm:$0xff]   ;;  %v4527_v61 = vld [vmem:[%s6644_s4 + $0x30] ss:$8 sps:$4 sm:$0xff]  }
 0x190   :  { %v947_v57 = vmax.f32 %v921_v39, 0.0  ;;  %v4525_v39 = vld [vmem:[%s6644_s4 + $0x34] ss:$8 sps:$4 sm:$0xff]  }
 0x191   :  { %v945_v11 = vmax.f32 %v913_v45, 0.0  ;;  %v4528_v45 = vld [vmem:[%s6644_s4 + $0x44] ss:$8 sps:$4 sm:$0xff]  }
 0x192   :  { %v987_v33 = vpack.c.bf16 %v947_v57, %v946_v3  ;;  %v4530_v3 = vld [vmem:[%s6644_s4 + $0x40] ss:$8 sps:$4 sm:$0xff]   ;;  %v4531_v57 = vld [vmem:[%s6644_s4 + $0x54] ss:$8 sps:$4 sm:$0xff]  }
 0x193   :  { %v986_v2 = vpack.c.bf16 %v945_v11, %v944_v46  ;;  %v4533_v46 = vld [vmem:[%s6644_s4 + $0x50] ss:$8 sps:$4 sm:$0xff]   ;;  %v4534_v11 = vld [vmem:[%s6645_s5] sm:$0xff]  }
 0x194   :  { %1791 = vmatpush1.bf16.msra.mxu1 %v4534_v11 }
 0x195   :  { %4166 = vmatprep.mubr.bf16.mxu1 %v986_v2  ;;  %1792 = vmatprep.subr.bf16.mxu1 %v4806_v44  ;;  %v4536_v2 = vld [vmem:[%s6645_s5 + $0x10] sm:$0xff]  }
 0x196   :  { %4167 = vmatmul.mubr.bf16.gmra.mrb[20].mxu1 %v987_v33  ;;  %v4535_v33 = vld [vmem:[%s6645_s5 + $0x8] sm:$0xff]  }
 0x198   :  { %1793 = vmatpush1.bf16.msra.mxu1 %v4535_v33 }
 0x199   :  { %1794 = vmatprep.subr.bf16.mxu1 %v4806_v44 }
 0x19c   :  { %1795 = vmatpush1.bf16.msra.mxu1 %v4536_v2 }
 0x19d   :  { %1796 = vmatprep.subr.bf16.mxu1 %v4806_v44 }
 0x1a0   :  { %1797 = vmatpush1.bf16.msra.mxu1 %v4537_v30 }
 0x1a1   :  { %1798 = vmatprep.subr.bf16.mxu1 %v4806_v44 }
 0x240   :  { %v4148_v1 = vpop.f32.mrb[0].mxu1 }
 0x241   :  { %v1070_v62 = vpop.f32.mrb[1].mxu1 }
 0x242   :  { %v4149_v7 = vpop.f32.mrb[2].mxu1 }
 0x243   :  { %v1166_v28 = vpack.c.bf16 %v4149_v7, %v4148_v1  ;;  %v1073_v36 = vpop.f32.mrb[3].mxu1  ;;  %v4538_v1 = vld [vmem:[%s6645_s5 + $0x20] sm:$0xff]   ;;  %v4540_v7 = vld [vmem:[%s6645_s5 + $0x30] sm:$0xff]  }
 0x244   :  { %v1165_v31 = vpack.c.bf16 %v1073_v36, %v1070_v62  ;;  %1799 = vmatpush1.bf16.msra.mxu1 %v4538_v1  ;;  %v4539_v62 = vld [vmem:[%s6645_s5 + $0x28] sm:$0xff]   ;;  %v4542_v36 = vld [vmem:[%s6645_s5 + $0x40] sm:$0xff]  }
 0x245   :  { %1800 = vmatprep.subr.bf16.mxu1 %v4806_v44 }
 0x246   :  { %1251 = vmatpush1.bf16.msra.mxu0 %v1165_v31  ;;  %v4543_v31 = vld [vmem:[%s6645_s5 + $0x48] sm:$0xff]  }
 0x247   :  { %1252 = vmatprep.subr.bf16.mxu0 %v4806_v44 }
 0x248   :  { %1801 = vmatpush1.bf16.msra.mxu1 %v4539_v62  ;;  %v1420_v62 = vand.u32 7, %v4971_v20 }
 0x249   :  { %v4152_v10 = vpop.f32.mrb[4].mxu1  ;;  %1802 = vmatprep.subr.bf16.mxu1 %v4806_v44 }
 0x24a   :  { %v1086_v13 = vpop.f32.mrb[5].mxu1  ;;  %1253 = vmatpush1.bf16.msra.mxu0 %v1166_v28  ;;  %v4541_v28 = vld [vmem:[%s6645_s5 + $0x38] sm:$0xff]   ;;  %vm5746_vm13 = vcmp.eq.s32.totalorder %v1420_v62, 0 }
 0x24b   :  { %v4153_v56 = vpop.f32.mrb[6].mxu1  ;;  %1254 = vmatprep.subr.bf16.mxu0 %v4806_v44 }
 0x24c   :  { %v1168_v14 = vpack.c.bf16 %v4153_v56, %v4152_v10  ;;  %v1089_v25 = vpop.f32.mrb[7].mxu1  ;;  %1803 = vmatpush1.bf16.msra.mxu1 %v4540_v7  ;;  %v4544_v10 = vld [vmem:[%s6645_s5 + $0x50] sm:$0xff]   ;;  %v4546_v56 = vld [vmem:[%s6645_s5 + $0x60] sm:$0xff]  }
 0x24d   :  { %v1167_v43 = vpack.c.bf16 %v1089_v25, %v1086_v13  ;;  %1804 = vmatprep.subr.bf16.mxu1 %v4806_v44  ;;  %v4545_v13 = vld [vmem:[%s6645_s5 + $0x58] sm:$0xff]   ;;  %v1416_v25 = vand.u32 7, %v4963_v16 }
 0x24f   :  { %1255 = vmatpush1.bf16.msra.mxu0 %v1167_v43  ;;  %vm5682_vm2 = vcmp.eq.s32.totalorder %v1416_v25, 0  ;;  %vm1476_vm7 = vcmp.eq.s32.totalorder %v1416_v25, 7 }
 0x250   :  { %1256 = vmatprep.subr.bf16.mxu0 %v4806_v44  ;;  %1805 = vmatpush1.bf16.msra.mxu1 %v4541_v28 }
 0x251   :  { %v4156_v32 = vpop.f32.mrb[8].mxu1  ;;  %1806 = vmatprep.subr.bf16.mxu1 %v4806_v44 }
 0x252   :  { %v1102_v26 = vpop.f32.mrb[9].mxu1 }
 0x253   :  { %v4157_v21 = vpop.f32.mrb[10].mxu1  ;;  %1257 = vmatpush1.bf16.msra.mxu0 %v1168_v14  ;;  %v1415_v14 = vand.u32 7, %v4953_v12 }
 0x254   :  { %v1170_v40 = vpack.c.bf16 %v4157_v21, %v4156_v32  ;;  %v1105_v52 = vpop.f32.mrb[11].mxu1  ;;  %1258 = vmatprep.subr.bf16.mxu0 %v4806_v44  ;;  %1807 = vmatpush1.bf16.msra.mxu1 %v4542_v36  ;;  %v4547_v32 = vld [vmem:[%s6645_s5 + $0x68] sm:$0xff]  }
 0x255   :  { %v1169_v22 = vpack.c.bf16 %v1105_v52, %v1102_v26  ;;  %1808 = vmatprep.subr.bf16.mxu1 %v4806_v44  ;;  %vm5678_vm1 = vcmp.eq.s32.totalorder %v1415_v14, 0  ;;  %vm5710_vm6 = vcmp.eq.s32.totalorder %v1415_v14, 7 }
 0x257   :  { %1259 = vmatpush1.bf16.msra.mxu0 %v1169_v22 }
 0x258   :  { %1260 = vmatprep.subr.bf16.mxu0 %v4806_v44  ;;  %1809 = vmatpush1.bf16.msra.mxu1 %v4543_v31 }
 0x259   :  { %v4160_v17 = vpop.f32.mrb[12].mxu1  ;;  %1810 = vmatprep.subr.bf16.mxu1 %v4806_v44 }
 0x25a   :  { %v1118_v8 = vpop.f32.mrb[13].mxu1 }
 0x25b   :  { %v4161_v0 = vpop.f32.mrb[14].mxu1  ;;  %1261 = vmatpush1.bf16.msra.mxu0 %v1170_v40 }
 0x25c   :  { %v1172_v6 = vpack.c.bf16 %v4161_v0, %v4160_v17  ;;  %v1121_v15 = vpop.f32.mrb[15].mxu1  ;;  %1262 = vmatprep.subr.bf16.mxu0 %v4806_v44  ;;  %1811 = vmatpush1.bf16.msra.mxu1 %v4544_v10 }
 0x25d   :  { %v1171_v24 = vpack.c.bf16 %v1121_v15, %v1118_v8  ;;  %1812 = vmatprep.subr.bf16.mxu1 %v4806_v44 }
 0x25f   :  { %1263 = vmatpush1.bf16.msra.mxu0 %v1171_v24 }
 0x260   :  { %1264 = vmatprep.subr.bf16.mxu0 %v4806_v44  ;;  %1813 = vmatpush1.bf16.msra.mxu1 %v4545_v13 }
 0x261   :  { %v4164_v35 = vpop.f32.mrb[16].mxu1  ;;  %1814 = vmatprep.subr.bf16.mxu1 %v4806_v44 }
 0x262   :  { %v1134_v29 = vpop.f32.mrb[17].mxu1 }
 0x263   :  { %v4165_v37 = vpop.f32.mrb[18].mxu1  ;;  %1265 = vmatpush1.bf16.msra.mxu0 %v1172_v6 }
 0x264   :  { %v1174_v5 = vpack.c.bf16 %v4165_v37, %v4164_v35  ;;  %v1137_v19 = vpop.f32.mrb[19].mxu1  ;;  %1266 = vmatprep.subr.bf16.mxu0 %v4806_v44  ;;  %1815 = vmatpush1.bf16.msra.mxu1 %v4546_v56 }
 0x265   :  { %v1173_v41 = vpack.c.bf16 %v1137_v19, %v1134_v29  ;;  %1816 = vmatprep.subr.bf16.mxu1 %v4806_v44  ;;  %v4548_v29 = vld [vmem:[%s6645_s5 + $0x70] sm:$0xff]   ;;  %v1417_v19 = vand.u32 7, %v5356_v4 }
 0x267   :  { %1267 = vmatpush1.bf16.msra.mxu0 %v1173_v41  ;;  %v1418_v41 = vand.u32 7, %v4967_v18  ;;  %vm5706_vm5 = vcmp.eq.s32.totalorder %v1417_v19, 0  ;;  %vm5742_vm11 = vcmp.eq.s32.totalorder %v1417_v19, 7 }
 0x268   :  { %1268 = vmatprep.subr.bf16.mxu0 %v4806_v44  ;;  %1817 = vmatpush1.bf16.msra.mxu1 %v4547_v32 }
 0x269   :  { %v4168_v47 = vpop.f32.mrb[20].mxu1  ;;  %1818 = vmatprep.subr.bf16.mxu1 %v4806_v44  ;;  %vm5714_vm8 = vcmp.eq.s32.totalorder %v1418_v41, 0  ;;  %vm1478_vm12 = vcmp.eq.s32.totalorder %v1418_v41, 7  ;;  %v1422_v41 = vand.u32 7, %v5039_v49 }
 0x26a   :  { %v1150_v63 = vpop.f32.mrb[21].mxu1 }
 0x26b   :  { %v4169_v38 = vpop.f32.mrb[22].mxu1  ;;  %1269 = vmatpush1.bf16.msra.mxu0 %v1174_v5 }
 0x26c   :  { %v1176_v50 = vpack.c.bf16 %v4169_v38, %v4168_v47  ;;  %v1153_v51 = vpop.f32.mrb[23].mxu1  ;;  %1270 = vmatprep.subr.bf16.mxu0 %v4806_v44  ;;  %1819 = vmatpush1.bf16.msra.mxu1 %v4548_v29 }
 0x26d   :  { %v1175_v54 = vpack.c.bf16 %v1153_v51, %v1150_v63 }
 0x26f   :  { %1271 = vmatpush1.bf16.msra.mxu0 %v1175_v54 }
 0x270   :  { %1272 = vmatprep.subr.bf16.mxu0 %v4806_v44 }
 0x273   :  { %1273 = vmatpush1.bf16.msra.mxu0 %v1176_v50 }
 0x276   :  { %1283 = vmatmul.mubr.bf16.vlgmr.msra.gmra.mrb[24].mxu0 %v4516_v55 }
 0x277   :  { %3801 = vmatprep.mubr.msk.bf16.mxu0 %vm6664_vm15, %v4519_v59 }
 0x27e   :  { %1291 = vmatmul.mubr.bf16.gmra.mrb[28].mxu0 %v4521_v58 }
 0x27f   :  { %3802 = vmatprep.mubr.msk.bf16.mxu0 %vm6664_vm15, %v4522_v48 }
 0x286   :  { %1299 = vmatmul.mubr.bf16.gmra.mrb[32].mxu0 %v4524_v34 }
 0x287   :  { %3803 = vmatprep.mubr.msk.bf16.mxu0 %vm6664_vm15, %v4525_v39 }
 0x28e   :  { %1307 = vmatmul.mubr.bf16.gmra.mrb[36].mxu0 %v4527_v61 }
 0x28f   :  { %3804 = vmatprep.mubr.msk.bf16.mxu0 %vm6664_vm15, %v4528_v45 }
 0x296   :  { %1315 = vmatmul.mubr.bf16.gmra.mrb[40].mxu0 %v4530_v3 }
 0x297   :  { %3805 = vmatprep.mubr.msk.bf16.mxu0 %vm6664_vm15, %v4531_v57  ;;  %v1419_v57 = vand.u32 7, %v5353_v23 }
 0x299   :  { %vm5738_vm9 = vcmp.eq.s32.totalorder %v1419_v57, 0 }
 0x29e   :  { %1323 = vmatmul.mubr.bf16.gmra.mrb[44].mxu0 %v4533_v46 }
 0x349   :  { %v1284_v43 = vpop.f32.mrb[24].mxu0 }
 0x34a   :  { %v1343_v26 = vrot.slane %v1284_v43, 7  ;;  %v1286_v40 = vpop.f32.mrb[25].mxu0  ;;  %v1379_v52 = vrot.slane %v1284_v43, 1 }
 0x34b   :  { %v1287_v22 = vpop.f32.mrb[26].mxu0 }
 0x34c   :  { %v5687_v8 = vsel %vm6667_vm10, 0.0, %v1343_v26  ;;  %v4415_v0 = vpack.i.bf16 %v1287_v22, %v1284_v43  ;;  %v1344_v6 = vrot.slane %v1287_v22, 7  ;;  %v1380_v15 = vrot.slane %v1287_v22, 1  ;;  %v1289_v24 = vpop.f32.mrb[27].mxu0 }
 0x34d   :  { %v1463_v35 = vsel %vm5678_vm1, 0.0, %v5687_v8  ;;  %vm1771_vm1 = vcmask 916480  }
 0x34e   :  { %v5697_v37 = vsel %vm6667_vm10, %v1343_v26, %v1344_v6  ;;  %4416 = vrot.lane.b32.xlu0 %v4415_v0, %s4807_s24  ;;  %v1381_v5 = vsel %vm6666_vm0, %v1379_v52, %v1380_v15  ;;  %v1421_v0 = vand.u32 7, %v5386_v60 }
 0x34f   :  { %v1464_v47 = vsel %vm5682_vm2, 0.0, %v5697_v37  ;;  %v1511_v33 = vsel %vm5710_vm6, 0.0, %v1381_v5  ;;  %vm5774_vm6 = vcmp.eq.s32.totalorder %v1419_v57, 7 }
 0x350   :  { %vm5770_vm14 = vcmp.eq.s32.totalorder %v1421_v0, 0 }
 0x351   :  { %v1292_v63 = vpop.f32.mrb[28].mxu0 }
 0x352   :  { %v1346_v38 = vrot.slane %v1292_v63, 7  ;;  %v1382_v50 = vrot.slane %v1292_v63, 1  ;;  %v1294_v51 = vpop.f32.mrb[29].mxu0 }
 0x353   :  { %v1295_v55 = vpop.f32.mrb[30].mxu0 }
 0x354   :  { %v5719_v48 = vsel %vm6667_vm10, %v1344_v6, %v1346_v38  ;;  %v4425_v34 = vpack.i.bf16 %v1295_v55, %v1292_v63  ;;  %v1348_v39 = vrot.slane %v1295_v55, 7  ;;  %v1384_v61 = vrot.slane %v1295_v55, 1  ;;  %v1297_v45 = vpop.f32.mrb[31].mxu0 }
 0x355   :  { %v1383_v3 = vsel %vm6666_vm0, %v1380_v15, %v1382_v50  ;;  %v1465_v46 = vsel %vm5706_vm5, 0.0, %v5719_v48 }
 0x356   :  { %v5727_v11 = vsel %vm6667_vm10, %v1346_v38, %v1348_v39  ;;  %4426 = vrot.lane.b32.xlu0 %v4425_v34, %s4807_s24  ;;  %v1512_v2 = vsel %vm1476_vm7, 0.0, %v1383_v3  ;;  %v1385_v30 = vsel %vm6666_vm0, %v1382_v50, %v1384_v61  ;;  %vm1480_vm7 = vcmp.eq.s32.totalorder %v1420_v62, 7 }
 0x357   :  { %v4420_v1 = vpack.i.bf16 %v1512_v2, %v1511_v33  ;;  %v1466_v7 = vsel %vm5714_vm8, 0.0, %v5727_v11  ;;  %v1513_v24 = vsel %vm5742_vm11, 0.0, %v1385_v30  ;;  %vm5778_vm11 = vcmp.eq.s32.totalorder %v1422_v41, 0 }
 0x358   :  { %v1423_v30 = vand.u32 7, %v5369_v27  ;;  %vm6782_vm8 = vcmask 1040384  }
 0x359   :  { %4421 = vrot.lane.b32.xlu1 %v4420_v1, %s4805_s3  ;;  %v1300_v28 = vpop.f32.mrb[32].mxu0 }
 0x35a   :  { %v1350_v36 = vrot.slane %v1300_v28, 7  ;;  %v1386_v31 = vrot.slane %v1300_v28, 1  ;;  %v1302_v10 = vpop.f32.mrb[33].mxu0  ;;  %vm5834_vm15 = vcmp.eq.s32.totalorder %v1423_v30, 7 }
 0x35b   :  { %v1303_v56 = vpop.f32.mrb[34].mxu0  ;;  %v1424_v10 = vand.u32 7, %v5047_v53 }
 0x35c   :  { %v5751_v43 = vsel %vm6667_vm10, %v1348_v39, %v1350_v36  ;;  %v4435_v32 = vpack.i.bf16 %v1303_v56, %v1300_v28  ;;  %v1352_v26 = vrot.slane %v1303_v56, 7  ;;  %v1388_v40 = vrot.slane %v1303_v56, 1  ;;  %v1305_v52 = vpop.f32.mrb[35].mxu0 }
 0x35d   :  { %v1387_v22 = vsel %vm6666_vm0, %v1384_v61, %v1386_v31  ;;  %v1467_v6 = vsel %vm5738_vm9, 0.0, %v5751_v43  ;;  %vm5810_vm4 = vcmp.eq.s32.totalorder %v1424_v10, 0  ;;  %vm6783_vm9 = vmmov %vm6782_vm8 }
 0x35e   :  { %v5759_v15 = vsel %vm6667_vm10, %v1350_v36, %v1352_v26  ;;  %4436 = vrot.lane.b32.xlu0 %v4435_v32, %s4807_s24  ;;  %v1514_v29 = vsel %vm1478_vm12, 0.0, %v1387_v22  ;;  %v1389_v5 = vsel %vm6666_vm0, %v1386_v31, %v1388_v40  ;;  %vm5802_vm12 = vcmp.eq.s32.totalorder %v1423_v30, 0 }
 0x35f   :  { %v4430_v19 = vpack.i.bf16 %v1514_v29, %v1513_v24  ;;  %v1468_v60 = vsel %vm5746_vm13, 0.0, %v5759_v15  ;;  %v1515_v62 = vsel %vm5774_vm6, 0.0, %v1389_v5  ;;  %vm5806_vm6 = vcmp.eq.s32.totalorder %v1421_v0, 7 }
 0x361   :  { %4431 = vrot.lane.b32.xlu1 %v4430_v19, %s4805_s3  ;;  %v1308_v63 = vpop.f32.mrb[36].mxu0 }
 0x362   :  { %v1354_v38 = vrot.slane %v1308_v63, 7  ;;  %v1390_v50 = vrot.slane %v1308_v63, 1  ;;  %v1310_v51 = vpop.f32.mrb[37].mxu0 }
 0x363   :  { %v1311_v59 = vpop.f32.mrb[38].mxu0 }
 0x364   :  { %v5783_v39 = vsel %vm6667_vm10, %v1352_v26, %v1354_v38  ;;  %v4445_v61 = vpack.i.bf16 %v1311_v59, %v1308_v63  ;;  %v1356_v45 = vrot.slane %v1311_v59, 7  ;;  %v1392_v3 = vrot.slane %v1311_v59, 1  ;;  %v1313_v33 = vpop.f32.mrb[39].mxu0 }
 0x365   :  { %v1391_v2 = vsel %vm6666_vm0, %v1388_v40, %v1390_v50  ;;  %v1469_v57 = vsel %vm5770_vm14, 0.0, %v5783_v39 }
 0x366   :  { %v5791_v1 = vsel %vm6667_vm10, %v1354_v38, %v1356_v45  ;;  %4446 = vrot.lane.b32.xlu0 %v4445_v61, %s4807_s24  ;;  %v1516_v28 = vsel %vm1480_vm7, 0.0, %v1391_v2  ;;  %v1393_v36 = vsel %vm6666_vm0, %v1390_v50, %v1392_v3  ;;  %vm1482_vm7 = vcmp.eq.s32.totalorder %v1422_v41, 7 }
 0x367   :  { %v4440_v31 = vpack.i.bf16 %v1516_v28, %v1515_v62  ;;  %v1470_v27 = vsel %vm5778_vm11, 0.0, %v5791_v1  ;;  %v1425_v50 = vand.u32 7, %v5421_v42  ;;  %v1517_v51 = vsel %vm5806_vm6, 0.0, %v1393_v36  ;;  %v4552_v28 = vld [vmem:[%s6647_s7 + $0x18] sm:$0xff]  }
 0x369   :  { %4441 = vrot.lane.b32.xlu1 %v4440_v31, %s4805_s3  ;;  %v1316_v56 = vpop.f32.mrb[40].mxu0  ;;  %vm5838_vm6 = vcmp.eq.s32.totalorder %v1425_v50, 0  ;;  %vm5846_vm3 = vcmp.eq.s32.totalorder %v1425_v50, 7 }
 0x36a   :  { %v1358_v14 = vrot.slane %v1316_v56, 7  ;;  %v1394_v32 = vrot.slane %v1316_v56, 1  ;;  %v1318_v26 = vpop.f32.mrb[41].mxu0 }
 0x36b   :  { %v1319_v52 = vpop.f32.mrb[42].mxu0 }
 0x36c   :  { %v5815_v24 = vsel %vm6667_vm10, %v1356_v45, %v1358_v14  ;;  %v4455_v29 = vpack.i.bf16 %v1319_v52, %v1316_v56  ;;  %v1360_v5 = vrot.slane %v1319_v52, 7  ;;  %v1396_v19 = vrot.slane %v1319_v52, 1  ;;  %v1321_v63 = vpop.f32.mrb[43].mxu0 }
 0x36d   :  { %v1395_v38 = vsel %vm6666_vm0, %v1392_v3, %v1394_v32  ;;  %v1471_v0 = vsel %vm5802_vm12, 0.0, %v5815_v24  ;;  %v1426_v45 = vand.u32 7, %v5075_v9  ;;  %vm6759_vm12 = vcmask 1046528  }
 0x36e   :  { %v5823_v41 = vsel %vm6667_vm10, %v1358_v14, %v1360_v5  ;;  %4456 = vrot.lane.b32.xlu0 %v4455_v29, %s4807_s24  ;;  %v1518_v59 = vsel %vm1482_vm7, 0.0, %v1395_v38  ;;  %v1397_v34 = vsel %vm6666_vm0, %v1394_v32, %v1396_v19  ;;  %vm5842_vm7 = vcmp.eq.s32.totalorder %v1424_v10, 7  ;;  %vm6761_vm14 = vmmov %vm6759_vm12 }
 0x36f   :  { %v4450_v61 = vpack.i.bf16 %v1518_v59, %v1517_v51  ;;  %v1472_v42 = vsel %vm5810_vm4, 0.0, %v5823_v41  ;;  %vm5850_vm0 = vcmp.eq.s32.totalorder %v1426_v45, 7  ;;  %vm5854_vm10 = vcmp.eq.s32.totalorder %v1426_v45, 0 }
 0x370   :  { %vm6758_vm4 = vcmask 1040384   ;;  %v1519_v63 = vsel %vm5834_vm15, 0.0, %v1397_v34 }
 0x371   :  { %4451 = vrot.lane.b32.xlu1 %v4450_v61, %s4805_s3  ;;  %v1324_v3 = vpop.f32.mrb[44].mxu0  ;;  %vm6760_vm11 = vmmov %vm6758_vm4 }
 0x372   :  { %v1362_v33 = vrot.slane %v1324_v3, 7  ;;  %v1398_v2 = vrot.slane %v1324_v3, 1  ;;  %v1326_v62 = vpop.f32.mrb[45].mxu0 }
 0x373   :  { %v1327_v31 = vpop.f32.mrb[46].mxu0  ;;  %v4551_v62 = vld [vmem:[%s6647_s7 + $0x10] sm:$0xff]  }
 0x374   :  { %v5859_v32 = vsel %vm6758_vm4, %v1360_v5, %v1362_v33  ;;  %v4465_v26 = vpack.i.bf16 %v1327_v31, %v1324_v3  ;;  %v1364_v10 = vrot.slane %v1327_v31, 7  ;;  %v1400_v52 = vrot.slane %v1327_v31, 1  ;;  %v1329_v22 = vpop.f32.mrb[47].mxu0  ;;  %vm6762_vm4 = vmmov %vm6759_vm12 }
 0x375   :  { %v1399_v29 = vsel %vm6759_vm12, %v1396_v19, %v1398_v2  ;;  %v1473_v38 = vsel %vm5838_vm6, 0.0, %v5859_v32 }
 0x376   :  { %v5868_v50 = vsel %vm6760_vm11, %v1362_v33, %v1364_v10  ;;  %v1414_v51 = vsel %vm6761_vm14, %v1400_v52, 0.0  ;;  %4466 = vrot.lane.b32.xlu0 %v4465_v26, %s4807_s24  ;;  %v1520_v5 = vsel %vm5842_vm7, 0.0, %v1399_v29  ;;  %v1401_v59 = vsel %vm6762_vm4, %v1398_v2, %v1400_v52  ;;  %v4549_v33 = vld [vmem:[%s6647_s7] sm:$0xff]   ;;  %v4550_v2 = vld [vmem:[%s6647_s7 + $0x8] sm:$0xff]  }
 0x377   :  { %v4460_v19 = vpack.i.bf16 %v1520_v5, %v1519_v63  ;;  %v1521_v34 = vsel %vm5846_vm3, 0.0, %v1401_v59  ;;  %v1522_v61 = vsel %vm5850_vm0, 0.0, %v1414_v51  ;;  %v1474_v45 = vsel %vm5854_vm10, 0.0, %v5868_v50  ;;  %4170 = vmatprep.subr.bf16.mxu0 %v4549_v33  ;;  %v4553_v50 = vld [vmem:[%s6647_s7 + $0x20] sm:$0xff]  }
 0x378   :  { %v4470_v3 = vpack.i.bf16 %v1522_v61, %v1521_v34  ;;  %4171 = vmatpush3.bf16.msra.mxu0 %v4549_v33  ;;  %vm1607_vm0 = vcmask 654336   ;;  %vm6763_vm3 = vcmask 261120   ;;  %vm4809_vm10 = vmmov 0  }
 0x379   :  { %4461 = vrot.lane.b32.xlu1 %v4460_v19, %s4805_s3  ;;  %4172 = vmatprep.subr.bf16.mxu0 %v4550_v2  ;;  %vm6764_vm15 = vmmov %vm6763_vm3 }
 0x37a   :  { %vm6765_vm2 = vmmov %vm6763_vm3 }
 0x37b   :  { %vm6766_vm5 = vmmov %vm6765_vm2 }
 0x37c   :  { %4173 = vmatpush3.bf16.msra.mxu0 %v4550_v2  ;;  %vm6769_vm13 = vmmov %vm6765_vm2 }
 0x37d   :  { %4471 = vrot.lane.b32.xlu1 %v4470_v3, %s4805_s3  ;;  %4174 = vmatprep.subr.bf16.mxu0 %v4551_v62  ;;  %vm6770_vm14 = vmmov %vm6765_vm2 }
 0x37e   :  { %vm6773_vm7 = vmmov %vm6765_vm2 }
 0x37f   :  { %vm6774_vm4 = vmmov %vm6765_vm2 }
 0x380   :  { %4175 = vmatpush3.bf16.msra.mxu0 %v4551_v62  ;;  %vm6777_vm6 = vmmov %vm6765_vm2 }
 0x381   :  { %4176 = vmatprep.subr.bf16.mxu0 %v4552_v28 }
 0x384   :  { %4177 = vmatpush3.bf16.msra.mxu0 %v4552_v28 }
 0x385   :  { %4178 = vmatprep.subr.bf16.mxu0 %v4553_v50 }
 0x388   :  { %4179 = vmatpush3.bf16.msra.mxu0 %v4553_v50 }
 0x3c0   :  { %v4417_v31 = vpop.permute.xlu0 %4416 }
 0x3c1   :  { %v4419_v9 = vunpack.i.h.bf16 %v4417_v31  ;;  %v4418_v56 = vunpack.i.l.bf16 %v4417_v31 }
 0x3c3   :  { %v1608_v14 = vsel %vm1607_vm0, %v1463_v35, %v4418_v56  ;;  %v1609_v26 = vsel %vm1607_vm0, %v1464_v47, %v4419_v9 }
 0x3c4   :  { %v1662_v10 = vpack.c.bf16 %v1609_v26, %v1608_v14 }
 0x3c8   :  { %v4427_v52 = vpop.permute.xlu0 %4426 }
 0x3c9   :  { %v4429_v22 = vunpack.i.h.bf16 %v4427_v52  ;;  %v4428_v29 = vunpack.i.l.bf16 %v4427_v52 }
 0x3cb   :  { %v4422_v63 = vpop.permute.xlu1 %4421  ;;  %v1610_v21 = vsel %vm1607_vm0, %v1465_v46, %v4428_v29  ;;  %v1611_v17 = vsel %vm1607_vm0, %v1466_v7, %v4429_v22 }
 0x3cc   :  { %v4424_v8 = vunpack.i.h.bf16 %v4422_v63  ;;  %v4423_v35 = vunpack.i.l.bf16 %v4422_v63  ;;  %v1664_v37 = vpack.c.bf16 %v1611_v17, %v1610_v21 }
 0x3ce   :  { %v1621_v47 = vsel %vm6763_vm3, %v4419_v9, %v4424_v8  ;;  %v1620_v51 = vsel %vm6764_vm15, %v4418_v56, %v4423_v35  ;;  %vm6775_vm3 = vmmov %vm6765_vm2 }
 0x3cf   :  { %v1663_v5 = vpack.c.bf16 %v1621_v47, %v1620_v51  ;;  %vm6776_vm15 = vmmov %vm6765_vm2 }
 0x3d0   :  { %v4437_v54 = vpop.permute.xlu0 %4436 }
 0x3d1   :  { %3822 = vmatprep.mubr.msk.bf16.mxu1 %vm1771_vm1, %v1663_v5  ;;  %v4439_v48 = vunpack.i.h.bf16 %v4437_v54  ;;  %v4438_v46 = vunpack.i.l.bf16 %v4437_v54  ;;  %v4555_v5 = vld [vmem:[%s6647_s7 + $0x30] sm:$0xff]   ;;  %v4556_v54 = vld [vmem:[%s6647_s7 + $0x38] sm:$0xff]  }
 0x3d2   :  { %1823 = vmatmul.mubr.bf16.vlgmr.msra.gmra.mrb[24].mxu1 %v1662_v10 }
 0x3d3   :  { %v4432_v58 = vpop.permute.xlu1 %4431  ;;  %v1612_v11 = vsel %vm1607_vm0, %v1467_v6, %v4438_v46  ;;  %v1613_v7 = vsel %vm1607_vm0, %v1468_v60, %v4439_v48 }
 0x3d4   :  { %v4434_v59 = vunpack.i.h.bf16 %v4432_v58  ;;  %v4433_v19 = vunpack.i.l.bf16 %v4432_v58  ;;  %v1666_v34 = vpack.c.bf16 %v1613_v7, %v1612_v11 }
 0x3d6   :  { %v1623_v61 = vsel %vm6765_vm2, %v4429_v22, %v4434_v59  ;;  %v1622_v3 = vsel %vm6766_vm5, %v4428_v29, %v4433_v19 }
 0x3d7   :  { %v1665_v33 = vpack.c.bf16 %v1623_v61, %v1622_v3 }
 0x3d8   :  { %v4447_v2 = vpop.permute.xlu0 %4446 }
 0x3d9   :  { %3823 = vmatprep.mubr.msk.bf16.mxu1 %vm1771_vm1, %v1665_v33  ;;  %v4449_v13 = vunpack.i.h.bf16 %v4447_v2  ;;  %v4448_v43 = vunpack.i.l.bf16 %v4447_v2 }
 0x3da   :  { %1831 = vmatmul.mubr.bf16.gmra.mrb[28].mxu1 %v1664_v37 }
 0x3db   :  { %v4442_v6 = vpop.permute.xlu1 %4441  ;;  %v1614_v25 = vsel %vm1607_vm0, %v1469_v57, %v4448_v43  ;;  %v1615_v15 = vsel %vm1607_vm0, %v1470_v27, %v4449_v13 }
 0x3dc   :  { %v4444_v60 = vunpack.i.h.bf16 %v4442_v6  ;;  %v4443_v62 = vunpack.i.l.bf16 %v4442_v6  ;;  %v1668_v28 = vpack.c.bf16 %v1615_v15, %v1614_v25 }
 0x3de   :  { %v1625_v31 = vsel %vm6769_vm13, %v4439_v48, %v4444_v60  ;;  %v1624_v9 = vsel %vm6770_vm14, %v4438_v46, %v4443_v62  ;;  %v3806_v48 = vld [vmem:[%s6646_s6] ss:$0 sm:$0xff]  ;;  %vm6784_vm13 = vcmask 1046528  }
 0x3df   :  { %v1667_v56 = vpack.c.bf16 %v1625_v31, %v1624_v9 }
 0x3e0   :  { %v4457_v14 = vpop.permute.xlu0 %4456 }
 0x3e1   :  { %3824 = vmatprep.mubr.msk.bf16.mxu1 %vm1771_vm1, %v1667_v56  ;;  %v4459_v55 = vunpack.i.h.bf16 %v4457_v14  ;;  %v4458_v39 = vunpack.i.l.bf16 %v4457_v14 }
 0x3e2   :  { %1839 = vmatmul.mubr.bf16.gmra.mrb[32].mxu1 %v1666_v34 }
 0x3e3   :  { %v4452_v57 = vpop.permute.xlu1 %4451  ;;  %v1616_v49 = vsel %vm1607_vm0, %v1471_v0, %v4458_v39  ;;  %v1617_v1 = vsel %vm1607_vm0, %v1472_v42, %v4459_v55 }
 0x3e4   :  { %v4454_v27 = vunpack.i.h.bf16 %v4452_v57  ;;  %v4453_v26 = vunpack.i.l.bf16 %v4452_v57  ;;  %v1670_v10 = vpack.c.bf16 %v1617_v1, %v1616_v49 }
 0x3e6   :  { %v1627_v52 = vsel %vm6773_vm7, %v4449_v13, %v4454_v27  ;;  %v1626_v22 = vsel %vm6774_vm4, %v4448_v43, %v4453_v26  ;;  %vm6791_vm4 = vmmov %vm6782_vm8 }
 0x3e7   :  { %v1669_v29 = vpack.c.bf16 %v1627_v52, %v1626_v22 }
 0x3e8   :  { %v4467_v63 = vpop.permute.xlu0 %4466 }
 0x3e9   :  { %3825 = vmatprep.mubr.msk.bf16.mxu1 %vm1771_vm1, %v1669_v29  ;;  %v4469_v40 = vunpack.i.h.bf16 %v4467_v63  ;;  %v4468_v24 = vunpack.i.l.bf16 %v4467_v63 }
 0x3ea   :  { %1847 = vmatmul.mubr.bf16.gmra.mrb[36].mxu1 %v1668_v28 }
 0x3eb   :  { %v4462_v0 = vpop.permute.xlu1 %4461  ;;  %v1618_v53 = vsel %vm1607_vm0, %v1473_v38, %v4468_v24  ;;  %v1619_v41 = vsel %vm1607_vm0, %v1474_v45, %v4469_v40  ;;  %v4554_v45 = vld [vmem:[%s6647_s7 + $0x28] sm:$0xff]   ;;  %vm2061_vm0 = vcmask 785408  }
 0x3ec   :  { %v4464_v42 = vunpack.i.h.bf16 %v4462_v0  ;;  %v4463_v21 = vunpack.i.l.bf16 %v4462_v0  ;;  %v1672_v17 = vpack.c.bf16 %v1619_v41, %v1618_v53  ;;  %4180 = vmatprep.subr.bf16.mxu0 %v4554_v45 }
 0x3ed   :  { %4181 = vmatpush3.bf16.msra.mxu0 %v4554_v45 }
 0x3ee   :  { %v1629_v8 = vsel %vm6775_vm3, %v4459_v55, %v4464_v42  ;;  %v1628_v35 = vsel %vm6776_vm15, %v4458_v39, %v4463_v21  ;;  %4182 = vmatprep.subr.bf16.mxu0 %v4555_v5  ;;  %vm6792_vm3 = vmmov %vm6784_vm13 }
 0x3ef   :  { %v1671_v37 = vpack.c.bf16 %v1629_v8, %v1628_v35  ;;  %v4472_v47 = vpop.permute.xlu1 %4471  ;;  %vm6793_vm15 = vmmov %vm6791_vm4 }
 0x3f0   :  { %v4474_v36 = vunpack.i.h.bf16 %v4472_v47  ;;  %v4473_v51 = vunpack.i.l.bf16 %v4472_v47 }
 0x3f1   :  { %3826 = vmatprep.mubr.msk.bf16.mxu1 %vm1771_vm1, %v1671_v37  ;;  %4183 = vmatpush3.bf16.msra.mxu0 %v4555_v5  ;;  %v4808_v5 = vmov 0.0  }
 0x3f2   :  { %v1631_v32 = vsel %vm6777_vm6, %v4469_v40, %v4474_v36  ;;  %v1630_v30 = vsel %vm6765_vm2, %v4468_v24, %v4473_v51  ;;  %1855 = vmatmul.mubr.bf16.gmra.mrb[40].mxu1 %v1670_v10  ;;  %4184 = vmatprep.subr.bf16.mxu0 %v4556_v54  ;;  %vm6794_vm6 = vmmov %vm6792_vm3 }
 0x3f3   :  { %v1673_v38 = vpack.c.bf16 %v1631_v32, %v1630_v30 }
 0x3f5   :  { %3827 = vmatprep.mubr.msk.bf16.mxu1 %vm1771_vm1, %v1673_v38  ;;  %4185 = vmatpush3.bf16.msra.mxu0 %v4556_v54 }
 0x3f6   :  { %4198 = vmatprep.subr.bf16.mxu0 %v4808_v5 }
 0x3fa   :  { %1863 = vmatmul.mubr.bf16.gmra.mrb[44].mxu1 %v1672_v17 }
 0x4a5   :  { %v1824_v46 = vpop.f32.mrb[24].mxu1 }
 0x4a6   :  { %v1825_v58 = vadd.f32 %v3806_v48, %v1824_v46  ;;  %v1826_v11 = vpop.f32.mrb[25].mxu1 }
 0x4a7   :  { %v1827_v7 = vpop.f32.mrb[26].mxu1 }
 0x4a8   :  { %v1828_v59 = vadd.f32 %v3806_v48, %v1827_v7  ;;  %v1829_v19 = vpop.f32.mrb[27].mxu1  ;;  %v1871_v34 = vmax.f32 %v1825_v58, 0.0 }
 0x4aa   :  { %v1872_v61 = vmax.f32 %v1828_v59, 0.0 }
 0x4ac   :  { %v1905_v3 = vpack.c.bf16 %v1872_v61, %v1871_v34 }
 0x4ad   :  { %v1832_v33 = vpop.f32.mrb[28].mxu1 }
 0x4ae   :  { %v1833_v2 = vadd.f32 %v3806_v48, %v1832_v33  ;;  %v1834_v13 = vpop.f32.mrb[29].mxu1  ;;  %4186 = vmatprep.mubr.bf16.mxu0 %v1905_v3 }
 0x4af   :  { %v1835_v43 = vpop.f32.mrb[30].mxu1 }
 0x4b0   :  { %v1836_v6 = vadd.f32 %v3806_v48, %v1835_v43  ;;  %v1837_v25 = vpop.f32.mrb[31].mxu1  ;;  %v1873_v15 = vmax.f32 %v1833_v2, 0.0 }
 0x4b2   :  { %v1874_v60 = vmax.f32 %v1836_v6, 0.0 }
 0x4b4   :  { %v1906_v62 = vpack.c.bf16 %v1874_v60, %v1873_v15  ;;  %v4557_v60 = vld [vmem:[%s6648_s8] sm:$0xff]  }
 0x4b5   :  { %v1840_v28 = vpop.f32.mrb[32].mxu1 }
 0x4b6   :  { %v1841_v31 = vadd.f32 %v3806_v48, %v1840_v28  ;;  %v1842_v9 = vpop.f32.mrb[33].mxu1  ;;  %4187 = vmatmul.mubr.bf16.vlgmr.msra.gmra.mrb[48].mxu0 %v1906_v62  ;;  %v4558_v62 = vld [vmem:[%s6648_s8 + $0x8] sm:$0xff]   ;;  %v4559_v28 = vld [vmem:[%s6648_s8 + $0x10] sm:$0xff]  }
 0x4b7   :  { %v1843_v56 = vpop.f32.mrb[34].mxu1  ;;  %v4561_v9 = vld [vmem:[%s6649_s9] sm:$0xff]  }
 0x4b8   :  { %v1844_v14 = vadd.f32 %v3806_v48, %v1843_v56  ;;  %v1845_v55 = vpop.f32.mrb[35].mxu1  ;;  %v1875_v39 = vmax.f32 %v1841_v31, 0.0  ;;  %v4560_v31 = vld [vmem:[%s6649_s9 + $0x40] sm:$0xff]   ;;  %v4562_v56 = vld [vmem:[%s6649_s9 + $0x48] sm:$0xff]  }
 0x4b9   :  { %4045 = vmatprep.subr.bf16.mxu1 %v4560_v31  ;;  %v4564_v55 = vld [vmem:[%s6649_s9 + $0x50] sm:$0xff]   ;;  %v2175_v31 = vand.u32 3, %v4971_v20 }
 0x4ba   :  { %v1876_v57 = vmax.f32 %v1844_v14, 0.0  ;;  %4046 = vmatpush3.bf16.msra.mxu1 %v4561_v9  ;;  %v4563_v14 = vld [vmem:[%s6649_s9 + $0x8] sm:$0xff]  }
 0x4bb   :  { %4047 = vmatprep.subr.bf16.mxu1 %v4562_v56 }
 0x4bc   :  { %v1907_v49 = vpack.c.bf16 %v1876_v57, %v1875_v39  ;;  %v4565_v39 = vld [vmem:[%s6649_s9 + $0x10] sm:$0xff]   ;;  %v4566_v57 = vld [vmem:[%s6649_s9 + $0x58] sm:$0xff]  }
 0x4bd   :  { %v1848_v1 = vpop.f32.mrb[36].mxu1 }
 0x4be   :  { %v1849_v27 = vadd.f32 %v3806_v48, %v1848_v1  ;;  %v1850_v26 = vpop.f32.mrb[37].mxu1  ;;  %4190 = vmatprep.mubr.bf16.mxu0 %v1907_v49  ;;  %4048 = vmatpush3.bf16.msra.mxu1 %v4563_v14  ;;  %v4567_v49 = vld [vmem:[%s6649_s9 + $0x18] sm:$0xff]   ;;  %v4568_v1 = vld [vmem:[%s6649_s9 + $0x60] sm:$0xff]  }
 0x4bf   :  { %v1851_v10 = vpop.f32.mrb[38].mxu1  ;;  %4049 = vmatprep.subr.bf16.mxu1 %v4564_v55  ;;  %v4570_v26 = vld [vmem:[%s6649_s9 + $0x68] sm:$0xff]  }
 0x4c0   :  { %v1852_v52 = vadd.f32 %v3806_v48, %v1851_v10  ;;  %v1853_v22 = vpop.f32.mrb[39].mxu1  ;;  %v1877_v29 = vmax.f32 %v1849_v27, 0.0  ;;  %v4569_v27 = vld [vmem:[%s6649_s9 + $0x20] sm:$0xff]  }
 0x4c1   :  { %v4571_v10 = vld [vmem:[%s6649_s9 + $0x80] sm:$0xff]   ;;  %v2170_v22 = vand.u32 3, %v4953_v12 }
 0x4c2   :  { %v1878_v63 = vmax.f32 %v1852_v52, 0.0  ;;  %4050 = vmatpush3.bf16.msra.mxu1 %v4565_v39  ;;  %v4572_v52 = vld [vmem:[%s6649_s9 + $0x28] sm:$0xff]  }
 0x4c3   :  { %4051 = vmatprep.subr.bf16.mxu1 %v4566_v57  ;;  %vm6064_vm1 = vcmp.eq.s32.totalorder %v2170_v22, 0  ;;  %vm6102_vm11 = vcmp.eq.s32.totalorder %v2170_v22, 3 }
 0x4c4   :  { %v1908_v40 = vpack.c.bf16 %v1878_v63, %v1877_v29  ;;  %v2171_v29 = vand.u32 3, %v4963_v16  ;;  %v4573_v63 = vld [vmem:[%s6649_s9 + $0x70] sm:$0xff]  }
 0x4c5   :  { %v1856_v24 = vpop.f32.mrb[40].mxu1 }
 0x4c6   :  { %v1857_v0 = vadd.f32 %v3806_v48, %v1856_v24  ;;  %v1858_v53 = vpop.f32.mrb[41].mxu1  ;;  %4191 = vmatmul.mubr.bf16.gmra.mrb[52].mxu0 %v1908_v40  ;;  %4052 = vmatpush3.bf16.msra.mxu1 %v4567_v49  ;;  %v4574_v24 = vld [vmem:[%s6649_s9 + $0x30] sm:$0xff]   ;;  %vm6068_vm5 = vcmp.eq.s32.totalorder %v2171_v29, 0  ;;  %vm2201_vm12 = vcmp.eq.s32.totalorder %v2171_v29, 3 }
 0x4c7   :  { %v1859_v41 = vpop.f32.mrb[42].mxu1  ;;  %4053 = vmatprep.subr.bf16.mxu1 %v4568_v1  ;;  %v4581_v1 = vld [vmem:[%s6651_s11 + $0x18] sm:$0xff]  }
 0x4c8   :  { %v1860_v42 = vadd.f32 %v3806_v48, %v1859_v41  ;;  %v1861_v21 = vpop.f32.mrb[43].mxu1  ;;  %v1879_v17 = vmax.f32 %v1857_v0, 0.0 }
 0x4ca   :  { %v1880_v8 = vmax.f32 %v1860_v42, 0.0  ;;  %4054 = vmatpush3.bf16.msra.mxu1 %v4569_v27 }
 0x4cb   :  { %4055 = vmatprep.subr.bf16.mxu1 %v4570_v26  ;;  %v4582_v26 = vld [vmem:[%s6651_s11 + $0x20] sm:$0xff]  }
 0x4cc   :  { %v1909_v35 = vpack.c.bf16 %v1880_v8, %v1879_v17  ;;  %v4575_v17 = vld [vmem:[%s6649_s9 + $0x88] sm:$0xff]  }
 0x4cd   :  { %v1864_v37 = vpop.f32.mrb[44].mxu1 }
 0x4ce   :  { %v1865_v47 = vadd.f32 %v3806_v48, %v1864_v37  ;;  %v1866_v36 = vpop.f32.mrb[45].mxu1  ;;  %4194 = vmatprep.mubr.bf16.mxu0 %v1909_v35  ;;  %4056 = vmatpush3.bf16.msra.mxu1 %v4572_v52 }
 0x4cf   :  { %v1867_v51 = vpop.f32.mrb[46].mxu1  ;;  %4057 = vmatprep.subr.bf16.mxu1 %v4573_v63 }
 0x4d0   :  { %v1868_v32 = vadd.f32 %v3806_v48, %v1867_v51  ;;  %v1869_v30 = vpop.f32.mrb[47].mxu1  ;;  %v1881_v38 = vmax.f32 %v1865_v47, 0.0  ;;  %v4576_v51 = vld [vmem:[%s6649_s9 + $0x78] sm:$0xff]  }
 0x4d1   :  { %v4577_v30 = vld [vmem:[%s6649_s9 + $0x38] sm:$0xff]   ;;  %s4811_s9 = smov 64  }
 0x4d2   :  { %v1882_v50 = vmax.f32 %v1868_v32, 0.0  ;;  %4058 = vmatpush3.bf16.msra.mxu1 %v4574_v24 }
 0x4d3   :  { %4059 = vmatprep.subr.bf16.mxu1 %v4576_v51 }
 0x4d4   :  { %v1910_v45 = vpack.c.bf16 %v1882_v50, %v1881_v38 }
 0x4d6   :  { %4195 = vmatmul.mubr.bf16.gmra.mrb[56].mxu0 %v1910_v45  ;;  %v2172_v45 = vand.u32 3, %v5356_v4  ;;  %4060 = vmatpush3.bf16.msra.mxu1 %v4577_v30 }
 0x4d7   :  { %4210 = vmatprep.mubr.msk.bf16.mxu0 %vm4809_vm10, %v4808_v5  ;;  %4238 = vmatprep.subr.bf16.mxu1 %v4808_v5 }
 0x4d8   :  { %vm6098_vm14 = vcmp.eq.s32.totalorder %v2172_v45, 0  ;;  %vm6124_vm2 = vcmp.eq.s32.totalorder %v2172_v45, 3 }
 0x589   :  { %v4188_v54 = vpop.f32.mrb[48].mxu0 }
 0x58a   :  { %v1993_v46 = vpop.f32.mrb[49].mxu0 }
 0x58b   :  { %v4189_v58 = vpop.f32.mrb[50].mxu0 }
 0x58c   :  { %v2041_v11 = vpack.c.bf16 %v4189_v58, %v4188_v54  ;;  %v1996_v7 = vpop.f32.mrb[51].mxu0  ;;  %v2173_v54 = vand.u32 3, %v4967_v18 }
 0x58d   :  { %v2040_v59 = vpack.c.bf16 %v1996_v7, %v1993_v46 }
 0x58e   :  { %vm6106_vm7 = vcmp.eq.s32.totalorder %v2173_v54, 0 }
 0x58f   :  { %4199 = vmatpush3.bf16.msra.mxu0 %v2040_v59 }
 0x590   :  { %4200 = vmatprep.subr.bf16.mxu0 %v4808_v5 }
 0x593   :  { %4201 = vmatpush3.bf16.msra.mxu0 %v2041_v11 }
 0x594   :  { %4202 = vmatprep.subr.bf16.mxu0 %v4808_v5 }
 0x599   :  { %v4192_v48 = vpop.f32.mrb[52].mxu0 }
 0x59a   :  { %v2009_v19 = vpop.f32.mrb[53].mxu0 }
 0x59b   :  { %v4193_v34 = vpop.f32.mrb[54].mxu0 }
 0x59c   :  { %v2043_v61 = vpack.c.bf16 %v4193_v34, %v4192_v48  ;;  %v2012_v3 = vpop.f32.mrb[55].mxu0 }
 0x59d   :  { %v2042_v33 = vpack.c.bf16 %v2012_v3, %v2009_v19 }
 0x59f   :  { %4203 = vmatpush3.bf16.msra.mxu0 %v2042_v33 }
 0x5a0   :  { %4204 = vmatprep.subr.bf16.mxu0 %v4808_v5 }
 0x5a3   :  { %4205 = vmatpush3.bf16.msra.mxu0 %v2043_v61 }
 0x5a4   :  { %4206 = vmatprep.subr.bf16.mxu0 %v4808_v5 }
 0x5a9   :  { %v4196_v2 = vpop.f32.mrb[56].mxu0 }
 0x5aa   :  { %v2025_v13 = vpop.f32.mrb[57].mxu0 }
 0x5ab   :  { %v4197_v43 = vpop.f32.mrb[58].mxu0 }
 0x5ac   :  { %v2045_v6 = vpack.c.bf16 %v4197_v43, %v4196_v2  ;;  %v2028_v25 = vpop.f32.mrb[59].mxu0  ;;  %v2174_v43 = vand.u32 3, %v5353_v23 }
 0x5ad   :  { %v2044_v15 = vpack.c.bf16 %v2028_v25, %v2025_v13 }
 0x5af   :  { %4207 = vmatpush3.bf16.msra.mxu0 %v2044_v15 }
 0x5b0   :  { %4208 = vmatprep.subr.bf16.mxu0 %v4808_v5 }
 0x5b3   :  { %4209 = vmatpush3.bf16.msra.mxu0 %v2045_v6 }
 0x5b4   :  { %4222 = vmatprep.subr.bf16.mxu0 %v4808_v5 }
 0x5b6   :  { %4211 = vmatmul.mubr.msk.bf16.vlgmr.msra.gmra.mrb[60].mxu0 %vm2061_vm0, %v4557_v60 }
 0x5b7   :  { %4214 = vmatprep.mubr.msk.bf16.mxu0 %vm4809_vm10, %v4808_v5  ;;  %4223 = vmatpush3.bf16.msra.mxu0 %v4571_v10 }
 0x5b8   :  { %4224 = vmatprep.subr.bf16.mxu0 %v4808_v5 }
 0x5bb   :  { %4225 = vmatpush3.bf16.msra.mxu0 %v4575_v17 }
 0x5be   :  { %4215 = vmatmul.mubr.msk.bf16.gmra.mrb[64].mxu0 %vm2061_vm0, %v4558_v62 }
 0x5bf   :  { %4218 = vmatprep.mubr.msk.bf16.mxu0 %vm4809_vm10, %v4808_v5 }
 0x5c6   :  { %4219 = vmatmul.mubr.msk.bf16.gmra.mrb[68].mxu0 %vm2061_vm0, %v4559_v28 }
 0x5c7   :  { %4226 = vmatprep.mubr.msk.bf16.mxu0 %vm4809_vm10, %v4808_v5 }
 0x689   :  { %v2105_v40 = vpop.f32.mrb[60].mxu0 }
 0x68a   :  { %v2134_v0 = vrot.slane %v2105_v40, 7  ;;  %v4212_v41 = vpop.f32.mrb[61].mxu0  ;;  %v2152_v16 = vrot.slane %v2105_v40, 1 }
 0x68b   :  { %v2108_v42 = vpop.f32.mrb[62].mxu0 }
 0x68c   :  { %v6076_v8 = vsel %vm6782_vm8, 0.0, %v2134_v0  ;;  %v4475_v35 = vpack.i.bf16 %v2108_v42, %v2105_v40  ;;  %v2135_v37 = vrot.slane %v2108_v42, 7  ;;  %v2153_v47 = vrot.slane %v2108_v42, 1  ;;  %v4213_v36 = vpop.f32.mrb[63].mxu0 }
 0x68d   :  { %v2194_v32 = vsel %vm6064_vm1, 0.0, %v6076_v8  ;;  %vm6128_vm8 = vcmp.eq.s32.totalorder %v2174_v43, 0  ;;  %vm6810_vm1 = vcmask 523264  }
 0x68e   :  { %v6088_v38 = vsel %vm6783_vm9, %v2134_v0, %v2135_v37  ;;  %4476 = vrot.lane.b32.xlu0 %v4475_v35, %s4810_s25  ;;  %v2154_v50 = vsel %vm6784_vm13, %v2152_v16, %v2153_v47  ;;  %vm6132_vm9 = vcmp.eq.s32.totalorder %v2173_v54, 3  ;;  %vm6136_vm13 = vcmp.eq.s32.totalorder %v2174_v43, 3 }
 0x68f   :  { %v2195_v46 = vsel %vm6068_vm5, 0.0, %v6088_v38  ;;  %v2218_v15 = vsel %vm6102_vm11, 0.0, %v2154_v50  ;;  %vm6144_vm11 = vcmp.eq.s32.totalorder %v2175_v31, 0  ;;  %vm6812_vm5 = vcmask 261120  }
 0x691   :  { %v2113_v58 = vpop.f32.mrb[64].mxu0 }
 0x692   :  { %v2137_v11 = vrot.slane %v2113_v58, 7  ;;  %v2155_v7 = vrot.slane %v2113_v58, 1  ;;  %v4216_v59 = vpop.f32.mrb[65].mxu0 }
 0x693   :  { %v2116_v19 = vpop.f32.mrb[66].mxu0 }
 0x694   :  { %v2138_v34 = vsel %vm6791_vm4, %v2135_v37, %v2137_v11  ;;  %v4485_v61 = vpack.i.bf16 %v2116_v19, %v2113_v58  ;;  %v2139_v3 = vrot.slane %v2116_v19, 7  ;;  %v2157_v33 = vrot.slane %v2116_v19, 1  ;;  %v4217_v2 = vpop.f32.mrb[67].mxu0 }
 0x695   :  { %v2156_v13 = vsel %vm6792_vm3, %v2153_v47, %v2155_v7  ;;  %v2196_v6 = vsel %vm6098_vm14, 0.0, %v2138_v34  ;;  %vm6140_vm14 = vcmp.eq.s32.totalorder %v2175_v31, 3 }
 0x696   :  { %v2140_v25 = vsel %vm6793_vm15, %v2137_v11, %v2139_v3  ;;  %4486 = vrot.lane.b32.xlu0 %v4485_v61, %s4810_s25  ;;  %v2219_v60 = vsel %vm2201_vm12, 0.0, %v2156_v13  ;;  %v2158_v62 = vsel %vm6794_vm6, %v2155_v7, %v2157_v33  ;;  %vm6807_vm12 = vmmov %vm6791_vm4 }
 0x697   :  { %v4480_v28 = vpack.i.bf16 %v2219_v60, %v2218_v15  ;;  %v2197_v9 = vsel %vm6106_vm7, 0.0, %v2140_v25  ;;  %vm6808_vm7 = vmmov %vm6792_vm3  ;;  %v2220_v24 = vsel %vm6124_vm2, 0.0, %v2158_v62  ;;  %v4579_v25 = vld [vmem:[%s6651_s11 + $0x8] sm:$0xff]  }
 0x698   :  { %vm6809_vm15 = vmmov %vm6792_vm3 }
 0x699   :  { %4481 = vrot.lane.b32.xlu1 %v4480_v28, %s4811_s9  ;;  %v2121_v23 = vpop.f32.mrb[68].mxu0  ;;  %vm6811_vm6 = vmmov %vm6810_vm1 }
 0x69a   :  { %v2141_v56 = vrot.slane %v2121_v23, 7  ;;  %v2159_v14 = vrot.slane %v2121_v23, 1  ;;  %v4220_v55 = vpop.f32.mrb[69].mxu0  ;;  %vm6813_vm2 = vmmov %vm6810_vm1 }
 0x69b   :  { %v2124_v49 = vpop.f32.mrb[70].mxu0 }
 0x69c   :  { %v2142_v10 = vsel %vm6807_vm12, %v2139_v3, %v2141_v56  ;;  %v4495_v52 = vpack.i.bf16 %v2124_v49, %v2121_v23  ;;  %v2143_v22 = vrot.slane %v2124_v49, 7  ;;  %v2161_v29 = vrot.slane %v2124_v49, 1  ;;  %v4221_v63 = vpop.f32.mrb[71].mxu0  ;;  %vm6821_vm12 = vmmov %vm6810_vm1 }
 0x69d   :  { %v2160_v40 = vsel %vm6808_vm7, %v2157_v33, %v2159_v14  ;;  %v2198_v0 = vsel %vm6128_vm8, 0.0, %v2142_v10  ;;  %vm6814_vm8 = vmmov %vm6810_vm1  ;;  %v4583_v10 = vld [vmem:[%s6651_s11 + $0x28] sm:$0xff]  }
 0x69e   :  { %v2144_v41 = vsel %vm6791_vm4, %v2141_v56, %v2143_v22  ;;  %v2169_v16 = vsel %vm6792_vm3, %v2161_v29, 0.0  ;;  %4496 = vrot.lane.b32.xlu0 %v4495_v52, %s4810_s25  ;;  %v2221_v42 = vsel %vm6132_vm9, 0.0, %v2160_v40  ;;  %v2162_v17 = vsel %vm6809_vm15, %v2159_v14, %v2161_v29  ;;  %v4580_v14 = vld [vmem:[%s6651_s11 + $0x10] sm:$0xff]   ;;  %vm6816_vm9 = vmmov %vm6810_vm1  ;;  %v4585_v22 = vld [vmem:[%s6651_s11 + $0x38] sm:$0xff]  }
 0x69f   :  { %v4490_v35 = vpack.i.bf16 %v2221_v42, %v2220_v24  ;;  %v2222_v37 = vsel %vm6136_vm13, 0.0, %v2162_v17  ;;  %v2223_v47 = vsel %vm6140_vm14, 0.0, %v2169_v16  ;;  %v2199_v36 = vsel %vm6144_vm11, 0.0, %v2144_v41  ;;  %vm6817_vm13 = vmmov %vm6810_vm1  ;;  %v4584_v52 = vld [vmem:[%s6651_s11 + $0x30] sm:$0xff]  }
 0x6a0   :  { %v4500_v51 = vpack.i.bf16 %v2223_v47, %v2222_v37  ;;  %vm6819_vm11 = vcmask 392192   ;;  %vm6822_vm7 = vmmov %vm6810_vm1 }
 0x6a1   :  { %4491 = vrot.lane.b32.xlu1 %v4490_v35, %s4811_s9  ;;  %vm6823_vm4 = vmmov %vm6810_vm1 }
 0x6a2   :  { %vm6824_vm3 = vmmov %vm6810_vm1 }
 0x6a3   :  { %vm6825_vm15 = vmmov %vm6810_vm1 }
 0x6a5   :  { %4501 = vrot.lane.b32.xlu1 %v4500_v51, %s4811_s9 }
 0x700   :  { %v4477_v30 = vpop.permute.xlu0 %4476 }
 0x701   :  { %v4479_v50 = vunpack.i.h.bf16 %v4477_v30  ;;  %v4478_v45 = vunpack.i.l.bf16 %v4477_v30 }
 0x703   :  { %v2266_v54 = vsel %vm2061_vm0, %v2194_v32, %v4478_v45  ;;  %v2267_v58 = vsel %vm2061_vm0, %v2195_v46, %v4479_v50  ;;  %v4578_v46 = vld [vmem:[%s6651_s11] sm:$0xff]  }
 0x704   :  { %v2314_v11 = vpack.c.bf16 %v2267_v58, %v2266_v54 }
 0x708   :  { %v4487_v7 = vpop.permute.xlu0 %4486 }
 0x709   :  { %v4489_v59 = vunpack.i.h.bf16 %v4487_v7  ;;  %v4488_v48 = vunpack.i.l.bf16 %v4487_v7 }
 0x70b   :  { %v4482_v19 = vpop.permute.xlu1 %4481  ;;  %v2268_v4 = vsel %vm2061_vm0, %v2196_v6, %v4488_v48  ;;  %v2269_v18 = vsel %vm2061_vm0, %v2197_v9, %v4489_v59 }
 0x70c   :  { %v4484_v53 = vunpack.i.h.bf16 %v4482_v19  ;;  %v4483_v34 = vunpack.i.l.bf16 %v4482_v19  ;;  %v2317_v8 = vpack.c.bf16 %v2269_v18, %v2268_v4 }
 0x70e   :  { %v2316_v61 = vpack.c.bf16 %v4484_v53, %v4483_v34  ;;  %v2272_v32 = vsel %vm6810_vm1, %v4478_v45, %v4483_v34  ;;  %v2273_v21 = vsel %vm6811_vm6, %v4479_v50, %v4484_v53 }
 0x70f   :  { %v2315_v38 = vpack.c.bf16 %v2273_v21, %v2272_v32 }
 0x710   :  { %4227 = vmatmul.mubr.msk.bf16.vlgmr.msra.gmra.mrb[72].mxu0 %vm6812_vm5, %v2316_v61  ;;  %v4497_v3 = vpop.permute.xlu0 %4496 }
 0x711   :  { %2479 = vmatprep.mubr.bf16.mxu1 %v2315_v38  ;;  %v4499_v33 = vunpack.i.h.bf16 %v4497_v3  ;;  %v4498_v2 = vunpack.i.l.bf16 %v4497_v3  ;;  %4230 = vmatprep.mubr.msk.bf16.mxu0 %vm4809_vm10, %v4808_v5 }
 0x712   :  { %2480 = vmatmul.mubr.bf16.vlgmr.msra.gmra.mrb[48].mxu1 %v2314_v11 }
 0x713   :  { %v4492_v13 = vpop.permute.xlu1 %4491  ;;  %v2270_v43 = vsel %vm2061_vm0, %v2198_v0, %v4498_v2  ;;  %v2271_v6 = vsel %vm2061_vm0, %v2199_v36, %v4499_v33  ;;  %4239 = vmatpush3.bf16.msra.mxu1 %v4578_v46  ;;  %vm6815_vm0 = vmmov %vm6812_vm5  ;;  %v3842_v0 = vld [vmem:[%s6650_s10] ss:$0 sm:$0xff] }
 0x714   :  { %v4494_v15 = vunpack.i.h.bf16 %v4492_v13  ;;  %v4493_v60 = vunpack.i.l.bf16 %v4492_v13  ;;  %v2320_v62 = vpack.c.bf16 %v2271_v6, %v2270_v43  ;;  %4240 = vmatprep.subr.bf16.mxu1 %v4808_v5  ;;  %vm6818_vm14 = vmmov %vm6815_vm0 }
 0x716   :  { %v2319_v28 = vpack.c.bf16 %v4494_v15, %v4493_v60  ;;  %v2274_v31 = vsel %vm6813_vm2, %v4488_v48, %v4493_v60  ;;  %v2275_v9 = vsel %vm6814_vm8, %v4489_v59, %v4494_v15  ;;  %vm6826_vm2 = vmmov %vm6810_vm1  ;;  %vm3718_vm8 = vcmask 33792  }
 0x717   :  { %v4502_v23 = vpop.permute.xlu1 %4501  ;;  %v2318_v56 = vpack.c.bf16 %v2275_v9, %v2274_v31  ;;  %4241 = vmatpush3.bf16.msra.mxu1 %v4579_v25 }
 0x718   :  { %v4504_v55 = vunpack.i.h.bf16 %v4502_v23  ;;  %v4503_v39 = vunpack.i.l.bf16 %v4502_v23  ;;  %4231 = vmatmul.mubr.msk.bf16.gmra.mrb[76].mxu0 %vm6815_vm0, %v2319_v28  ;;  %4242 = vmatprep.subr.bf16.mxu1 %v4808_v5 }
 0x719   :  { %2487 = vmatprep.mubr.bf16.mxu1 %v2318_v56  ;;  %4234 = vmatprep.mubr.msk.bf16.mxu0 %vm4809_vm10, %v4808_v5 }
 0x71a   :  { %2488 = vmatmul.mubr.bf16.gmra.mrb[52].mxu1 %v2317_v8  ;;  %v2276_v57 = vsel %vm6816_vm9, %v4498_v2, %v4503_v39  ;;  %v2277_v49 = vsel %vm6817_vm13, %v4499_v33, %v4504_v55  ;;  %v2322_v27 = vpack.c.bf16 %v4504_v55, %v4503_v39 }
 0x71b   :  { %v2321_v20 = vpack.c.bf16 %v2277_v49, %v2276_v57  ;;  %4243 = vmatpush3.bf16.msra.mxu1 %v4580_v14  ;;  %v4586_v57 = vld [vmem:[%s6652_s12] sm:$0xff]  }
 0x71c   :  { %4244 = vmatprep.subr.bf16.mxu1 %v4808_v5 }
 0x71d   :  { %2495 = vmatprep.mubr.bf16.mxu1 %v2321_v20 }
 0x71f   :  { %4245 = vmatpush3.bf16.msra.mxu1 %v4581_v1 }
 0x720   :  { %4235 = vmatmul.mubr.msk.bf16.gmra.mrb[80].mxu0 %vm6818_vm14, %v2322_v27  ;;  %4246 = vmatprep.subr.bf16.mxu1 %v4808_v5 }
 0x721   :  { %4272 = vmatprep.mubr.msk.bf16.mxu0 %vm6819_vm11, %v4586_v57  ;;  %v4662_v57 = vld [vmem:[%s6653_s13 + $0xb4] ss:$8 sps:$4 sm:$0xff]  }
 0x722   :  { %2496 = vmatmul.mubr.bf16.gmra.mrb[56].mxu1 %v2320_v62 }
 0x723   :  { %4254 = vmatprep.mubr.msk.bf16.mxu1 %vm4809_vm10, %v4808_v5  ;;  %4247 = vmatpush3.bf16.msra.mxu1 %v4582_v26 }
 0x724   :  { %4248 = vmatprep.subr.bf16.mxu1 %v4808_v5 }
 0x727   :  { %4249 = vmatpush3.bf16.msra.mxu1 %v4583_v10 }
 0x728   :  { %4250 = vmatprep.subr.bf16.mxu1 %v4808_v5 }
 0x72b   :  { %4251 = vmatpush3.bf16.msra.mxu1 %v4584_v52 }
 0x72c   :  { %4252 = vmatprep.subr.bf16.mxu1 %v4808_v5 }
 0x72f   :  { %4253 = vmatpush3.bf16.msra.mxu1 %v4585_v22 }
 0x7e3   :  { %v2538_v29 = vpop.f32.mrb[72].mxu0 }
 0x7e4   :  { %v4228_v63 = vpop.f32.mrb[73].mxu0 }
 0x7e5   :  { %v4061_v40 = vpop.f32.mrb[48].mxu1  ;;  %v2541_v24 = vpop.f32.mrb[74].mxu0 }
 0x7e6   :  { %v4062_v41 = vpop.f32.mrb[49].mxu1  ;;  %v4229_v16 = vpop.f32.mrb[75].mxu0 }
 0x7e7   :  { %v4063_v42 = vadd.f32 %v4062_v41, %v4061_v40  ;;  %v4064_v17 = vpop.f32.mrb[50].mxu1  ;;  %v4587_v16 = vld [vmem:[%s6652_s12 + $0x8] ss:$0 sps:$4 sm:$0xff]  }
 0x7e8   :  { %v4065_v35 = vpop.f32.mrb[51].mxu1 }
 0x7e9   :  { %v2482_v37 = vadd.f32 %v4063_v42, %v3842_v0  ;;  %v4066_v47 = vadd.f32 %v4065_v35, %v4064_v17  ;;  %v4588_v42 = vld [vmem:[%s6653_s13 + $0x100] ss:$8 sps:$4 sm:$0xff]   ;;  %v4590_v17 = vld [vmem:[%s6653_s13 + $0x104] ss:$8 sps:$4 sm:$0xff]   ;;  %v4593_v35 = vld [vmem:[%s6653_s13 + $0x114] ss:$8 sps:$4 sm:$0xff]  }
 0x7ea   :  { %3468 = vmatprep.subr.bf16.mxu1 %v4590_v17  ;;  %v4686_v17 = vld [vmem:[%s6653_s13 + $0xf4] ss:$8 sps:$4 sm:$0xff]  }
 0x7eb   :  { %v2539_v36 = vadd.f32 %v2538_v29, %v2482_v37  ;;  %v2485_v51 = vadd.f32 %v4066_v47, %v3842_v0  ;;  %v2546_v30 = vpop.f32.mrb[76].mxu0  ;;  %v4594_v37 = vld [vmem:[%s6653_s13] ss:$8 sps:$4 sm:$0xff]   ;;  %v4596_v47 = vld [vmem:[%s6653_s13 + $0x4] ss:$8 sps:$4 sm:$0xff]  }
 0x7ec   :  { %v4232_v50 = vpop.f32.mrb[77].mxu0 }
 0x7ed   :  { %v2542_v45 = vadd.f32 %v2541_v24, %v2485_v51  ;;  %v4067_v54 = vpop.f32.mrb[52].mxu1  ;;  %v2549_v58 = vpop.f32.mrb[78].mxu0  ;;  %v2561_v59 = vmax.f32 %v2539_v36, 0.0  ;;  %v4591_v36 = vld [vmem:[%s6653_s13 + $0x110] ss:$8 sps:$4 sm:$0xff]  }
 0x7ee   :  { %v4068_v11 = vpop.f32.mrb[53].mxu1  ;;  %v4233_v7 = vpop.f32.mrb[79].mxu0  ;;  %v4602_v51 = vld [vmem:[%s6653_s13 + $0x14] ss:$8 sps:$4 sm:$0xff]   ;;  %v4600_v50 = vld [vmem:[%s6653_s13 + $0x10] ss:$8 sps:$4 sm:$0xff]  }
 0x7ef   :  { %v2562_v48 = vmax.f32 %v2542_v45, 0.0  ;;  %v4069_v19 = vadd.f32 %v4068_v11, %v4067_v54  ;;  %v4070_v4 = vpop.f32.mrb[54].mxu1  ;;  %v4608_v45 = vld [vmem:[%s6653_s13 + $0x24] ss:$8 sps:$4 sm:$0xff]   ;;  %v4597_v54 = vld [vmem:[%s6653_s13 + $0x120] ss:$8 sps:$4 sm:$0xff]  }
 0x7f0   :  { %v4071_v18 = vpop.f32.mrb[55].mxu1  ;;  %v4606_v11 = vld [vmem:[%s6653_s13 + $0x20] ss:$8 sps:$4 sm:$0xff]   ;;  %v4614_v7 = vld [vmem:[%s6653_s13 + $0x34] ss:$8 sps:$4 sm:$0xff]  }
 0x7f1   :  { %v2586_v53 = vpack.c.bf16 %v2562_v48, %v2561_v59  ;;  %v2490_v34 = vadd.f32 %v4069_v19, %v3842_v0  ;;  %v4072_v8 = vadd.f32 %v4071_v18, %v4070_v4  ;;  %v4603_v59 = vld [vmem:[%s6653_s13 + $0x130] ss:$8 sps:$4 sm:$0xff]   ;;  %v4611_v48 = vld [vmem:[%s6653_s13 + $0x144] ss:$8 sps:$4 sm:$0xff]   ;;  %v4609_v18 = vld [vmem:[%s6653_s13 + $0x140] ss:$8 sps:$4 sm:$0xff]  }
 0x7f2   :  { %v4612_v19 = vld [vmem:[%s6653_s13 + $0x30] ss:$8 sps:$4 sm:$0xff]   ;;  %v4620_v4 = vld [vmem:[%s6653_s13 + $0x44] ss:$8 sps:$4 sm:$0xff]  }
 0x7f3   :  { %v2547_v61 = vadd.f32 %v2546_v30, %v2490_v34  ;;  %v2493_v32 = vadd.f32 %v4072_v8, %v3842_v0  ;;  %v2554_v21 = vpop.f32.mrb[80].mxu0  ;;  %4255 = vmatmul.mubr.bf16.vlgmr.msra.gmra.mrb[60].mxu1 %v2586_v53  ;;  %v4599_v30 = vld [vmem:[%s6653_s13 + $0x124] ss:$8 sps:$4 sm:$0xff]   ;;  %v4617_v53 = vld [vmem:[%s6653_s13 + $0x154] ss:$8 sps:$4 sm:$0xff]  }
 0x7f4   :  { %v4236_v38 = vpop.f32.mrb[81].mxu0  ;;  %4258 = vmatprep.mubr.msk.bf16.mxu1 %vm4809_vm10, %v4808_v5  ;;  %3469 = vmatpush1.bf16.msra.mxu1 %v4588_v42  ;;  %v4618_v34 = vld [vmem:[%s6653_s13 + $0x40] ss:$8 sps:$4 sm:$0xff]   ;;  %v4626_v8 = vld [vmem:[%s6653_s13 + $0x54] ss:$8 sps:$4 sm:$0xff]  }
 0x7f5   :  { %v2550_v46 = vadd.f32 %v2549_v58, %v2493_v32  ;;  %v4073_v3 = vpop.f32.mrb[56].mxu1  ;;  %v2557_v33 = vpop.f32.mrb[82].mxu0  ;;  %v2563_v43 = vmax.f32 %v2547_v61, 0.0  ;;  %3470 = vmatprep.subr.bf16.mxu1 %v4593_v35  ;;  %v4605_v58 = vld [vmem:[%s6653_s13 + $0x134] ss:$8 sps:$4 sm:$0xff]  }
 0x7f6   :  { %v4074_v2 = vpop.f32.mrb[57].mxu1  ;;  %v4237_v13 = vpop.f32.mrb[83].mxu0  ;;  %v4615_v61 = vld [vmem:[%s6653_s13 + $0x150] ss:$8 sps:$4 sm:$0xff]   ;;  %v4623_v32 = vld [vmem:[%s6653_s13 + $0x164] ss:$8 sps:$4 sm:$0xff]  }
 0x7f7   :  { %v2564_v6 = vmax.f32 %v2550_v46, 0.0  ;;  %v4075_v25 = vadd.f32 %v4074_v2, %v4073_v3  ;;  %v4076_v15 = vpop.f32.mrb[58].mxu1  ;;  %v4632_v38 = vld [vmem:[%s6653_s13 + $0x64] ss:$8 sps:$4 sm:$0xff]   ;;  %v4621_v46 = vld [vmem:[%s6653_s13 + $0x160] ss:$8 sps:$4 sm:$0xff]  }
 0x7f8   :  { %v4077_v60 = vpop.f32.mrb[59].mxu1  ;;  %3471 = vmatpush1.bf16.msra.mxu1 %v4591_v36  ;;  %v4629_v3 = vld [vmem:[%s6653_s13 + $0x174] ss:$8 sps:$4 sm:$0xff]   ;;  %v4627_v13 = vld [vmem:[%s6653_s13 + $0x170] ss:$8 sps:$4 sm:$0xff]  }
 0x7f9   :  { %v2498_v62 = vadd.f32 %v4075_v25, %v3842_v0  ;;  %v4078_v28 = vadd.f32 %v4077_v60, %v4076_v15  ;;  %v2587_v31 = vpack.c.bf16 %v2564_v6, %v2563_v43  ;;  %3472 = vmatprep.subr.bf16.mxu1 %v4599_v30  ;;  %v4638_v2 = vld [vmem:[%s6653_s13 + $0x74] ss:$8 sps:$4 sm:$0xff]   ;;  %v4635_v43 = vld [vmem:[%s6653_s13 + $0x184] ss:$8 sps:$4 sm:$0xff]   ;;  %v4636_v6 = vld [vmem:[%s6653_s13 + $0x70] ss:$8 sps:$4 sm:$0xff]  }
 0x7fa   :  { %v4644_v25 = vld [vmem:[%s6653_s13 + $0x84] ss:$8 sps:$4 sm:$0xff]   ;;  %v4633_v15 = vld [vmem:[%s6653_s13 + $0x180] ss:$8 sps:$4 sm:$0xff]   ;;  %v4641_v60 = vld [vmem:[%s6653_s13 + $0x194] ss:$8 sps:$4 sm:$0xff]  }
 0x7fb   :  { %v2555_v9 = vadd.f32 %v2554_v21, %v2498_v62  ;;  %v2501_v23 = vadd.f32 %v4078_v28, %v3842_v0  ;;  %4259 = vmatmul.mubr.bf16.gmra.mrb[64].mxu1 %v2587_v31  ;;  %v4624_v21 = vld [vmem:[%s6653_s13 + $0x50] ss:$8 sps:$4 sm:$0xff]   ;;  %v4642_v62 = vld [vmem:[%s6653_s13 + $0x80] ss:$8 sps:$4 sm:$0xff]   ;;  %v4650_v28 = vld [vmem:[%s6653_s13 + $0x94] ss:$8 sps:$4 sm:$0xff]  }
 0x7fc   :  { %4262 = vmatprep.mubr.msk.bf16.mxu1 %vm4809_vm10, %v4808_v5  ;;  %vm6820_vm10 = vmmov %vm6819_vm11  ;;  %3473 = vmatpush1.bf16.msra.mxu1 %v4597_v54  ;;  %v4639_v31 = vld [vmem:[%s6653_s13 + $0x190] ss:$8 sps:$4 sm:$0xff]   ;;  %v4683_v42 = vld [vmem:[%s6653_s13 + $0x204] ss:$8 sps:$4 sm:$0xff]  }
 0x7fd   :  { %v2558_v56 = vadd.f32 %v2557_v33, %v2501_v23  ;;  %v2565_v14 = vmax.f32 %v2555_v9, 0.0  ;;  %3474 = vmatprep.subr.bf16.mxu1 %v4605_v58  ;;  %v4630_v33 = vld [vmem:[%s6653_s13 + $0x60] ss:$8 sps:$4 sm:$0xff]   ;;  %v4647_v9 = vld [vmem:[%s6653_s13 + $0x1a4] ss:$8 sps:$4 sm:$0xff]  }
 0x7fe   :  { %v4648_v23 = vld [vmem:[%s6653_s13 + $0x90] ss:$8 sps:$4 sm:$0xff]  }
 0x7ff   :  { %v2566_v55 = vmax.f32 %v2558_v56, 0.0  ;;  %v4656_v56 = vld [vmem:[%s6653_s13 + $0xa4] ss:$8 sps:$4 sm:$0xff]   ;;  %v4684_v35 = vld [vmem:[%s6653_s13 + $0xf0] ss:$8 sps:$4 sm:$0xff]  }
 0x800   :  { %3475 = vmatpush1.bf16.msra.mxu1 %v4603_v59 }
 0x801   :  { %v2588_v39 = vpack.c.bf16 %v2566_v55, %v2565_v14  ;;  %3476 = vmatprep.subr.bf16.mxu1 %v4611_v48  ;;  %v4645_v14 = vld [vmem:[%s6653_s13 + $0x1a0] ss:$8 sps:$4 sm:$0xff]   ;;  %v4653_v55 = vld [vmem:[%s6653_s13 + $0x1b4] ss:$8 sps:$4 sm:$0xff]  }
 0x803   :  { %4263 = vmatmul.mubr.bf16.gmra.mrb[68].mxu1 %v2588_v39  ;;  %v4654_v39 = vld [vmem:[%s6653_s13 + $0xa0] ss:$8 sps:$4 sm:$0xff]  }
 0x804   :  { %3477 = vmatpush1.bf16.msra.mxu1 %v4609_v18 }
 0x805   :  { %3478 = vmatprep.subr.bf16.mxu1 %v4617_v53 }
 0x808   :  { %3479 = vmatpush1.bf16.msra.mxu1 %v4615_v61 }
 0x809   :  { %3480 = vmatprep.subr.bf16.mxu1 %v4623_v32  ;;  %v4681_v32 = vld [vmem:[%s6653_s13 + $0x200] ss:$8 sps:$4 sm:$0xff]  }
 0x80c   :  { %3481 = vmatpush1.bf16.msra.mxu1 %v4621_v46 }
 0x80d   :  { %3482 = vmatprep.subr.bf16.mxu1 %v4629_v3 }
 0x810   :  { %3483 = vmatpush1.bf16.msra.mxu1 %v4627_v13 }
 0x811   :  { %3484 = vmatprep.subr.bf16.mxu1 %v4635_v43 }
 0x814   :  { %3485 = vmatpush1.bf16.msra.mxu1 %v4633_v15 }
 0x815   :  { %3486 = vmatprep.subr.bf16.mxu1 %v4641_v60  ;;  %v4687_v60 = vld [vmem:[%s6653_s13 + $0x210] ss:$8 sps:$4 sm:$0xff]  }
 0x818   :  { %3487 = vmatpush1.bf16.msra.mxu1 %v4639_v31 }
 0x819   :  { %3488 = vmatprep.subr.bf16.mxu1 %v4647_v9 }
 0x81c   :  { %3489 = vmatpush1.bf16.msra.mxu1 %v4645_v14 }
 0x81d   :  { %3490 = vmatprep.subr.bf16.mxu1 %v4653_v55 }
 0x8c6   :  { %v2671_v49 = vpop.f32.mrb[60].mxu1 }
 0x8c7   :  { %v4256_v20 = vpop.f32.mrb[61].mxu1 }
 0x8c8   :  { %v2674_v1 = vpop.f32.mrb[62].mxu1  ;;  %v4659_v20 = vld [vmem:[%s6653_s13 + $0x1c4] ss:$8 sps:$4 sm:$0xff]  }
 0x8c9   :  { %v2694_v27 = vpack.c.bf16 %v2674_v1, %v2671_v49  ;;  %v4257_v26 = vpop.f32.mrb[63].mxu1  ;;  %v4651_v49 = vld [vmem:[%s6653_s13 + $0x1b0] ss:$8 sps:$4 sm:$0xff]  }
 0x8ca   :  { %v4660_v1 = vld [vmem:[%s6653_s13 + $0xb0] ss:$8 sps:$4 sm:$0xff]   ;;  %3491 = vmatpush1.bf16.msra.mxu1 %v4651_v49  ;;  %v4657_v26 = vld [vmem:[%s6653_s13 + $0x1c0] ss:$8 sps:$4 sm:$0xff]  }
 0x8cb   :  { %4266 = vmatprep.subr.bf16.mxu0 %v2694_v27  ;;  %3492 = vmatprep.subr.bf16.mxu1 %v4659_v20  ;;  %v4690_v20 = vld [vmem:[%s6653_s13 + $0x220] ss:$8 sps:$4 sm:$0xff]  }
 0x8cc   :  { %4267 = vmatpush3.bf16.msra.mxu0 %v2694_v27  ;;  %v4668_v27 = vld [vmem:[%s6653_s13 + $0xc4] ss:$8 sps:$4 sm:$0xff]  }
 0x8ce   :  { %v2679_v10 = vpop.f32.mrb[64].mxu1  ;;  %3493 = vmatpush1.bf16.msra.mxu1 %v4657_v26  ;;  %v4698_v26 = vld [vmem:[%s6653_s13 + $0x244] ss:$8 sps:$4 sm:$0xff]  }
 0x8cf   :  { %v4260_v5 = vpop.f32.mrb[65].mxu1 }
 0x8d0   :  { %v2682_v52 = vpop.f32.mrb[66].mxu1  ;;  %v4666_v5 = vld [vmem:[%s6653_s13 + $0xc0] ss:$8 sps:$4 sm:$0xff]  }
 0x8d1   :  { %v2695_v22 = vpack.c.bf16 %v2682_v52, %v2679_v10  ;;  %v4261_v29 = vpop.f32.mrb[67].mxu1  ;;  %v4665_v10 = vld [vmem:[%s6653_s13 + $0x1d4] ss:$8 sps:$4 sm:$0xff]  }
 0x8d2   :  { %v4674_v52 = vld [vmem:[%s6653_s13 + $0xd4] ss:$8 sps:$4 sm:$0xff]   ;;  %3494 = vmatprep.subr.bf16.mxu1 %v4665_v10  ;;  %v4671_v29 = vld [vmem:[%s6653_s13 + $0x1e4] ss:$8 sps:$4 sm:$0xff]   ;;  %v4696_v10 = vld [vmem:[%s6653_s13 + $0x240] ss:$8 sps:$4 sm:$0xff]  }
 0x8d3   :  { %4268 = vmatprep.subr.bf16.mxu0 %v2695_v22 }
 0x8d4   :  { %4269 = vmatpush3.bf16.msra.mxu0 %v2695_v22  ;;  %v4663_v22 = vld [vmem:[%s6653_s13 + $0x1d0] ss:$8 sps:$4 sm:$0xff]  }
 0x8d5   :  { %3495 = vmatpush1.bf16.msra.mxu1 %v4663_v22  ;;  %v4704_v22 = vld [vmem:[%s6653_s13 + $0x264] ss:$8 sps:$4 sm:$0xff]  }
 0x8d6   :  { %v2687_v63 = vpop.f32.mrb[68].mxu1  ;;  %3496 = vmatprep.subr.bf16.mxu1 %v4671_v29  ;;  %v4702_v29 = vld [vmem:[%s6653_s13 + $0x260] ss:$8 sps:$4 sm:$0xff]  }
 0x8d7   :  { %v4264_v40 = vpop.f32.mrb[69].mxu1 }
 0x8d8   :  { %v2690_v24 = vpop.f32.mrb[70].mxu1  ;;  %v4669_v40 = vld [vmem:[%s6653_s13 + $0x1e0] ss:$8 sps:$4 sm:$0xff]  }
 0x8d9   :  { %v2696_v0 = vpack.c.bf16 %v2690_v24, %v2687_v63  ;;  %v4265_v41 = vpop.f32.mrb[71].mxu1  ;;  %v4672_v63 = vld [vmem:[%s6653_s13 + $0xd0] ss:$8 sps:$4 sm:$0xff]   ;;  %v4677_v24 = vld [vmem:[%s6653_s13 + $0x1f4] ss:$8 sps:$4 sm:$0xff]   ;;  %3497 = vmatpush1.bf16.msra.mxu1 %v4669_v40 }
 0x8da   :  { %3498 = vmatprep.subr.bf16.mxu1 %v4677_v24  ;;  %v4680_v41 = vld [vmem:[%s6653_s13 + $0xe4] ss:$8 sps:$4 sm:$0xff]   ;;  %v4705_v40 = vld [vmem:[%s6653_s13 + $0x270] ss:$8 sps:$4 sm:$0xff]  }
 0x8db   :  { %4270 = vmatprep.subr.bf16.mxu0 %v2696_v0  ;;  %v4710_v24 = vld [vmem:[%s6653_s13 + $0x284] ss:$8 sps:$4 sm:$0xff]  }
 0x8dc   :  { %4271 = vmatpush3.bf16.msra.mxu0 %v2696_v0  ;;  %v4675_v0 = vld [vmem:[%s6653_s13 + $0x1f0] ss:$8 sps:$4 sm:$0xff]  }
 0x8dd   :  { %3427 = vmatprep.subr.bf16.mxu0 %v4596_v47  ;;  %3499 = vmatpush1.bf16.msra.mxu1 %v4675_v0  ;;  %v4708_v0 = vld [vmem:[%s6653_s13 + $0x280] ss:$8 sps:$4 sm:$0xff]  }
 0x8de   :  { %3509 = vmatprep.subr.bf16.mxu1 %v4683_v42  ;;  %v4716_v42 = vld [vmem:[%s6653_s13 + $0x2a4] ss:$8 sps:$4 sm:$0xff]  }
 0x8df   :  { %4273 = vmatmul.mubr.msk.bf16.vlgmr.msra.gmra.mrb[84].mxu0 %vm6820_vm10, %v4587_v16  ;;  %v4678_v16 = vld [vmem:[%s6653_s13 + $0xe0] ss:$8 sps:$4 sm:$0xff]  }
 0x8e0   :  { %3428 = vmatpush1.bf16.msra.mxu0 %v4594_v37 }
 0x8e1   :  { %3429 = vmatprep.subr.bf16.mxu0 %v4602_v51 }
 0x8e4   :  { %3430 = vmatpush1.bf16.msra.mxu0 %v4600_v50 }
 0x8e5   :  { %3431 = vmatprep.subr.bf16.mxu0 %v4608_v45 }
 0x8e8   :  { %3432 = vmatpush1.bf16.msra.mxu0 %v4606_v11 }
 0x8e9   :  { %3433 = vmatprep.subr.bf16.mxu0 %v4614_v7  ;;  %v4812_v7 = vmov 1983009808  }
 0x8ea   :  { %v2807_v59 = vunpack.c.l.s4 %v4812_v7  ;;  %v4732_v7 = vld [vmem:[%s6655_s15] sm:$0xff]  }
 0x8ec   :  { %3434 = vmatpush1.bf16.msra.mxu0 %v4612_v19 }
 0x8ed   :  { %3435 = vmatprep.subr.bf16.mxu0 %v4620_v4  ;;  %v2808_v4 = vunpack.c.0.s8 %v2807_v59  ;;  %v4733_v59 = vld [vmem:[%s6655_s15 + $0x8] sm:$0xff]  }
 0x8ef   :  { %v2811_v46 = vsub.s32 %v2808_v4, %v4953_v12  ;;  %v4736_v4 = vld [vmem:[%s6655_s15 + $0x20] sm:$0xff]  }
 0x8f0   :  { %3436 = vmatpush1.bf16.msra.mxu0 %v4618_v34 }
 0x8f1   :  { %3437 = vmatprep.subr.bf16.mxu0 %v4626_v8 }
 0x8f4   :  { %3438 = vmatpush1.bf16.msra.mxu0 %v4624_v21 }
 0x8f5   :  { %3439 = vmatprep.subr.bf16.mxu0 %v4632_v38  ;;  %v4689_v38 = vld [vmem:[%s6653_s13 + $0x214] ss:$8 sps:$4 sm:$0xff]  }
 0x8f8   :  { %3440 = vmatpush1.bf16.msra.mxu0 %v4630_v33 }
 0x8f9   :  { %3441 = vmatprep.subr.bf16.mxu0 %v4638_v2 }
 0x8fc   :  { %3442 = vmatpush1.bf16.msra.mxu0 %v4636_v6 }
 0x8fd   :  { %3443 = vmatprep.subr.bf16.mxu0 %v4644_v25 }
 0x900   :  { %3444 = vmatpush1.bf16.msra.mxu0 %v4642_v62 }
 0x901   :  { %3445 = vmatprep.subr.bf16.mxu0 %v4650_v28  ;;  %v4692_v28 = vld [vmem:[%s6653_s13 + $0x224] ss:$8 sps:$4 sm:$0xff]  }
 0x904   :  { %3446 = vmatpush1.bf16.msra.mxu0 %v4648_v23 }
 0x905   :  { %3447 = vmatprep.subr.bf16.mxu0 %v4656_v56 }
 0x908   :  { %3448 = vmatpush1.bf16.msra.mxu0 %v4654_v39 }
 0x909   :  { %3449 = vmatprep.subr.bf16.mxu0 %v4662_v57 }
 0x90c   :  { %3450 = vmatpush1.bf16.msra.mxu0 %v4660_v1  ;;  %v4695_v1 = vld [vmem:[%s6653_s13 + $0x234] ss:$8 sps:$4 sm:$0xff]  }
 0x90d   :  { %3451 = vmatprep.subr.bf16.mxu0 %v4668_v27  ;;  %v4693_v27 = vld [vmem:[%s6653_s13 + $0x230] ss:$8 sps:$4 sm:$0xff]  }
 0x910   :  { %3452 = vmatpush1.bf16.msra.mxu0 %v4666_v5  ;;  %v4701_v5 = vld [vmem:[%s6653_s13 + $0x254] ss:$8 sps:$4 sm:$0xff]  }
 0x911   :  { %3453 = vmatprep.subr.bf16.mxu0 %v4674_v52  ;;  %v4699_v52 = vld [vmem:[%s6653_s13 + $0x250] ss:$8 sps:$4 sm:$0xff]  }
 0x914   :  { %3454 = vmatpush1.bf16.msra.mxu0 %v4672_v63  ;;  %v4707_v63 = vld [vmem:[%s6653_s13 + $0x274] ss:$8 sps:$4 sm:$0xff]  }
 0x915   :  { %3455 = vmatprep.subr.bf16.mxu0 %v4680_v41  ;;  %v4713_v41 = vld [vmem:[%s6653_s13 + $0x294] ss:$8 sps:$4 sm:$0xff]  }
 0x918   :  { %3456 = vmatpush1.bf16.msra.mxu0 %v4678_v16  ;;  %v4711_v16 = vld [vmem:[%s6653_s13 + $0x290] ss:$8 sps:$4 sm:$0xff]  }
 0x919   :  { %3457 = vmatprep.subr.bf16.mxu0 %v4686_v17  ;;  %v4714_v17 = vld [vmem:[%s6653_s13 + $0x2a0] ss:$8 sps:$4 sm:$0xff]  }
 0x91c   :  { %3458 = vmatpush1.bf16.msra.mxu0 %v4684_v35  ;;  %v4719_v35 = vld [vmem:[%s6653_s13 + $0x2b4] ss:$8 sps:$4 sm:$0xff]  }
 0x91d   :  { %3678 = vmatprep.subr.bf16.mxu0 %v4806_v44 }
 0x9b2   :  { %v4274_v37 = vpop.f32.mrb[84].mxu0 }
 0x9b3   :  { %v2745_v47 = vpop.f32.mrb[85].mxu0  ;;  %v2788_v58 = vrot.slane %v4274_v37, 6  ;;  %v2782_v11 = vrot.slane %v4274_v37, 2  ;;  %v2786_v62 = vrot.slane %v4274_v37, 4 }
 0x9b4   :  { %v4275_v36 = vpop.f32.mrb[86].mxu0  ;;  %v2766_v45 = vrot.slane %v2745_v47, 6  ;;  %v2760_v54 = vrot.slane %v2745_v47, 2  ;;  %v2764_v21 = vrot.slane %v2745_v47, 4 }
 0x9b5   :  { %v2748_v51 = vpop.f32.mrb[87].mxu0  ;;  %v4720_v36 = vld [vmem:[%s6653_s13 + $0x2c0] ss:$8 sps:$4 sm:$0xff]  }
 0x9b6   :  { %v2777_v30 = vrot.slane %v2748_v51, 6  ;;  %v2771_v50 = vrot.slane %v2748_v51, 2  ;;  %v2775_v48 = vrot.slane %v2748_v51, 4 }
 0x9b8   :  { %2778 = vrot.lane.b32.xlu0 %v2777_v30, %s4811_s9  ;;  %2772 = vrot.lane.b32.xlu1 %v2771_v50, %s4811_s9  ;;  %v4723_v30 = vld [vmem:[%s6653_s13 + $0x2d0] ss:$8 sps:$4 sm:$0xff]   ;;  %v4728_v50 = vld [vmem:[%s6653_s13 + $0x2e4] ss:$8 sps:$4 sm:$0xff]  }
 0x9bc   :  { %2767 = vrot.lane.b32.xlu0 %v2766_v45, %s4811_s9  ;;  %2761 = vrot.lane.b32.xlu1 %v2760_v54, %s4811_s9  ;;  %v4726_v45 = vld [vmem:[%s6653_s13 + $0x2e0] ss:$8 sps:$4 sm:$0xff]   ;;  %v4731_v54 = vld [vmem:[%s6653_s13 + $0x2f4] ss:$8 sps:$4 sm:$0xff]  }
 0x9c0   :  { %2789 = vrot.lane.b32.xlu0 %v2788_v58, %s4811_s9  ;;  %2783 = vrot.lane.b32.xlu1 %v2782_v11, %s4811_s9  ;;  %v4729_v58 = vld [vmem:[%s6653_s13 + $0x2f0] ss:$8 sps:$4 sm:$0xff]  }
 0xa2a   :  { %v2779_v19 = vpop.permute.xlu0 %2778  ;;  %v2773_v18 = vpop.permute.xlu1 %2772 }
 0xa2b   :  { %v2795_v53 = vsel %vm6821_vm12, %v2775_v48, %v2779_v19  ;;  %v2794_v34 = vsel %vm6822_vm7, %v2748_v51, %v2773_v18  ;;  %v4725_v51 = vld [vmem:[%s6653_s13 + $0x2d4] ss:$8 sps:$4 sm:$0xff]   ;;  %v4737_v18 = vld [vmem:[%s6655_s15 + $0x28] sm:$0xff]  }
 0xa2c   :  { %v2932_v8 = vpack.c.bf16 %v2795_v53, %v2795_v53  ;;  %v2931_v61 = vpack.c.bf16 %v2794_v34, %v2794_v34  ;;  %v2805_v3 = vcombine.low %v2794_v34, %v2795_v53  ;;  %v4734_v48 = vld [vmem:[%s6655_s15 + $0x10] sm:$0xff]   ;;  %v4735_v19 = vld [vmem:[%s6655_s15 + $0x18] sm:$0xff]  }
 0xa2d   :  { %v4738_v53 = vld [vmem:[%s6655_s15 + $0x30] sm:$0xff]   ;;  %v4739_v34 = vld [vmem:[%s6655_s15 + $0x38] sm:$0xff]  }
 0xa2e   :  { %v2768_v33 = vpop.permute.xlu0 %2767  ;;  %3500 = vmatprep.mubr.bf16.mxu1 %v2932_v8  ;;  %v2762_v2 = vpop.permute.xlu1 %2761  ;;  %v2819_v31 = vrot.slane %v2805_v3, %v2811_v46  ;;  %v4740_v8 = vld [vmem:[%s6655_s15 + $0x40] sm:$0xff]  }
 0xa2f   :  { %v2793_v13 = vsel %vm6823_vm4, %v2764_v21, %v2768_v33  ;;  %v2792_v43 = vsel %vm6824_vm3, %v2745_v47, %v2762_v2  ;;  %3501 = vmatmul.mubr.bf16.vlgmr.msra.gmra.mrb[72].mxu1 %v2931_v61  ;;  %v4722_v47 = vld [vmem:[%s6653_s13 + $0x2c4] ss:$8 sps:$4 sm:$0xff]   ;;  %v4743_v21 = vld [vmem:[%s6655_s15 + $0x58] sm:$0xff]   ;;  %v2939_v2 = vsub.s32 0, %v4953_v12 }
 0xa30   :  { %v2930_v6 = vpack.c.bf16 %v2793_v13, %v2793_v13  ;;  %v2804_v25 = vcombine.low %v2792_v43, %v2793_v13  ;;  %v2929_v15 = vpack.c.bf16 %v2792_v43, %v2792_v43  ;;  %3510 = vmatpush1.bf16.msra.mxu1 %v4681_v32  ;;  %v4741_v61 = vld [vmem:[%s6655_s15 + $0x48] sm:$0xff]   ;;  %v4742_v32 = vld [vmem:[%s6655_s15 + $0x50] sm:$0xff]   ;;  %v2935_v13 = vld [vmem:[%s6654_s14] sm:$0x3]  ;;  %v2943_v43 = vsub.s32 1, %v4953_v12 }
 0xa31   :  { %3511 = vmatprep.subr.bf16.mxu1 %v4689_v38 }
 0xa32   :  { %v2812_v9 = vrot.slane %v2804_v25, %v2811_v46  ;;  %3459 = vmatprep.mubr.bf16.mxu0 %v2930_v6  ;;  %v2790_v23 = vpop.permute.xlu0 %2789  ;;  %v2784_v56 = vpop.permute.xlu1 %2783  ;;  %v2940_v6 = vrot.slane %v2935_v13, %v2939_v2  ;;  %v2944_v25 = vrot.slane %v2935_v13, %v2943_v43 }
 0xa33   :  { %v2797_v14 = vsel %vm6825_vm15, %v2786_v62, %v2790_v23  ;;  %v6464_v55 = vsel %vm6810_vm1, %v4274_v37, %v2784_v56  ;;  %3460 = vmatmul.mubr.bf16.vlgmr.msra.gmra.mrb[88].mxu0 %v2929_v15  ;;  %v4717_v37 = vld [vmem:[%s6653_s13 + $0x2b0] ss:$8 sps:$4 sm:$0xff]  }
 0xa34   :  { %v2820_v39 = vcombine.low %v2812_v9, %v2819_v31  ;;  %v2934_v57 = vpack.c.bf16 %v2797_v14, %v2797_v14  ;;  %v2821_v49 = vcombine.low %v6464_v55, %v2797_v14  ;;  %3512 = vmatpush1.bf16.msra.mxu1 %v4687_v60  ;;  %v2933_v11 = vpack.c.bf16 %v6464_v55, %v6464_v55 }
 0xa35   :  { %3513 = vmatprep.subr.bf16.mxu1 %v4692_v28  ;;  %3679 = vmatpush1.bf16.msra.mxu0 %v4732_v7 }
 0xa36   :  { %2831 = vst [vmem:[%s6659_s19] sm:$0xff] %v2820_v39  ;;  %3876 = vst.sshfl [vmem:[%s6659_s19 + $0x8] sm:$0x33 pattern:$0x76325410] %v2821_v49  ;;  %3541 = vmatprep.mubr.bf16.mxu1 %v2934_v57  ;;  %3680 = vmatprep.subr.bf16.mxu0 %v4806_v44 }
 0xa38   :  { %3514 = vmatpush1.bf16.msra.mxu1 %v4690_v20 }
 0xa39   :  { %3515 = vmatprep.subr.bf16.mxu1 %v4695_v1  ;;  %3681 = vmatpush1.bf16.msra.mxu0 %v4733_v59 }
 0xa3a   :  { %3682 = vmatprep.subr.bf16.mxu0 %v4806_v44 }
 0xa3c   :  { %3516 = vmatpush1.bf16.msra.mxu1 %v4693_v27 }
 0xa3d   :  { %3517 = vmatprep.subr.bf16.mxu1 %v4698_v26  ;;  %3683 = vmatpush1.bf16.msra.mxu0 %v4734_v48 }
 0xa3e   :  { %3684 = vmatprep.subr.bf16.mxu0 %v4806_v44 }
 0xa40   :  { %3518 = vmatpush1.bf16.msra.mxu1 %v4696_v10 }
 0xa41   :  { %3519 = vmatprep.subr.bf16.mxu1 %v4701_v5  ;;  %3685 = vmatpush1.bf16.msra.mxu0 %v4735_v19 }
 0xa42   :  { %3686 = vmatprep.subr.bf16.mxu0 %v4806_v44 }
 0xa44   :  { %3520 = vmatpush1.bf16.msra.mxu1 %v4699_v52 }
 0xa45   :  { %3521 = vmatprep.subr.bf16.mxu1 %v4704_v22  ;;  %3687 = vmatpush1.bf16.msra.mxu0 %v4736_v4 }
 0xa46   :  { %3688 = vmatprep.subr.bf16.mxu0 %v4806_v44 }
 0xa48   :  { %3522 = vmatpush1.bf16.msra.mxu1 %v4702_v29 }
 0xa49   :  { %3523 = vmatprep.subr.bf16.mxu1 %v4707_v63  ;;  %3689 = vmatpush1.bf16.msra.mxu0 %v4737_v18 }
 0xa4a   :  { %3690 = vmatprep.subr.bf16.mxu0 %v4806_v44 }
 0xa4c   :  { %3524 = vmatpush1.bf16.msra.mxu1 %v4705_v40 }
 0xa4d   :  { %3525 = vmatprep.subr.bf16.mxu1 %v4710_v24  ;;  %3691 = vmatpush1.bf16.msra.mxu0 %v4738_v53  ;;  %v3973_v24 = vld [vmem:[%s6656_s16] ss:$0 sm:$0xff]  ;;  %s4813_s16 = smov [#allocation4]  }
 0xa4e   :  { %3692 = vmatprep.subr.bf16.mxu0 %v4806_v44  ;;  %s3748_s28 = sshll.u32 %s4813_s16, 4  ;;  %s3749_s28 = int_to_ptr.vmem [resolvable:$true] %s3748_s28 }
 0xa4f   :  { %s4756_s12 = scalar_lea.vmem %s3749_s28, 32  ;;  %p4761_p1 = scmp.lt.s32.totalorder %s3749_s28, %s3749_s28 }
 0xa50   :  { %3526 = vmatpush1.bf16.msra.mxu1 %v4708_v0  ;;  %p4757_p0 = scmp.ne.s32.totalorder %s3749_s28, %s4756_s12  ;;  %p4762_p2 = scmp.lt.s32.totalorder %s4756_s12, %s4756_s12 }
 0xa51   :  { %3527 = vmatprep.subr.bf16.mxu1 %v4713_v41  ;;  %3693 = vmatpush1.bf16.msra.mxu0 %v4739_v34 }
 0xa52   :  { %3694 = vmatprep.subr.bf16.mxu0 %v4806_v44  ;;  %p4763_p3 = por %p4762_p2, %p4761_p1 }
 0xa54   :  { %3528 = vmatpush1.bf16.msra.mxu1 %v4711_v16  ;;  %p4764_p4 = pnand %p4763_p3, %p4757_p0 }
 0xa55   :  { %3529 = vmatprep.subr.bf16.mxu1 %v4716_v42  ;;  %3695 = vmatpush1.bf16.msra.mxu0 %v4740_v8 }
 0xa56   :  { %3696 = vmatprep.subr.bf16.mxu0 %v4806_v44 }
 0xa58   :  { %3530 = vmatpush1.bf16.msra.mxu1 %v4714_v17 }
 0xa59   :  { %3531 = vmatprep.subr.bf16.mxu1 %v4719_v35  ;;  %3697 = vmatpush1.bf16.msra.mxu0 %v4741_v61 }
 0xa5a   :  { %3698 = vmatprep.subr.bf16.mxu0 %v4806_v44 }
 0xa5c   :  { %3532 = vmatpush1.bf16.msra.mxu1 %v4717_v37 }
 0xa5d   :  { %3533 = vmatprep.subr.bf16.mxu1 %v4722_v47  ;;  %3699 = vmatpush1.bf16.msra.mxu0 %v4742_v32 }
 0xa5e   :  { %3700 = vmatprep.subr.bf16.mxu0 %v4806_v44 }
 0xa60   :  { %3534 = vmatpush1.bf16.msra.mxu1 %v4720_v36 }
 0xa61   :  { %3535 = vmatprep.subr.bf16.mxu1 %v4725_v51  ;;  %3701 = vmatpush1.bf16.msra.mxu0 %v4743_v21 }
 0xa64   :  { %3536 = vmatpush1.bf16.msra.mxu1 %v4723_v30 }
 0xa65   :  { %3537 = vmatprep.subr.bf16.mxu1 %v4728_v50 }
 0xa68   :  { %3538 = vmatpush1.bf16.msra.mxu1 %v4726_v45 }
 0xa69   :  { %3539 = vmatprep.subr.bf16.mxu1 %v4731_v54 }
 0xa6c   :  { %3540 = vmatpush1.bf16.msra.mxu1 %v4729_v58 }
 0xa6f   :  { %3542 = vmatmul.mubr.bf16.vlgmr.msra.gmra.mrb[72].mxu1 %v2933_v11 }
 0xb06   :  { %v3461_v38 = vpop.f32.mrb[88].mxu0 }
 0xb07   :  { %v3463_v46 = vpop.f32.mrb[89].mxu0  ;;  %v3462_v44 = vadd.f32 %v3461_v38, %v2940_v6 }
 0xb08   :  { %v3465_v3 = vpop.f32.mrb[90].mxu0  ;;  %v3464_v15 = vadd.f32 %v3463_v46, %v2944_v25 }
 0xb09   :  { %v3466_v33 = vpop.f32.mrb[91].mxu0 }
 0xb42   :  { %v3543_v60 = vpop.f32.mrb[72].mxu1 }
 0xb43   :  { %v4277_v62 = vadd.f32 %v3543_v60, %v3462_v44  ;;  %v3545_v28 = vpop.f32.mrb[73].mxu1 }
 0xb44   :  { %v4279_v31 = vadd.f32 %v3545_v28, %v3464_v15  ;;  %v3547_v9 = vpop.f32.mrb[74].mxu1 }
 0xb45   :  { %v3550_v23 = vand.u32 2147483647, %v4277_v62  ;;  %v3548_v56 = vpop.f32.mrb[75].mxu1  ;;  %vm3558_vm6 = vcmp.ge.f32.partialorder %v4277_v62, 0.0 }
 0xb46   :  { %v3551_v14 = vand.u32 2147483647, %v4279_v31  ;;  %vm3559_vm5 = vcmp.ge.f32.partialorder %v4279_v31, 0.0 }
 0xb47   :  { %v3552_v55 = vsub.f32 0.0, %v3550_v23 }
 0xb48   :  { %v3553_v39 = vsub.f32 0.0, %v3551_v14 }
 0xb49   :  { %v3554_v57 = vmul.f32 1.442695, %v3552_v55 }
 0xb4a   :  { %v3556_v49 = vmul.f32 1.442695, %v3553_v39 }
 0xb4b   :  { %4744 = vpow2.f32 %v3554_v57 }
 0xb4c   :  { %4746 = vpow2.f32 %v3556_v49 }
 0xb55   :  { %v4745_v20 = vpop.eup %4744 }
 0xb56   :  { %v4747_v12 = vpop.eup %4746  ;;  %v3560_v1 = vadd.f32 1.0, %v4745_v20 }
 0xb57   :  { %v3561_v27 = vadd.f32 1.0, %v4747_v12 }
 0xb58   :  { %4748 = vrcp.f32 %v3560_v1 }
 0xb59   :  { %4750 = vrcp.f32 %v3561_v27 }
 0xb62   :  { %v4749_v26 = vpop.eup %4748 }
 0xb63   :  { %v4751_v10 = vpop.eup %4750  ;;  %v3566_v5 = vmul.f32 %v4749_v26, %v4745_v20 }
 0xb64   :  { %v3567_v52 = vmul.f32 %v4751_v10, %v4747_v12 }
 0xb65   :  { %v3568_v22 = vsel %vm3558_vm6, %v4749_v26, %v3566_v5 }
 0xb66   :  { %v3569_v29 = vsel %vm3559_vm5, %v4751_v10, %v3567_v52  ;;  %v3594_v40 = vpack.c.bf16 %v3568_v22, %v3568_v22 }
 0xb67   :  { %v3595_v63 = vpack.c.bf16 %v3569_v29, %v3569_v29 }
 0xb69   :  { %3986 = vmatprep.mubr.msk.bf16.mxu0 %vm6826_vm2, %v3595_v63 }
 0xb6a   :  { %3711 = vmatmul.mubr.bf16.vlgmr.msra.gmra.mrb[92].mxu0 %v3594_v40 }
 0xc3d   :  { %v3712_v0 = vpop.f32.mrb[92].mxu0 }
 0xc3e   :  { %v3713_v41 = vadd.f32 %v3973_v24, %v3712_v0  ;;  %v3714_v16 = vpop.f32.mrb[93].mxu0 }
 0xc3f   :  { %v3715_v42 = vpop.f32.mrb[94].mxu0 }
 0xc40   :  { %v3716_v17 = vpop.f32.mrb[95].mxu0  ;;  %v3720_v35 = vsel %vm3718_vm8, %v3713_v41, -inf  ;;  %3719 = vst.msk [vmem:[#allocation4] sm:$0x3] %vm3718_vm8, %v3713_v41 }
 0xc41   :  { %3721 = vmax.xlane.f32.xlu0 %v3720_v35 }
 0xcce   :  { %v3722_v37 = vpop.xlane.xlu0 %3721 }
 0xccf   :  { %v3723_v47 = vsub.f32 %v3713_v41, %v3722_v37 }
 0xcd1   :  { %v3724_v36 = vmul.f32 1.442695, %v3723_v47 }
 0xcd3   :  { %4752 = vpow2.f32 %v3724_v36 }
 0xcdd   :  { %v4753_v51 = vpop.eup %4752 }
 0xcde   :  { %v3726_v30 = vsel %vm3718_vm8, %v4753_v51, 0.0 }
 0xcdf   :  { %3727 = vadd.xlane.f32.xlu1 %v3726_v30 }
 0xce0   :  { %4767 = shalt.err (!%p4764_p4)
}
 0xce1   :  { %s4768_s13 = scalar_lea.hbm %s6658_s18, 32 }
 0xce2   :  { %p4769_p5 = scmp.ne.s32.totalorder %s6658_s18, %s4768_s13  ;;  %p4772_p6 = scmp.lt.u32.totalorder %s4768_s13, %s6658_s18 }
 0xce4   :  { %p4774_p7 = pnand %p4772_p6, %p4769_p5 }
 0xce6   :  { %4777 = shalt.err (!%p4774_p7)
}
 0xce7   :  { %3751 = dma.vmem_to_hbm [thread:$0]  %s3749_s28, 32, %s6658_s18, [#allocation5]  }
 0xce8   :  { %s4814_s24 = smov [#allocation2]  }
 0xce9   :  { %s3738_s5 = sshll.u32 %s4814_s24, 4  ;;  %s3739_s5 = int_to_ptr.vmem [resolvable:$true] %s3738_s5 }
 0xcea   :  { %s4778_s6 = scalar_lea.vmem %s3739_s5, 32  ;;  %p4783_p9 = scmp.lt.s32.totalorder %s3739_s5, %s3739_s5 }
 0xceb   :  { %p4779_p8 = scmp.ne.s32.totalorder %s3739_s5, %s4778_s6  ;;  %p4784_p10 = scmp.lt.s32.totalorder %s4778_s6, %s4778_s6 }
 0xced   :  { %p4785_p11 = por %p4784_p10, %p4783_p9 }
 0xcef   :  { %p4786_p12 = pnand %p4785_p11, %p4779_p8 }
 0xd6c   :  { %v3728_v50 = vpop.xlane.xlu1 %3727 }
 0xd6d   :  { %4754 = vrcp.f32 %v3728_v50 }
 0xd77   :  { %v4755_v45 = vpop.eup %4754 }
 0xd78   :  { %v3730_v54 = vmul.f32 %v4755_v45, %v4753_v51 }
 0xd7a   :  { %3731 = vst.msk [vmem:[#allocation2] sm:$0x3] %vm3718_vm8, %v3730_v54 }
 0xd7b   :  { %4789 = shalt.err (!%p4786_p12)
}
 0xd7c   :  { %s4790_s18 = scalar_lea.hbm %s6657_s17, 32 }
 0xd7d   :  { %p4791_p13 = scmp.ne.s32.totalorder %s6657_s17, %s4790_s18  ;;  %p4794_p0 = scmp.lt.u32.totalorder %s4790_s18, %s6657_s17 }
 0xd7f   :  { %p4796_p1 = pnand %p4794_p0, %p4791_p13 }
 0xd81   :  { %4799 = shalt.err (!%p4796_p1)
}
 0xd82   :  { %3741 = dma.vmem_to_hbm [thread:$0]  %s3739_s5, 32, %s6657_s17, [#allocation3]  }
 0xd83   :  { %4800 = dma.done.wait [#allocation3], 32  }
 0xd84   :  { %4801 = vsyncadd [#allocation3], 4294967264 }
 0xd85   :  { %4802 = dma.done.wait [#allocation5], 32  }
 0xd86   :  { %4803 = vsyncadd [#allocation5], 4294967264 }
 0xd87   :  { %3762 = vsyncpa [#allocation3], 1 }
 0xd88   :  { %3763 = vsyncpa [#allocation5], 1 }

</bundles_post_ra>
